<compile_context>
chip_gen: v7x
topology: tpu7x:2x2x1
jax: 0.10.0
libtpu: 0.0.40
codegen_flags: <defaults>
</compile_context>

<pallas_src>
import jax
import jax.numpy as jnp
from jax.experimental import pallas as pl
from jax.experimental.pallas import tpu as pltpu


def _round_up(x, m):
    return ((x + m - 1) // m) * m


def _pick_tile(padded_dim, max_tile, unit=128):
    """Largest multiple of `unit` that divides `padded_dim` and is <= max_tile."""
    q = padded_dim // unit
    best = 1
    for t in range(1, max(1, max_tile // unit) + 1):
        if q % t == 0:
            best = t
    return best * unit


def _los_head_kernel(x_ref, w_ref, b_ref, o_ref, acc_ref):
    # x_ref:  [tm, tk]  bf16 activations
    # w_ref:  [tk, tn]  bf16 weight, pre-transposed to [H, O] at init
    # b_ref:  [1,  tn]  f32 bias row (K-invariant, resident across the K axis)
    # o_ref:  [tm, tn]  f32 output tile
    # acc_ref:[tm, tn]  f32 accumulator scratch (persists across the K axis)
    k = pl.program_id(2)

    @pl.when(k == 0)
    def _():
        acc_ref[...] = jnp.zeros_like(acc_ref)

    acc_ref[...] += jnp.dot(
        x_ref[...], w_ref[...], preferred_element_type=jnp.float32
    )

    @pl.when(k == pl.num_programs(2) - 1)
    def _():
        o_ref[...] = (acc_ref[...] + b_ref[...]).astype(o_ref.dtype)


class LosHeadPallas:
    """Pallas TPU LosHead forward: Dropout(0) -> Linear -> Dropout(0) == x @ W^T + b."""

    def __init__(self, weight, bias, *, tm_max=512, tn_max=512, tk_max=1024):
        O, H = weight.shape
        assert bias.shape == (O,), "bias shape mismatch"
        self.H, self.O = H, O
        self.tm_max = tm_max

        # Keep f32 originals for the small-shape fallback path.
        self.w_f32 = jnp.asarray(weight, jnp.float32)
        self.b_f32 = jnp.asarray(bias, jnp.float32)

        # Tiny / lane-sparse shapes: masked partial stores + grid overhead make
        # a standalone pallas_call a loss; XLA's fused dot handles these.
        self.use_pallas = (O >= 128 and H >= 128)
        if not self.use_pallas:
            return

        # ---- one-time parameter preparation (never repeated per forward) ----
        Hp = _round_up(H, 128)
        Op = _round_up(O, 128)
        w_t = self.w_f32.T                                   # [H, O]
        w_t = jnp.pad(w_t, ((0, Hp - H), (0, Op - O)))       # zero pad is exact
        self.w_pad = w_t.astype(jnp.bfloat16)                # [Hp, Op] bf16
        self.b_pad = jnp.pad(self.b_f32, (0, Op - O)).reshape(1, Op)  # [1, Op] f32
        self.Hp, self.Op = Hp, Op

        self.tk = _pick_tile(Hp, tk_max)   # multiple of 128 (256-friendly when possible)
        self.tn = _pick_tile(Op, tn_max)

    def __call__(self, x):
        # Dropout(p=0.0) on both sides of the Linear is the identity -> pure affine map.
        assert x.ndim == 2 and x.shape[1] == self.H, "input shape mismatch"

        if not self.use_pallas:
            return x.astype(jnp.float32) @ self.w_f32.T + self.b_f32

        B = x.shape[0]
        H, O, Hp, Op, tk = self.H, self.O, self.Hp, self.Op, self.tk

        # M tiling: whole batch in one block when it fits -> weight streams
        # from HBM exactly once.  Only large batches get 512-row blocks.
        if B <= self.tm_max:
            tm, Bp = B, B
        else:
            tm = self.tm_max
            Bp = _round_up(B, tm)

        # v7x megacore: ensure at least one "parallel" axis has >= 2 blocks.
        tn = self.tn
        if Bp // tm == 1 and Op // tn == 1 and Op // 128 >= 2:
            tn = _pick_tile(Op, Op // 2)

        # Cast activations to bf16 for the MXU; zero K-pad is exact.
        xb = x.astype(jnp.bfloat16)
        if Hp != H or Bp != B:
            xb = jnp.pad(xb, ((0, Bp - B), (0, Hp - H)))

        grid = (Bp // tm, Op // tn, Hp // tk)
        grid_m, grid_n, _ = grid

        cost = pl.CostEstimate(
            flops=2 * B * H * O,
            transcendentals=0,
            bytes_accessed=(
                Bp * Hp * 2 * grid_n      # x (bf16), re-read once per N block
                + Hp * Op * 2 * grid_m    # W (bf16), re-read once per M block
                + Op * 4 * grid_m         # bias (f32)
                + Bp * Op * 4             # output (f32)
            ),
        )

        out = pl.pallas_call(
            _los_head_kernel,
            out_shape=jax.ShapeDtypeStruct((Bp, Op), jnp.float32),
            grid_spec=pltpu.PrefetchScalarGridSpec(
                num_scalar_prefetch=0,
                grid=grid,
                in_specs=[
                    pl.BlockSpec((tm, tk), lambda i, j, k: (i, k)),   # x
                    pl.BlockSpec((tk, tn), lambda i, j, k: (k, j)),   # W^T [Hp, Op]
                    pl.BlockSpec((1, tn), lambda i, j, k: (0, j)),    # bias (K-invariant)
                ],
                out_specs=pl.BlockSpec((tm, tn), lambda i, j, k: (i, j)),
                scratch_shapes=[pltpu.VMEM((tm, tn), jnp.float32)],
            ),
            compiler_params=pltpu.CompilerParams(
                dimension_semantics=("parallel", "parallel", "arbitrary"),
                vmem_limit_bytes=32 * 1024 * 1024,
            ),
            cost_estimate=cost,
        )(xb, self.w_pad, self.b_pad)

        if (Bp, Op) != (B, O):
            out = out[:B, :O]
        return out

    # TODO(synk): if drop > 0 were ever required, add pltpu.prng_seed /
    # pltpu.prng_random_bits masking inside the kernel; act_layer is never
    # applied in the reference forward(), so it is intentionally omitted.


def _ref_f32(x, w, b):
    return x @ w.T + b


def _ref_bf16(x, w, b):
    # Reference that matches the kernel's bf16-input / f32-accumulate numerics.
    xb = x.astype(jnp.bfloat16).astype(jnp.float32)
    wb = w.astype(jnp.bfloat16).astype(jnp.float32)
    return xb @ wb.T + b


if __name__ == "__main__":
    key = jax.random.PRNGKey(0)

    # --- Small shapes implied by the module: batch=2, hidden_dim=32, output_dim=8 ---
    # (Takes the documented small-shape fallback: exact f32 path.)
    B, HIDDEN, OUT = 2, 32, 8
    kx, kw, kb = jax.random.split(key, 3)
    x = jax.random.normal(kx, (B, HIDDEN), dtype=jnp.float32)
    w = jax.random.normal(kw, (OUT, HIDDEN), dtype=jnp.float32) * 0.02
    b = jax.random.normal(kb, (OUT,), dtype=jnp.float32) * 0.02

    head = LosHeadPallas(w, b)
    y = head(x)
    jax.block_until_ready(y)
    assert y.shape == (B, OUT)
    assert jnp.allclose(y, _ref_f32(x, w, b), atol=1e-4, rtol=1e-4), \
        "small-shape (fallback) mismatch"

    # --- Larger shapes: exercise the tiled Pallas path (multi-block N, K accum) ---
    B2, H2, O2 = 384, 2048, 512
    kx2, kw2, kb2 = jax.random.split(jax.random.PRNGKey(1), 3)
    x2 = jax.random.normal(kx2, (B2, H2), dtype=jnp.float32)
    w2 = jax.random.normal(kw2, (O2, H2), dtype=jnp.float32) * 0.02
    b2 = jax.random.normal(kb2, (O2,), dtype=jnp.float32) * 0.02

    head2 = LosHeadPallas(w2, b2)
    y2 = head2(x2)
    jax.block_until_ready(y2)
    assert y2.shape == (B2, O2)
    assert jnp.allclose(y2, _ref_bf16(x2, w2, b2), atol=2e-2, rtol=2e-2), \
        "tiled-shape mismatch vs bf16 reference"

    # --- Ragged shapes: exercise init-time N/K padding + output slicing ---
    B3, H3, O3 = 100, 200, 300
    kx3, kw3, kb3 = jax.random.split(jax.random.PRNGKey(2), 3)
    x3 = jax.random.normal(kx3, (B3, H3), dtype=jnp.float32)
    w3 = jax.random.normal(kw3, (O3, H3), dtype=jnp.float32) * 0.02
    b3 = jax.random.normal(kb3, (O3,), dtype=jnp.float32) * 0.02

    head3 = LosHeadPallas(w3, b3)
    y3 = head3(x3)
    jax.block_until_ready(y3)
    assert y3.shape == (B3, O3)
    assert jnp.allclose(y3, _ref_bf16(x3, w3, b3), atol=2e-2, rtol=2e-2), \
        "ragged-shape mismatch vs bf16 reference"

    print("KERNEL_OK")
</pallas_src>

<mosaic_0001>
module attributes {stable_mosaic.version = 11 : i64} {
  func.func @_los_head_kernel(%arg0: i32, %arg1: i32, %arg2: i32, %arg3: memref<384x1024xbf16, #tpu.memory_space<vmem>>, %arg4: memref<1024x256xbf16, #tpu.memory_space<vmem>>, %arg5: memref<1x256xf32, #tpu.memory_space<vmem>>, %arg6: memref<384x256xf32, #tpu.memory_space<vmem>>, %arg7: memref<384x256xf32, #tpu.memory_space<vmem>>) attributes {dimension_semantics = [#tpu.dimension_semantics<parallel>, #tpu.dimension_semantics<parallel>, #tpu.dimension_semantics<arbitrary>], iteration_bounds = array<i64: 1, 2, 2>, scalar_prefetch = 0 : i64, scratch_operands = 1 : i64, tpu.core_type = #tpu.core_type<tc>, window_params = [{transform_indices = @transform_0, window_bounds = array<i64: 384, 1024>}, {transform_indices = @transform_1, window_bounds = array<i64: 1024, 256>}, {transform_indices = @transform_2, window_bounds = array<i64: 1, 256>}, {transform_indices = @transform_3, window_bounds = array<i64: 384, 256>}]} {
    %c0_i32 = arith.constant 0 : i32
    %0 = arith.cmpi eq, %arg2, %c0_i32 : i32
    %1 = arith.extui %0 : i1 to i32
    %c0_i32_0 = arith.constant 0 : i32
    %2 = arith.cmpi ne, %1, %c0_i32_0 : i32
    scf.if %2 {
      %cst_9 = arith.constant 0.000000e+00 : f32
      %12 = vector.broadcast %cst_9 : f32 to vector<384x256xf32>
      %c0_10 = arith.constant 0 : index
      %c0_11 = arith.constant 0 : index
      %13 = vector.load %arg7[%c0_10, %c0_11] : memref<384x256xf32, #tpu.memory_space<vmem>>, vector<384x256xf32>
      tpu.vector_store %arg7[%c0_10, %c0_11], %12 {strides = array<i32>} : memref<384x256xf32, #tpu.memory_space<vmem>>, vector<384x256xf32>,
    } else {
    }
    %c0 = arith.constant 0 : index
    %c0_1 = arith.constant 0 : index
    %3 = vector.load %arg7[%c0, %c0_1] : memref<384x256xf32, #tpu.memory_space<vmem>>, vector<384x256xf32>
    %c0_2 = arith.constant 0 : index
    %c0_3 = arith.constant 0 : index
    %4 = vector.load %arg3[%c0_2, %c0_3] : memref<384x1024xbf16, #tpu.memory_space<vmem>>, vector<384x1024xbf16>
    %c0_4 = arith.constant 0 : index
    %c0_5 = arith.constant 0 : index
    %5 = vector.load %arg4[%c0_4, %c0_5] : memref<1024x256xbf16, #tpu.memory_space<vmem>>, vector<1024x256xbf16>
    %cst = arith.constant dense<0.000000e+00> : vector<384x256xf32>
    %6 = tpu.matmul %4, %5, %cst {dimension_numbers = #tpu.dot_dimension_numbers<[1], [0], [0], [1], [0, 0, 1, 1], [], []>} : vector<384x1024xbf16>, vector<1024x256xbf16>, vector<384x256xf32> -> vector<384x256xf32>
    %7 = arith.addf %3, %6 : vector<384x256xf32>
    %c0_6 = arith.constant 0 : index
    %c0_7 = arith.constant 0 : index
    %8 = vector.load %arg7[%c0_6, %c0_7] : memref<384x256xf32, #tpu.memory_space<vmem>>, vector<384x256xf32>
    tpu.vector_store %arg7[%c0_6, %c0_7], %7 {strides = array<i32>} : memref<384x256xf32, #tpu.memory_space<vmem>>, vector<384x256xf32>,
    %c1_i32 = arith.constant 1 : i32
    %9 = arith.cmpi eq, %arg2, %c1_i32 : i32
    %10 = arith.extui %9 : i1 to i32
    %c0_i32_8 = arith.constant 0 : i32
    %11 = arith.cmpi ne, %10, %c0_i32_8 : i32
    scf.if %11 {
      %c0_9 = arith.constant 0 : index
      %c0_10 = arith.constant 0 : index
      %12 = vector.load %arg7[%c0_9, %c0_10] : memref<384x256xf32, #tpu.memory_space<vmem>>, vector<384x256xf32>
      %c0_11 = arith.constant 0 : index
      %c0_12 = arith.constant 0 : index
      %13 = vector.load %arg5[%c0_11, %c0_12] : memref<1x256xf32, #tpu.memory_space<vmem>>, vector<1x256xf32>
      %14 = vector.broadcast %13 : vector<1x256xf32> to vector<384x256xf32>
      %15 = arith.addf %12, %14 : vector<384x256xf32>
      %c0_13 = arith.constant 0 : index
      %c0_14 = arith.constant 0 : index
      %16 = vector.load %arg6[%c0_13, %c0_14] : memref<384x256xf32, #tpu.memory_space<vmem>>, vector<384x256xf32>
      tpu.vector_store %arg6[%c0_13, %c0_14], %15 {strides = array<i32>} : memref<384x256xf32, #tpu.memory_space<vmem>>, vector<384x256xf32>,
    } else {
    }
    return
  }
  func.func @transform_0(%arg0: i32, %arg1: i32, %arg2: i32) -> (i32, i32) {
    %c0_i32 = arith.constant 0 : i32
    return %arg0, %arg2 : i32, i32
  }
  func.func @transform_1(%arg0: i32, %arg1: i32, %arg2: i32) -> (i32, i32) {
    %c0_i32 = arith.constant 0 : i32
    return %arg2, %arg1 : i32, i32
  }
  func.func @transform_2(%arg0: i32, %arg1: i32, %arg2: i32) -> (i32, i32) {
    %c0_i32 = arith.constant 0 : i32
    %c0_i32_0 = arith.constant 0 : i32
    return %c0_i32, %arg1 : i32, i32
  }
  func.func @transform_3(%arg0: i32, %arg1: i32, %arg2: i32) -> (i32, i32) {
    %c0_i32 = arith.constant 0 : i32
    return %arg0, %arg1 : i32, i32
  }
}

</mosaic_0001>

<bundles_post_ra>
// kernel: tpu_custom_call.1
= control target key start
LH: loop header
LB: loop body
LE: loop exit
PB: predicated region body
PF: predicated region fallthrough
CT: control target
= control target key end

     0   :  { %s6461_s0 = inlined_call_operand.hbm [shape: bf16[384,2048], index: 0, kind: input, shape index: {}]   ;;  %s6462_s1 = inlined_call_operand.hbm [shape: bf16[2048,512], index: 1, kind: input, shape index: {}]   ;;  %s6463_s2 = inlined_call_operand.hbm [shape: f32[1,512], index: 2, kind: input, shape index: {}]   ;;  %s6464_s3 = inlined_call_operand.hbm [shape: f32[384,512], index: 3, kind: output, shape index: {}]  }
   0x1   :  { %6477 = sst [smem:[#allocation21_spill]] %s6461_s0 }
   0x2   :  { %6478 = sst [smem:[#allocation22_spill]] %s6462_s1 }
   0x3   :  { %6479 = sst [smem:[#allocation23_spill]] %s6463_s2 }
   0x4   :  { %6480 = sst [smem:[#allocation24_spill]] %s6464_s3 }
   0x5   :  { %8 = vsyncpa [#allocation4], 0 }
   0x6   :  { %10 = vsyncpa [#allocation4 + $0x1], 0 }
   0x7   :  { %11 = vsyncpa [#allocation7], 0 }
   0x8   :  { %13 = vsyncpa [#allocation7 + $0x1], 0 }
   0x9   :  { %14 = vsyncpa [#allocation5], 0 }
   0xa   :  { %16 = vsyncpa [#allocation5 + $0x1], 0  ;;  %s5418_s12 = smov 0   ;;  %s5420_s13 = smov 0  }
   0xb   :  { %s5422_s14 = smov 0   ;;  %s5424_s15 = smov 0  }
   0xc   :  { %s5426_s16 = smov 0   ;;  %s5428_s17 = smov 0  }
   0xd   :  { %s5430_s18 = smov 0   ;;  %s5432_s19 = smov 0  }
   0xe   :  { %s5434_s20 = smov 0   ;;  %s5436_s21 = smov 0  }
   0xf   :  { %s5438_s22 = smov 0   ;;  %s5440_s23 = smov 0  }
  0x10   :  { %s5442_s24 = smov 0   ;;  %s5444_s25 = smov 0  }
  0x11 LB: > { %6481 = sst [smem:[#allocation14_spill]] %s5330_s12  ;;  %s34_s26 = sadd.s32 1, %s5374_s23  ;;  %s5382_s25 = sphi %s5444_s25, %s22_s25   ;;  %s5378_s24 = sphi %s5442_s24, %s6525_s24   ;;  %s5374_s23 = sphi %s5440_s23, %s6536_s23   ;;  %s5370_s22 = sphi %s5438_s22, %s6523_s22   ;;  %s5366_s21 = sphi %s5436_s21, %s6535_s21   ;;  %s5362_s20 = sphi %s5434_s20, %s6534_s20   ;;  %s5358_s19 = sphi %s5432_s19, %s6533_s19   ;;  %s5354_s18 = sphi %s5430_s18, %s6532_s18   ;;  %s5350_s17 = sphi %s5428_s17, %s6531_s17   ;;  %s5346_s16 = sphi %s5426_s16, %s6530_s16   ;;  %s5342_s15 = sphi %s5424_s15, %s6529_s15   ;;  %s5338_s14 = sphi %s5422_s14, %s6528_s14   ;;  %s5334_s13 = sphi %s5420_s13, %s6527_s13   ;;  %s5330_s12 = sphi %s5418_s12, %s6526_s12  }
  0x12   : > { %6482 = sst [smem:[#allocation15_spill]] %s5342_s15  ;;  %s37_s27 = sadd.s32 1, %s5378_s24 }
  0x13   : > { %6483 = sst [smem:[#allocation16_spill]] %s5366_s21  ;;  %p35_p0 = scmp.ge.s32.totalorder %s34_s26, 2 }
  0x14   : > { %6484 = sst [smem:[#allocation17_spill]] %s5370_s22  ;;  %p6470_p1 = scmp.eq.s32.totalorder %s5382_s25, 0 }
  0x15   : > { %6485 = sst [smem:[#allocation18_spill]] %s5378_s24  ;;  %s78_s28 = sadd.s32 1, %s5350_s17 }
  0x16   : > { %p85_p2 = scmp.ne.s32.totalorder %s5350_s17, %s5346_s16  ;;  %s6538_s26 = smov (%p35_p0, %s34_s26), 0 }
  0x17   : > { %6486 = sst [smem:[#allocation19_spill]] %s6538_s26  ;;  %s6540_s27 = smov (!%p35_p0, %s37_s27), %s5378_s24 }
  0x18   : > { %s5499_s29 = ssub.s32 %s5374_s23, %s6538_s26  ;;  %p5503_p3 = por %p85_p2, %p6470_p1 }
  0x19   : > { %p39_p4 = scmp.ge.s32.totalorder %s6540_s27, 2  ;;  %p6469_p7 = scmp.lt.s32.totalorder %s5382_s25, 4 }
  0x1a   : > { %s4505_s4 = sshll.u32 %s5374_s23, 9  ;;  %s193_s6 = sand.u32 1, %s5382_s25  }
  0x1b   : > { %s6542_s27 = smov (%p39_p4, %s6540_s27), 0  ;;  %s195_s8 = sand.u32 1, %s5350_s17  }
  0x1c   : > { %6488 = sst [smem:[#allocation20_spill]] %s6542_s27  ;;  %s5516_s5 = ssub.s32 %s5378_s24, %s6542_s27 }
  0x1d   : > { %s75_s7 = sor.u32 %s5516_s5, %s5499_s29  ;;  %s4168_s9 = sshll.u32 %s195_s8, 10 }
  0x1e   : > { %p76_p8 = scmp.eq.s32.totalorder %s75_s7, 0  ;;  %s4170_s10 = sshll.u32 %s5378_s24, 1 }
  0x1f   : > { %s204_s26 = sadd.s32 %s4505_s4, %s4170_s10  ;;  %s197_s22 = scalar_lea.vmem [#allocation6], %s4168_s9 }
  0x20   : > { %s5524_s11 = scalar_select %p76_p8, %s5350_s17, %s78_s28  }
  0x21   : > { %s4172_s3 = sshll.u32 %s204_s26, 6  ;;  %s207_s21 = sshll.u32 %s197_s22, 4  ;;  %s5533_s21 = int_to_ptr.vmem [resolvable:$true] %s207_s21 }
  0x22   : > { %s6489_s1 = sld [smem:[#allocation22_spill]]  ;;  %p5539_p9 = pnand %p6469_p7, %p5503_p3 }
  0x23   : > { %p4176_p10 = scmp.ge.s32.totalorder %s5382_s25, 1  ;;  %s5544_s22 = scalar_lea.sflag [#allocation7], %s193_s6 }
  0x24   : > { %p5140_p12 = pneg %p5539_p9 }
  0x28   : > { %s5531_s15 = scalar_lea.hbm %s6489_s1, %s4172_s3  ;;  %s5143_s26 = scalar_lea.hbm %s6489_s1, 65536 }
  0x29   : > { %s5138_s2 = scalar_lea.hbm %s5531_s15, 16384  ;;  %p5144_p2 = scmp.lt.u32.totalorder %s5531_s15, %s6489_s1 }
  0x2a   : > { %p5139_p11 = scmp.ne.s32.totalorder %s5531_s15, %s5138_s2  ;;  %p5145_p3 = scmp.lt.u32.totalorder %s5143_s26, %s5138_s2 }
  0x2b   : > { %p5147_p8 = scmp.lt.u32.totalorder %s5138_s2, %s5531_s15 }
  0x2c   : > { %p5141_p13 = pnand %p5140_p12, %p5139_p11  ;;  %p5146_p4 = por %p5145_p3, %p5144_p2 }
  0x2e   : > { %p5142_p0 = pneg %p5141_p13  ;;  %p5148_p6 = por %p5147_p8, %p5146_p4 }
  0x30   : > { %p5149_p7 = pnand %p5148_p6, %p5142_p0 }
  0x32   : > { %5152 = shalt.err (!%p5149_p7)
}
  0x33   : > { %s5153_s6 = scalar_lea.vmem %s5533_s21, 16384  ;;  %s5384_s8 = smov [#allocation6]  }
  0x34   : > { %p5154_p11 = scmp.ne.s32.totalorder %s5533_s21, %s5153_s6  ;;  %s5158_s9 = sshll.u32 %s5384_s8, 4  ;;  %s5159_s9 = int_to_ptr.vmem [resolvable:$false] %s5158_s9 }
  0x35   : > { %s5160_s10 = scalar_lea.vmem %s5159_s9, 32768  ;;  %p5161_p5 = scmp.lt.s32.totalorder %s5533_s21, %s5159_s9 }
  0x36   : > { %p5156_p13 = pnand %p5154_p11, %p5140_p12  ;;  %p5162_p2 = scmp.lt.s32.totalorder %s5160_s10, %s5153_s6 }
  0x38   : > { %p5157_p1 = pneg %p5156_p13  ;;  %p5163_p3 = por %p5162_p2, %p5161_p5 }
  0x3a   : > { %p5164_p4 = pnand %p5163_p3, %p5157_p1 }
  0x3c   : > { %5167 = shalt.err (!%p5164_p4)
}
  0x3d   : > { %s5385_s2 = smov 256   ;;  %s5386_s3 = smov 128  }
  0x3e   : > { %s5387_s12 = smov 8   ;;  %p234_p1 = scmp.lt.s32.totalorder %s5382_s25, 5 }
  0x3f   : > { %4814 = dma.hbm_to_vmem [thread:$0]  (!%p5539_p9), %s5531_s15, 16384, %s5533_s21, %s5544_s22, %s5385_s2, %s5386_s3, %s5387_s12  }
  0x40   : > { %p5575_p5 = pnand %p4176_p10, %p234_p1  ;;  %s50_s30 = sadd.s32 1, %s5362_s20 }
  0x41   : > { %p57_p6 = scmp.ne.s32.totalorder %s5362_s20, %s5358_s19  ;;  %p6492_p7 = scmp.eq.s32.totalorder %s5499_s29, 0 }
  0x42   : > { %s6491_s26 = scalar_select %p5575_p5, 1, 0 }
  0x43   : > { %s5585_s7 = scalar_select %p6492_p7, %s5362_s20, %s50_s30  }
  0x44   : > { %p6493_p12 = scmp.eq.s32.totalorder %s5382_s25, 0  ;;  %s169_s6 = sand.u32 1, %s5362_s20  }
  0x45   : > { %s6494_s0 = sld [smem:[#allocation21_spill]]  ;;  %s4797_s21 = smul.u32 1536, %s169_s6 }
  0x46   : > { %p59_p0 = por %p6493_p12, %p57_p6  ;;  %p6495_p9 = scmp.lt.s32.totalorder %s5382_s25, 4 }
  0x47   : > { %s173_s28 = scalar_lea.vmem [#allocation3], %s4797_s21  ;;  %s5607_s2 = scalar_lea.sflag [#allocation4], %s169_s6 }
  0x48   : > { %p5601_p10 = pnand %p6495_p9, %p59_p0  ;;  %s183_s10 = sshll.u32 %s173_s28, 4  ;;  %s5605_s10 = int_to_ptr.vmem [resolvable:$true] %s183_s10 }
  0x4a   : > { %p5170_p13 = pneg %p5601_p10 }
  0x4b   : > { %s5597_s15 = scalar_lea.hbm %s6494_s0, %s4505_s4  ;;  %s5173_s30 = scalar_lea.hbm %s6494_s0, 49152 }
  0x4c   : > { %s5168_s4 = scalar_lea.hbm %s5597_s15, 24576  ;;  %p5174_p4 = scmp.lt.u32.totalorder %s5597_s15, %s6494_s0 }
  0x4d   : > { %p5169_p11 = scmp.ne.s32.totalorder %s5597_s15, %s5168_s4  ;;  %p5175_p1 = scmp.lt.u32.totalorder %s5173_s30, %s5168_s4 }
  0x4e   : > { %p5177_p7 = scmp.lt.u32.totalorder %s5168_s4, %s5597_s15 }
  0x4f   : > { %p5171_p2 = pnand %p5170_p13, %p5169_p11  ;;  %p5176_p6 = por %p5175_p1, %p5174_p4 }
  0x51   : > { %p5172_p3 = pneg %p5171_p2  ;;  %p5178_p12 = por %p5177_p7, %p5176_p6 }
  0x53   : > { %p5179_p0 = pnand %p5178_p12, %p5172_p3 }
  0x55   : > { %5182 = shalt.err (!%p5179_p0)
}
  0x56   : > { %s5183_s6 = scalar_lea.vmem %s5605_s10, 24576  ;;  %s5388_s21 = smov [#allocation3]  }
  0x57   : > { %p5184_p9 = scmp.ne.s32.totalorder %s5605_s10, %s5183_s6  ;;  %s5188_s28 = sshll.u32 %s5388_s21, 4  ;;  %s5189_s28 = int_to_ptr.vmem [resolvable:$false] %s5188_s28 }
  0x58   : > { %s5190_s3 = scalar_lea.vmem %s5189_s28, 49152  ;;  %p5191_p8 = scmp.lt.s32.totalorder %s5605_s10, %s5189_s28 }
  0x59   : > { %p5186_p11 = pnand %p5184_p9, %p5170_p13  ;;  %p5192_p4 = scmp.lt.s32.totalorder %s5190_s3, %s5183_s6 }
  0x5b   : > { %p5187_p2 = pneg %p5186_p11  ;;  %p5193_p1 = por %p5192_p4, %p5191_p8 }
  0x5d   : > { %p5194_p6 = pnand %p5193_p1, %p5187_p2 }
  0x5f   : > { %5197 = shalt.err (!%p5194_p6)
}
  0x60   : > { %s5389_s4 = smov 1024   ;;  %s6497_s12 = sld [smem:[#allocation15_spill]] }
  0x61   : > { %s6498_s30 = sld [smem:[#allocation14_spill]]  ;;  %s5390_s8 = smov 512  }
  0x62   : > { %s5391_s9 = smov 32   ;;  %s5636_s6 = sadd.s32 4294967295, %s5382_s25  }
  0x63   : > { %4811 = dma.hbm_to_vmem [thread:$0]  (!%p5601_p10), %s5597_s15, 24576, %s5605_s10, %s5607_s2, %s5389_s4, %s5390_s8, %s5391_s9  }
  0x64   : > { %s4163_s21 = sadd.s32 4294967294, %s5382_s25   ;;  %p64_p8 = scmp.eq.s32.totalorder %s5636_s6, 0 }
  0x65   : > { %p102_p13 = scmp.eq.s32.totalorder %s5516_s5, 0  ;;  %s104_s28 = sadd.s32 1, %s5338_s14 }
  0x66   : > { %p111_p3 = scmp.ne.s32.totalorder %s5338_s14, %s5334_s13  ;;  %p6499_p7 = scmp.ne.s32.totalorder %s5358_s19, %s5354_s18 }
  0x67   : > { %p6501_p0 = scmp.ne.s32.totalorder %s5346_s16, %s6497_s12  ;;  %p6503_p10 = scmp.eq.s32.totalorder %s5382_s25, 0 }
  0x68   : > { %p5647_p12 = por %p64_p8, %p6499_p7  ;;  %p117_p2 = scmp.ne.s32.totalorder %s5334_s13, %s6498_s30 }
  0x69   : > { %p5654_p9 = por %p6501_p0, %p64_p8  ;;  %p5663_p11 = por %p111_p3, %p6503_p10 }
  0x6a   : > { %s6500_s3 = scalar_select %p5647_p12, 1, 0 }
  0x6b   : > { %s6502_s29 = scalar_select %p5654_p9, 1, 0 }
  0x6c   : > { %s5659_s15 = scalar_select %p102_p13, %s5338_s14, %s104_s28  }
  0x6d   : > { %p143_p4 = scmp.eq.s32.totalorder %s5636_s6, 3  ;;  %p149_p1 = scmp.eq.s32.totalorder %s4163_s21, 3 }
  0x6e   : > { %p5670_p6 = por %p117_p2, %p64_p8  ;;  %s219_s5 = sand.u32 1, %s5338_s14  }
  0x6f   : > { %p5675_p7 = por %p143_p4, %p111_p3  ;;  %p5679_p13 = por %p149_p1, %p117_p2 }
  0x70   : > { %s6505_s18 = scalar_select %p5670_p6, 1, 0 }
  0x71   : > { %s6506_s2 = scalar_select %p5675_p7, 1, 0 }
  0x72   : > { %s6507_s4 = scalar_select %p5679_p13, 1, 0 }
  0x73   : > { %s4173_s12 = sshll.u32 %s219_s5, 1  ;;  %s4507_s8 = sshll.u32 %s5378_s24, 5 }
  0x74   : > { %s6508_s30 = sld [smem:[#allocation23_spill]]  ;;  %s221_s21 = scalar_lea.vmem [#allocation8], %s4173_s12 }
  0x75   : > { %s229_s1 = sshll.u32 %s221_s21, 4  ;;  %p6509_p8 = scmp.lt.s32.totalorder %s5382_s25, 4  ;;  %s230_s1 = int_to_ptr.vmem [resolvable:$true] %s229_s1 }
  0x77   : > { %p5693_p3 = pnand %p6509_p8, %p5663_p11 }
  0x79   : > { %p5200_p10 = pneg %p5693_p3 }
  0x7a   : > { %s5687_s0 = scalar_lea.hbm %s6508_s30, %s4507_s8  ;;  %s5203_s10 = scalar_lea.hbm %s6508_s30, 64 }
  0x7b   : > { %s5198_s5 = scalar_lea.hbm %s5687_s0, 32  ;;  %p5204_p11 = scmp.lt.u32.totalorder %s5687_s0, %s6508_s30 }
  0x7c   : > { %p5199_p0 = scmp.ne.s32.totalorder %s5687_s0, %s5198_s5  ;;  %p5205_p1 = scmp.lt.u32.totalorder %s5203_s10, %s5198_s5 }
  0x7d   : > { %p5207_p13 = scmp.lt.u32.totalorder %s5198_s5, %s5687_s0 }
  0x7e   : > { %p5201_p2 = pnand %p5200_p10, %p5199_p0  ;;  %p5206_p8 = por %p5205_p1, %p5204_p11 }
  0x80   : > { %p5202_p4 = pneg %p5201_p2  ;;  %p5208_p7 = por %p5207_p13, %p5206_p8 }
  0x82   : > { %p5209_p6 = pnand %p5208_p7, %p5202_p4 }
  0x84   : > { %5212 = shalt.err (!%p5209_p6)
}
  0x85   : > { %s5213_s21 = scalar_lea.vmem %s230_s1, 32  ;;  %s5392_s24 = smov [#allocation8]  }
  0x86   : > { %p5214_p9 = scmp.ne.s32.totalorder %s230_s1, %s5213_s21  ;;  %s5218_s8 = sshll.u32 %s5392_s24, 4  ;;  %s5219_s8 = int_to_ptr.vmem [resolvable:$false] %s5218_s8 }
  0x87   : > { %s5220_s12 = scalar_lea.vmem %s5219_s8, 64  ;;  %p5221_p12 = scmp.lt.s32.totalorder %s230_s1, %s5219_s8 }
  0x88   : > { %p5216_p0 = pnand %p5214_p9, %p5200_p10  ;;  %p5222_p5 = scmp.lt.s32.totalorder %s5220_s12, %s5213_s21 }
  0x8a   : > { %p5217_p2 = pneg %p5216_p0  ;;  %p5223_p1 = por %p5222_p5, %p5221_p12 }
  0x8c   : > { %p5224_p11 = pnand %p5223_p1, %p5217_p2 }
  0x8e   : > { %5227 = shalt.err (!%p5224_p11)
}
  0x8f   : > { %4817 = dma.hbm_to_vmem [thread:$0]  (!%p5693_p3), %s5687_s0, 32, %s230_s1, %s5544_s22  }
  0x90   : > { %p6511_p6 = scmp.ne.s32.totalorder %s6491_s26, 0 }
  0x91   : > { %s240_s5 = sand.u32 (!%p6511_p6), 1, %s5358_s19   ;;  %p6512_p9 = scmp.ne.s32.totalorder (!%p6511_p6), %s6500_s3, 0 }
  0x92   : > { %238 = sbr.rel (%p6511_p6) target bundleno = 952 (0x3b8), region = 32  ;;  %s241_s24 = scalar_lea.sflag (!%p6511_p6), [#allocation4], %s240_s5 }
  0x93   : > { %s4798_s10 = smul.u32 (!%p6511_p6), 1536, %s240_s5 }
  0x95   : > { %s5722_s9 = scalar_lea.vmem (!%p6511_p6), [#allocation3], %s4798_s10 }
  0x99   : > { %5313 = dma.done.wait (%p6512_p9), %s241_s24, 24576  }
  0x9a   : > { %5315 = vsyncadd (%p6512_p9), %s241_s24, 4294942720  ;;  %s249_s27 = sand.u32 1, %s5636_s6   ;;  %s251_s0 = sand.u32 1, %s5346_s16  }
  0x9b   : > { %s4177_s1 = sshll.u32 %s251_s0, 10  ;;  %s250_s22 = scalar_lea.sflag [#allocation7], %s249_s27 }
  0x9c   : > { %s5730_s26 = scalar_lea.vmem [#allocation6], %s4177_s1  ;;  %p6513_p5 = scmp.ne.s32.totalorder %s6502_s29, 0 }
  0x9e   : > { %5317 = dma.done.wait (%p6513_p5), %s250_s22, 16384  }
  0x9f   : > { %5319 = vsyncadd (%p6513_p5), %s250_s22, 4294950912  ;;  %s5737_s28 = sand.u32 1, %s5334_s13   ;;  %p6514_p12 = scmp.ne.s32.totalorder %s6505_s18, 0 }
  0xa0   : > { %s4178_s3 = sshll.u32 %s5737_s28, 1 }
  0xa1   : > { %s5740_s21 = scalar_lea.vmem [#allocation8], %s4178_s3 }
  0xa2   : > { %5321 = dma.done.wait (%p6514_p12), %s250_s22, 32  }
  0xa3   : > { %5323 = vsyncadd (%p6514_p12), %s250_s22, 4294967264  ;;  %s4799_s6 = smul.u32 768, %s5737_s28  ;;  %s6515_s12 = sld [smem:[#allocation16_spill]] }
  0xa5   : > { %s5747_s8 = scalar_lea.vmem [#allocation9], %s4799_s6 }
  0xa9   : > { %p4179_p7 = scmp.ne.s32.totalorder %s6515_s12, 0 }
  0xaa   : > { %v5393_v0 = vmov (!%p4179_p7), 0.0  }
  0xab   : > { %305 = sbr.rel (%p4179_p7) target bundleno = 219 (0xdb), region = 48  ;;  %306 = vst [vmem:[#allocation2] sm:$0xff] (!%p4179_p7), %v5393_v0  ;;  %307 = vst [vmem:[#allocation2 + $0x8] sm:$0xff] (!%p4179_p7), %v5393_v0 }
  0xac   : > { %308 = vst [vmem:[#allocation2 + $0x10] sm:$0xff] (!%p4179_p7), %v5393_v0  ;;  %309 = vst [vmem:[#allocation2 + $0x18] sm:$0xff] (!%p4179_p7), %v5393_v0 }
  0xad   : > { %310 = vst [vmem:[#allocation2 + $0x20] sm:$0xff] (!%p4179_p7), %v5393_v0  ;;  %311 = vst [vmem:[#allocation2 + $0x28] sm:$0xff] (!%p4179_p7), %v5393_v0 }
  0xae   : > { %312 = vst [vmem:[#allocation2 + $0x30] sm:$0xff] (!%p4179_p7), %v5393_v0  ;;  %313 = vst [vmem:[#allocation2 + $0x38] sm:$0xff] (!%p4179_p7), %v5393_v0 }
  0xaf   : > { %314 = vst [vmem:[#allocation2 + $0x40] sm:$0xff] (!%p4179_p7), %v5393_v0  ;;  %315 = vst [vmem:[#allocation2 + $0x48] sm:$0xff] (!%p4179_p7), %v5393_v0 }
  0xb0   : > { %316 = vst [vmem:[#allocation2 + $0x50] sm:$0xff] (!%p4179_p7), %v5393_v0  ;;  %317 = vst [vmem:[#allocation2 + $0x58] sm:$0xff] (!%p4179_p7), %v5393_v0 }
  0xb1   : > { %318 = vst [vmem:[#allocation2 + $0x60] sm:$0xff] (!%p4179_p7), %v5393_v0  ;;  %319 = vst [vmem:[#allocation2 + $0x68] sm:$0xff] (!%p4179_p7), %v5393_v0 }
  0xb2   : > { %320 = vst [vmem:[#allocation2 + $0x70] sm:$0xff] %v5393_v0  ;;  %321 = vst [vmem:[#allocation2 + $0x78] sm:$0xff] %v5393_v0 }
  0xb3   : > { %322 = vst [vmem:[#allocation2 + $0x80] sm:$0xff] %v5393_v0  ;;  %323 = vst [vmem:[#allocation2 + $0x88] sm:$0xff] %v5393_v0 }
  0xb4   : > { %324 = vst [vmem:[#allocation2 + $0x90] sm:$0xff] %v5393_v0  ;;  %325 = vst [vmem:[#allocation2 + $0x98] sm:$0xff] %v5393_v0 }
  0xb5   : > { %326 = vst [vmem:[#allocation2 + $0xa0] sm:$0xff] %v5393_v0  ;;  %327 = vst [vmem:[#allocation2 + $0xa8] sm:$0xff] %v5393_v0 }
  0xb6   : > { %328 = vst [vmem:[#allocation2 + $0xb0] sm:$0xff] %v5393_v0  ;;  %329 = vst [vmem:[#allocation2 + $0xb8] sm:$0xff] %v5393_v0 }
  0xb7   : > { %330 = vst [vmem:[#allocation2 + $0xc0] sm:$0xff] %v5393_v0  ;;  %331 = vst [vmem:[#allocation2 + $0xc8] sm:$0xff] %v5393_v0 }
  0xb8   : > { %332 = vst [vmem:[#allocation2 + $0xd0] sm:$0xff] %v5393_v0  ;;  %333 = vst [vmem:[#allocation2 + $0xd8] sm:$0xff] %v5393_v0 }
  0xb9   : > { %334 = vst [vmem:[#allocation2 + $0xe0] sm:$0xff] %v5393_v0  ;;  %335 = vst [vmem:[#allocation2 + $0xe8] sm:$0xff] %v5393_v0 }
  0xba   : > { %336 = vst [vmem:[#allocation2 + $0xf0] sm:$0xff] %v5393_v0  ;;  %337 = vst [vmem:[#allocation2 + $0xf8] sm:$0xff] %v5393_v0 }
  0xbb   : > { %338 = vst [vmem:[#allocation2 + $0x100] sm:$0xff] %v5393_v0  ;;  %339 = vst [vmem:[#allocation2 + $0x108] sm:$0xff] %v5393_v0 }
  0xbc   : > { %340 = vst [vmem:[#allocation2 + $0x110] sm:$0xff] %v5393_v0  ;;  %341 = vst [vmem:[#allocation2 + $0x118] sm:$0xff] %v5393_v0 }
  0xbd   : > { %342 = vst [vmem:[#allocation2 + $0x120] sm:$0xff] %v5393_v0  ;;  %343 = vst [vmem:[#allocation2 + $0x128] sm:$0xff] %v5393_v0 }
  0xbe   : > { %344 = vst [vmem:[#allocation2 + $0x130] sm:$0xff] %v5393_v0  ;;  %345 = vst [vmem:[#allocation2 + $0x138] sm:$0xff] %v5393_v0 }
  0xbf   : > { %346 = vst [vmem:[#allocation2 + $0x140] sm:$0xff] %v5393_v0  ;;  %347 = vst [vmem:[#allocation2 + $0x148] sm:$0xff] %v5393_v0 }
  0xc0   : > { %348 = vst [vmem:[#allocation2 + $0x150] sm:$0xff] %v5393_v0  ;;  %349 = vst [vmem:[#allocation2 + $0x158] sm:$0xff] %v5393_v0 }
  0xc1   : > { %350 = vst [vmem:[#allocation2 + $0x160] sm:$0xff] %v5393_v0  ;;  %351 = vst [vmem:[#allocation2 + $0x168] sm:$0xff] %v5393_v0 }
  0xc2   : > { %352 = vst [vmem:[#allocation2 + $0x170] sm:$0xff] %v5393_v0  ;;  %353 = vst [vmem:[#allocation2 + $0x178] sm:$0xff] %v5393_v0 }
  0xc3   : > { %354 = vst [vmem:[#allocation2 + $0x180] sm:$0xff] %v5393_v0  ;;  %355 = vst [vmem:[#allocation2 + $0x188] sm:$0xff] %v5393_v0 }
  0xc4   : > { %356 = vst [vmem:[#allocation2 + $0x190] sm:$0xff] %v5393_v0  ;;  %357 = vst [vmem:[#allocation2 + $0x198] sm:$0xff] %v5393_v0 }
  0xc5   : > { %358 = vst [vmem:[#allocation2 + $0x1a0] sm:$0xff] %v5393_v0  ;;  %359 = vst [vmem:[#allocation2 + $0x1a8] sm:$0xff] %v5393_v0 }
  0xc6   : > { %360 = vst [vmem:[#allocation2 + $0x1b0] sm:$0xff] %v5393_v0  ;;  %361 = vst [vmem:[#allocation2 + $0x1b8] sm:$0xff] %v5393_v0 }
  0xc7   : > { %362 = vst [vmem:[#allocation2 + $0x1c0] sm:$0xff] %v5393_v0  ;;  %363 = vst [vmem:[#allocation2 + $0x1c8] sm:$0xff] %v5393_v0 }
  0xc8   : > { %364 = vst [vmem:[#allocation2 + $0x1d0] sm:$0xff] %v5393_v0  ;;  %365 = vst [vmem:[#allocation2 + $0x1d8] sm:$0xff] %v5393_v0 }
  0xc9   : > { %366 = vst [vmem:[#allocation2 + $0x1e0] sm:$0xff] %v5393_v0  ;;  %367 = vst [vmem:[#allocation2 + $0x1e8] sm:$0xff] %v5393_v0 }
  0xca   : > { %368 = vst [vmem:[#allocation2 + $0x1f0] sm:$0xff] %v5393_v0  ;;  %369 = vst [vmem:[#allocation2 + $0x1f8] sm:$0xff] %v5393_v0 }
  0xcb   : > { %370 = vst [vmem:[#allocation2 + $0x200] sm:$0xff] %v5393_v0  ;;  %371 = vst [vmem:[#allocation2 + $0x208] sm:$0xff] %v5393_v0 }
  0xcc   : > { %372 = vst [vmem:[#allocation2 + $0x210] sm:$0xff] %v5393_v0  ;;  %373 = vst [vmem:[#allocation2 + $0x218] sm:$0xff] %v5393_v0 }
  0xcd   : > { %374 = vst [vmem:[#allocation2 + $0x220] sm:$0xff] %v5393_v0  ;;  %375 = vst [vmem:[#allocation2 + $0x228] sm:$0xff] %v5393_v0 }
  0xce   : > { %376 = vst [vmem:[#allocation2 + $0x230] sm:$0xff] %v5393_v0  ;;  %377 = vst [vmem:[#allocation2 + $0x238] sm:$0xff] %v5393_v0 }
  0xcf   : > { %378 = vst [vmem:[#allocation2 + $0x240] sm:$0xff] %v5393_v0  ;;  %379 = vst [vmem:[#allocation2 + $0x248] sm:$0xff] %v5393_v0 }
  0xd0   : > { %380 = vst [vmem:[#allocation2 + $0x250] sm:$0xff] %v5393_v0  ;;  %381 = vst [vmem:[#allocation2 + $0x258] sm:$0xff] %v5393_v0 }
  0xd1   : > { %382 = vst [vmem:[#allocation2 + $0x260] sm:$0xff] %v5393_v0  ;;  %383 = vst [vmem:[#allocation2 + $0x268] sm:$0xff] %v5393_v0 }
  0xd2   : > { %384 = vst [vmem:[#allocation2 + $0x270] sm:$0xff] %v5393_v0  ;;  %385 = vst [vmem:[#allocation2 + $0x278] sm:$0xff] %v5393_v0 }
  0xd3   : > { %386 = vst [vmem:[#allocation2 + $0x280] sm:$0xff] %v5393_v0  ;;  %387 = vst [vmem:[#allocation2 + $0x288] sm:$0xff] %v5393_v0 }
  0xd4   : > { %388 = vst [vmem:[#allocation2 + $0x290] sm:$0xff] %v5393_v0  ;;  %389 = vst [vmem:[#allocation2 + $0x298] sm:$0xff] %v5393_v0 }
  0xd5   : > { %390 = vst [vmem:[#allocation2 + $0x2a0] sm:$0xff] %v5393_v0  ;;  %391 = vst [vmem:[#allocation2 + $0x2a8] sm:$0xff] %v5393_v0 }
  0xd6   : > { %392 = vst [vmem:[#allocation2 + $0x2b0] sm:$0xff] %v5393_v0  ;;  %393 = vst [vmem:[#allocation2 + $0x2b8] sm:$0xff] %v5393_v0 }
  0xd7   : > { %394 = vst [vmem:[#allocation2 + $0x2c0] sm:$0xff] %v5393_v0  ;;  %395 = vst [vmem:[#allocation2 + $0x2c8] sm:$0xff] %v5393_v0 }
  0xd8   : > { %396 = vst [vmem:[#allocation2 + $0x2d0] sm:$0xff] %v5393_v0  ;;  %397 = vst [vmem:[#allocation2 + $0x2d8] sm:$0xff] %v5393_v0 }
  0xd9   : > { %398 = vst [vmem:[#allocation2 + $0x2e0] sm:$0xff] %v5393_v0  ;;  %399 = vst [vmem:[#allocation2 + $0x2e8] sm:$0xff] %v5393_v0 }
  0xda   : > { %400 = vst [vmem:[#allocation2 + $0x2f0] sm:$0xff] %v5393_v0  ;;  %401 = vst [vmem:[#allocation2 + $0x2f8] sm:$0xff] %v5393_v0 }
  0xdb PF: > { %v4946_v1 = vld [vmem:[%s5730_s26 + $0x4] ss:$8 sps:$4 sm:$0xff]   ;;  %v4950_v3 = vld [vmem:[%s5730_s26] ss:$8 sps:$4 sm:$0xff]   ;;  %v4952_v5 = vld [vmem:[%s5730_s26 + $0x14] ss:$8 sps:$4 sm:$0xff]  }
  0xdc   : > { %v4948_v2 = vld [vmem:[%s5730_s26 + $0x204] ss:$8 sps:$4 sm:$0xff]   ;;  %2418 = vmatprep.subr.bf16.mxu1 %v4946_v1  ;;  %v4951_v4 = vld [vmem:[%s5730_s26 + $0x200] ss:$8 sps:$4 sm:$0xff]   ;;  %v4954_v6 = vld [vmem:[%s5730_s26 + $0x214] ss:$8 sps:$4 sm:$0xff]  }
  0xdd   : > { %2964 = vmatprep.subr.bf16.mxu0 %v4948_v2  ;;  %2419 = vmatpush1.bf16.msra.mxu1 %v4950_v3  ;;  %v4956_v7 = vld [vmem:[%s5730_s26 + $0x10] ss:$8 sps:$4 sm:$0xff]   ;;  %v4958_v9 = vld [vmem:[%s5730_s26 + $0x24] ss:$8 sps:$4 sm:$0xff]   ;;  %v4962_v11 = vld [vmem:[%s5730_s26 + $0x20] ss:$8 sps:$4 sm:$0xff]  }
  0xde   : > { %2965 = vmatpush1.bf16.msra.mxu0 %v4951_v4  ;;  %2420 = vmatprep.subr.bf16.mxu1 %v4952_v5  ;;  %v4957_v8 = vld [vmem:[%s5730_s26 + $0x210] ss:$8 sps:$4 sm:$0xff]   ;;  %v4960_v10 = vld [vmem:[%s5730_s26 + $0x224] ss:$8 sps:$4 sm:$0xff]   ;;  %v4963_v12 = vld [vmem:[%s5730_s26 + $0x220] ss:$8 sps:$4 sm:$0xff]  }
  0xdf   : > { %2966 = vmatprep.subr.bf16.mxu0 %v4954_v6  ;;  %v4964_v13 = vld [vmem:[%s5730_s26 + $0x34] ss:$8 sps:$4 sm:$0xff]   ;;  %v4968_v15 = vld [vmem:[%s5730_s26 + $0x30] ss:$8 sps:$4 sm:$0xff]   ;;  %v4970_v17 = vld [vmem:[%s5730_s26 + $0x44] ss:$8 sps:$4 sm:$0xff]  }
  0xe0   : > { %v4966_v14 = vld [vmem:[%s5730_s26 + $0x234] ss:$8 sps:$4 sm:$0xff]   ;;  %v4969_v16 = vld [vmem:[%s5730_s26 + $0x230] ss:$8 sps:$4 sm:$0xff]   ;;  %v4972_v18 = vld [vmem:[%s5730_s26 + $0x244] ss:$8 sps:$4 sm:$0xff]  }
  0xe1   : > { %2421 = vmatpush1.bf16.msra.mxu1 %v4956_v7  ;;  %v4974_v19 = vld [vmem:[%s5730_s26 + $0x40] ss:$8 sps:$4 sm:$0xff]   ;;  %v4976_v21 = vld [vmem:[%s5730_s26 + $0x54] ss:$8 sps:$4 sm:$0xff]   ;;  %v4980_v23 = vld [vmem:[%s5730_s26 + $0x50] ss:$8 sps:$4 sm:$0xff]  }
  0xe2   : > { %2967 = vmatpush1.bf16.msra.mxu0 %v4957_v8  ;;  %2422 = vmatprep.subr.bf16.mxu1 %v4958_v9  ;;  %v4975_v20 = vld [vmem:[%s5730_s26 + $0x240] ss:$8 sps:$4 sm:$0xff]   ;;  %v4978_v22 = vld [vmem:[%s5730_s26 + $0x254] ss:$8 sps:$4 sm:$0xff]   ;;  %v4981_v24 = vld [vmem:[%s5730_s26 + $0x250] ss:$8 sps:$4 sm:$0xff]  }
  0xe3   : > { %2968 = vmatprep.subr.bf16.mxu0 %v4960_v10  ;;  %v4982_v25 = vld [vmem:[%s5730_s26 + $0x64] ss:$8 sps:$4 sm:$0xff]   ;;  %v4986_v27 = vld [vmem:[%s5730_s26 + $0x60] ss:$8 sps:$4 sm:$0xff]   ;;  %v4988_v29 = vld [vmem:[%s5730_s26 + $0x74] ss:$8 sps:$4 sm:$0xff]  }
  0xe4   : > { %v4984_v26 = vld [vmem:[%s5730_s26 + $0x264] ss:$8 sps:$4 sm:$0xff]   ;;  %v4987_v28 = vld [vmem:[%s5730_s26 + $0x260] ss:$8 sps:$4 sm:$0xff]   ;;  %v4990_v30 = vld [vmem:[%s5730_s26 + $0x274] ss:$8 sps:$4 sm:$0xff]  }
  0xe5   : > { %2423 = vmatpush1.bf16.msra.mxu1 %v4962_v11  ;;  %v4992_v31 = vld [vmem:[%s5730_s26 + $0x70] ss:$8 sps:$4 sm:$0xff]   ;;  %v4994_v33 = vld [vmem:[%s5730_s26 + $0x84] ss:$8 sps:$4 sm:$0xff]   ;;  %v4998_v35 = vld [vmem:[%s5730_s26 + $0x80] ss:$8 sps:$4 sm:$0xff]  }
  0xe6   : > { %2969 = vmatpush1.bf16.msra.mxu0 %v4963_v12  ;;  %2424 = vmatprep.subr.bf16.mxu1 %v4964_v13  ;;  %v4993_v32 = vld [vmem:[%s5730_s26 + $0x270] ss:$8 sps:$4 sm:$0xff]   ;;  %v4996_v34 = vld [vmem:[%s5730_s26 + $0x284] ss:$8 sps:$4 sm:$0xff]   ;;  %v4999_v36 = vld [vmem:[%s5730_s26 + $0x280] ss:$8 sps:$4 sm:$0xff]  }
  0xe7   : > { %2970 = vmatprep.subr.bf16.mxu0 %v4966_v14  ;;  %v5000_v37 = vld [vmem:[%s5730_s26 + $0x94] ss:$8 sps:$4 sm:$0xff]   ;;  %v5004_v39 = vld [vmem:[%s5730_s26 + $0x90] ss:$8 sps:$4 sm:$0xff]   ;;  %v5006_v41 = vld [vmem:[%s5730_s26 + $0xa4] ss:$8 sps:$4 sm:$0xff]  }
  0xe8   : > { %v5002_v38 = vld [vmem:[%s5730_s26 + $0x294] ss:$8 sps:$4 sm:$0xff]   ;;  %v5005_v40 = vld [vmem:[%s5730_s26 + $0x290] ss:$8 sps:$4 sm:$0xff]   ;;  %v5008_v42 = vld [vmem:[%s5730_s26 + $0x2a4] ss:$8 sps:$4 sm:$0xff]  }
  0xe9   : > { %2425 = vmatpush1.bf16.msra.mxu1 %v4968_v15  ;;  %v5010_v43 = vld [vmem:[%s5730_s26 + $0xa0] ss:$8 sps:$4 sm:$0xff]   ;;  %v5012_v45 = vld [vmem:[%s5730_s26 + $0xb4] ss:$8 sps:$4 sm:$0xff]   ;;  %v5016_v47 = vld [vmem:[%s5730_s26 + $0xb0] ss:$8 sps:$4 sm:$0xff]  }
  0xea   : > { %2971 = vmatpush1.bf16.msra.mxu0 %v4969_v16  ;;  %2426 = vmatprep.subr.bf16.mxu1 %v4970_v17  ;;  %v5011_v44 = vld [vmem:[%s5730_s26 + $0x2a0] ss:$8 sps:$4 sm:$0xff]   ;;  %v5014_v46 = vld [vmem:[%s5730_s26 + $0x2b4] ss:$8 sps:$4 sm:$0xff]   ;;  %v5017_v48 = vld [vmem:[%s5730_s26 + $0x2b0] ss:$8 sps:$4 sm:$0xff]  }
  0xeb   : > { %2972 = vmatprep.subr.bf16.mxu0 %v4972_v18  ;;  %v5895_v49 = vld [vmem:[%s5722_s9] sm:$0xff]  ;;  %v5901_v51 = vld [vmem:[%s5722_s9 + $0x10] sm:$0xff]  ;;  %s6516_s29 = sld [smem:[#allocation16_spill]] }
  0xec   : > { %v5898_v50 = vld [vmem:[%s5722_s9 + $0x20] sm:$0xff]  ;;  %v504_v52 = vld [vmem:[%s5722_s9 + $0x30] sm:$0xff] }
  0xed   : > { %2427 = vmatpush1.bf16.msra.mxu1 %v4974_v19  ;;  %v5018_v53 = vld [vmem:[%s5730_s26 + $0xc4] ss:$8 sps:$4 sm:$0xff]   ;;  %v4181_v54 = vcombine.high %v5895_v49, %v5898_v50  ;;  %v4185_v56 = vcombine.high %v5901_v51, %v504_v52  ;;  %v5022_v57 = vld [vmem:[%s5730_s26 + $0xc0] ss:$8 sps:$4 sm:$0xff]   ;;  %v5024_v59 = vld [vmem:[%s5730_s26 + $0xd4] ss:$8 sps:$4 sm:$0xff]   ;;  %v4180_v13 = vcombine.low %v5895_v49, %v5898_v50  ;;  %v4184_v14 = vcombine.low %v5901_v51, %v504_v52 }
  0xee   : > { %2973 = vmatpush1.bf16.msra.mxu0 %v4975_v20  ;;  %2428 = vmatprep.subr.bf16.mxu1 %v4976_v21  ;;  %v5020_v55 = vld [vmem:[%s5730_s26 + $0x2c4] ss:$8 sps:$4 sm:$0xff]   ;;  %v5023_v58 = vld [vmem:[%s5730_s26 + $0x2c0] ss:$8 sps:$4 sm:$0xff]   ;;  %v5026_v60 = vld [vmem:[%s5730_s26 + $0x2d4] ss:$8 sps:$4 sm:$0xff]  }
  0xef   : > { %2974 = vmatprep.subr.bf16.mxu0 %v4978_v22  ;;  %2450 = vmatprep.mubr.bf16.mxu1 %v4181_v54  ;;  %v5028_v61 = vld [vmem:[%s5730_s26 + $0xd0] ss:$8 sps:$4 sm:$0xff]   ;;  %v5030_v63 = vld [vmem:[%s5730_s26 + $0xe4] ss:$8 sps:$4 sm:$0xff]   ;;  %v5034_v1 = vld [vmem:[%s5730_s26 + $0xe0] ss:$8 sps:$4 sm:$0xff]  }
  0xf0   : > { %2996 = vmatprep.mubr.bf16.mxu0 %v4185_v56  ;;  %v5029_v62 = vld [vmem:[%s5730_s26 + $0x2d0] ss:$8 sps:$4 sm:$0xff]   ;;  %v5032_v0 = vld [vmem:[%s5730_s26 + $0x2e4] ss:$8 sps:$4 sm:$0xff]   ;;  %v5035_v2 = vld [vmem:[%s5730_s26 + $0x2e0] ss:$8 sps:$4 sm:$0xff]  }
  0xf1   : > { %2429 = vmatpush1.bf16.msra.mxu1 %v4980_v23  ;;  %v5036_v3 = vld [vmem:[%s5730_s26 + $0xf4] ss:$8 sps:$4 sm:$0xff]   ;;  %v5040_v5 = vld [vmem:[%s5730_s26 + $0xf0] ss:$8 sps:$4 sm:$0xff]   ;;  %v5044_v7 = vld [vmem:[%s5730_s26 + $0x104] ss:$8 sps:$4 sm:$0xff]  }
  0xf2   : > { %2975 = vmatpush1.bf16.msra.mxu0 %v4981_v24  ;;  %2430 = vmatprep.subr.bf16.mxu1 %v4982_v25  ;;  %v5038_v4 = vld [vmem:[%s5730_s26 + $0x2f4] ss:$8 sps:$4 sm:$0xff]   ;;  %v5041_v6 = vld [vmem:[%s5730_s26 + $0x2f0] ss:$8 sps:$4 sm:$0xff]   ;;  %v5047_v8 = vld [vmem:[%s5730_s26 + $0x304] ss:$8 sps:$4 sm:$0xff]  }
  0xf3   : > { %2976 = vmatprep.subr.bf16.mxu0 %v4984_v26  ;;  %v506_v9 = vld [vmem:[%s5722_s9 + $0x40] sm:$0xff]  ;;  %v508_v11 = vld [vmem:[%s5722_s9 + $0x50] sm:$0xff]  ;;  %p4500_p13 = scmp.ne.s32.totalorder %s6516_s29, 1 }
  0xf4   : > { %v510_v10 = vld [vmem:[%s5722_s9 + $0x60] sm:$0xff]  ;;  %v512_v12 = vld [vmem:[%s5722_s9 + $0x70] sm:$0xff] }
  0xf5   : > { %2431 = vmatpush1.bf16.msra.mxu1 %v4986_v27  ;;  %v5042_v15 = vld [vmem:[%s5730_s26 + $0x100] ss:$8 sps:$4 sm:$0xff]   ;;  %v4189_v17 = vcombine.high %v506_v9, %v510_v10  ;;  %v4193_v18 = vcombine.high %v508_v11, %v512_v12  ;;  %v5050_v19 = vld [vmem:[%s5730_s26 + $0x114] ss:$8 sps:$4 sm:$0xff]   ;;  %v5048_v20 = vld [vmem:[%s5730_s26 + $0x110] ss:$8 sps:$4 sm:$0xff]  }
  0xf6   : > { %2977 = vmatpush1.bf16.msra.mxu0 %v4987_v28  ;;  %2432 = vmatprep.subr.bf16.mxu1 %v4988_v29  ;;  %v5045_v16 = vld [vmem:[%s5730_s26 + $0x300] ss:$8 sps:$4 sm:$0xff]   ;;  %v5051_v21 = vld [vmem:[%s5730_s26 + $0x310] ss:$8 sps:$4 sm:$0xff]   ;;  %v5053_v22 = vld [vmem:[%s5730_s26 + $0x314] ss:$8 sps:$4 sm:$0xff]   ;;  %v4188_v29 = vcombine.low %v506_v9, %v510_v10 }
  0xf7   : > { %2978 = vmatprep.subr.bf16.mxu0 %v4990_v30  ;;  %v514_v23 = vld [vmem:[%s5722_s9 + $0x80] sm:$0xff]  ;;  %v516_v25 = vld [vmem:[%s5722_s9 + $0x90] sm:$0xff]  ;;  %v4192_v30 = vcombine.low %v508_v11, %v512_v12 }
  0xf8   : > { %v518_v24 = vld [vmem:[%s5722_s9 + $0xa0] sm:$0xff]  ;;  %v520_v26 = vld [vmem:[%s5722_s9 + $0xb0] sm:$0xff] }
  0xf9   : > { %2433 = vmatpush1.bf16.msra.mxu1 %v4992_v31  ;;  %v5056_v27 = vld [vmem:[%s5730_s26 + $0x124] ss:$8 sps:$4 sm:$0xff]   ;;  %v4197_v31 = vcombine.high %v514_v23, %v518_v24  ;;  %v5066_v49 = vld [vmem:[%s5730_s26 + $0x140] ss:$8 sps:$4 sm:$0xff]   ;;  %v5074_v51 = vld [vmem:[%s5730_s26 + $0x154] ss:$8 sps:$4 sm:$0xff]  }
  0xfa   : > { %2979 = vmatpush1.bf16.msra.mxu0 %v4993_v32  ;;  %2434 = vmatprep.subr.bf16.mxu1 %v4994_v33  ;;  %v5059_v28 = vld [vmem:[%s5730_s26 + $0x324] ss:$8 sps:$4 sm:$0xff]   ;;  %v4201_v32 = vcombine.high %v516_v25, %v520_v26  ;;  %v5054_v33 = vld [vmem:[%s5730_s26 + $0x120] ss:$8 sps:$4 sm:$0xff]   ;;  %v5077_v52 = vld [vmem:[%s5730_s26 + $0x354] ss:$8 sps:$4 sm:$0xff]  }
  0xfb   : > { %2980 = vmatprep.subr.bf16.mxu0 %v4996_v34  ;;  %v5057_v34 = vld [vmem:[%s5730_s26 + $0x320] ss:$8 sps:$4 sm:$0xff]   ;;  %v536_v56 = vld [vmem:[%s5722_s9 + $0x130] sm:$0xff]  ;;  %v5092_v11 = vld [vmem:[%s5730_s26 + $0x184] ss:$8 sps:$4 sm:$0xff]  }
  0xfc   : > { %v5069_v50 = vld [vmem:[%s5730_s26 + $0x340] ss:$8 sps:$4 sm:$0xff]   ;;  %v5084_v9 = vld [vmem:[%s5730_s26 + $0x170] ss:$8 sps:$4 sm:$0xff]   ;;  %v5095_v12 = vld [vmem:[%s5730_s26 + $0x384] ss:$8 sps:$4 sm:$0xff]  }
  0xfd   : > { %2435 = vmatpush1.bf16.msra.mxu1 %v4998_v35  ;;  %v5062_v35 = vld [vmem:[%s5730_s26 + $0x134] ss:$8 sps:$4 sm:$0xff]   ;;  %v534_v54 = vld [vmem:[%s5722_s9 + $0x120] sm:$0xff]  ;;  %v5087_v10 = vld [vmem:[%s5730_s26 + $0x370] ss:$8 sps:$4 sm:$0xff]  }
  0xfe   : > { %2981 = vmatpush1.bf16.msra.mxu0 %v4999_v36  ;;  %2436 = vmatprep.subr.bf16.mxu1 %v5000_v37  ;;  %v5065_v36 = vld [vmem:[%s5730_s26 + $0x334] ss:$8 sps:$4 sm:$0xff]   ;;  %v522_v37 = vld [vmem:[%s5722_s9 + $0xc0] sm:$0xff] }
  0xff   : > { %2982 = vmatprep.subr.bf16.mxu0 %v5002_v38  ;;  %v526_v38 = vld [vmem:[%s5722_s9 + $0xe0] sm:$0xff] }
 0x101   : > { %2437 = vmatpush1.bf16.msra.mxu1 %v5004_v39  ;;  %v524_v39 = vld [vmem:[%s5722_s9 + $0xd0] sm:$0xff] }
 0x102   : > { %2983 = vmatpush1.bf16.msra.mxu0 %v5005_v40  ;;  %2438 = vmatprep.subr.bf16.mxu1 %v5006_v41  ;;  %v528_v40 = vld [vmem:[%s5722_s9 + $0xf0] sm:$0xff] }
 0x103   : > { %2984 = vmatprep.subr.bf16.mxu0 %v5008_v42  ;;  %v5060_v41 = vld [vmem:[%s5730_s26 + $0x130] ss:$8 sps:$4 sm:$0xff]  }
 0x104   : > { %v5063_v42 = vld [vmem:[%s5730_s26 + $0x330] ss:$8 sps:$4 sm:$0xff]  }
 0x105   : > { %2439 = vmatpush1.bf16.msra.mxu1 %v5010_v43  ;;  %v5068_v43 = vld [vmem:[%s5730_s26 + $0x144] ss:$8 sps:$4 sm:$0xff]  }
 0x106   : > { %2985 = vmatpush1.bf16.msra.mxu0 %v5011_v44  ;;  %2440 = vmatprep.subr.bf16.mxu1 %v5012_v45  ;;  %v5071_v44 = vld [vmem:[%s5730_s26 + $0x344] ss:$8 sps:$4 sm:$0xff]   ;;  %v4196_v45 = vcombine.low %v514_v23, %v518_v24  ;;  %v548_v23 = vld [vmem:[%s5722_s9 + $0x190] sm:$0xff] }
 0x107   : > { %2986 = vmatprep.subr.bf16.mxu0 %v5014_v46  ;;  %v4200_v46 = vcombine.low %v516_v25, %v520_v26  ;;  %v552_v24 = vld [vmem:[%s5722_s9 + $0x1b0] sm:$0xff] }
 0x108   : > { %v5096_v25 = vld [vmem:[%s5730_s26 + $0x190] ss:$8 sps:$4 sm:$0xff]  }
 0x109   : > { %2441 = vmatpush1.bf16.msra.mxu1 %v5016_v47  ;;  %v4205_v47 = vcombine.high %v522_v37, %v526_v38  ;;  %v5099_v26 = vld [vmem:[%s5730_s26 + $0x390] ss:$8 sps:$4 sm:$0xff]  }
 0x10a   : > { %2987 = vmatpush1.bf16.msra.mxu0 %v5017_v48  ;;  %2442 = vmatprep.subr.bf16.mxu1 %v5018_v53  ;;  %v4209_v48 = vcombine.high %v524_v39, %v528_v40  ;;  %v530_v53 = vld [vmem:[%s5722_s9 + $0x100] sm:$0xff] }
 0x10b   : > { %2988 = vmatprep.subr.bf16.mxu0 %v5020_v55  ;;  %v532_v55 = vld [vmem:[%s5722_s9 + $0x110] sm:$0xff] }
 0x10d   : > { %2443 = vmatpush1.bf16.msra.mxu1 %v5022_v57  ;;  %v5072_v57 = vld [vmem:[%s5730_s26 + $0x150] ss:$8 sps:$4 sm:$0xff]  }
 0x10e   : > { %2989 = vmatpush1.bf16.msra.mxu0 %v5023_v58  ;;  %2444 = vmatprep.subr.bf16.mxu1 %v5024_v59  ;;  %v5075_v58 = vld [vmem:[%s5730_s26 + $0x350] ss:$8 sps:$4 sm:$0xff]   ;;  %v5080_v59 = vld [vmem:[%s5730_s26 + $0x164] ss:$8 sps:$4 sm:$0xff]  }
 0x10f   : > { %2990 = vmatprep.subr.bf16.mxu0 %v5026_v60  ;;  %v5083_v60 = vld [vmem:[%s5730_s26 + $0x364] ss:$8 sps:$4 sm:$0xff]  }
 0x111   : > { %2445 = vmatpush1.bf16.msra.mxu1 %v5028_v61  ;;  %v4204_v61 = vcombine.low %v522_v37, %v526_v38  ;;  %v554_v37 = vld [vmem:[%s5722_s9 + $0x1c0] sm:$0xff] }
 0x112   : > { %2991 = vmatpush1.bf16.msra.mxu0 %v5029_v62  ;;  %2446 = vmatprep.subr.bf16.mxu1 %v5030_v63  ;;  %v4208_v62 = vcombine.low %v524_v39, %v528_v40  ;;  %v4213_v63 = vcombine.high %v530_v53, %v534_v54  ;;  %v558_v38 = vld [vmem:[%s5722_s9 + $0x1e0] sm:$0xff]  ;;  %v556_v39 = vld [vmem:[%s5722_s9 + $0x1d0] sm:$0xff] }
 0x113   : > { %2992 = vmatprep.subr.bf16.mxu0 %v5032_v0  ;;  %v4217_v0 = vcombine.high %v532_v55, %v536_v56  ;;  %v560_v40 = vld [vmem:[%s5722_s9 + $0x1f0] sm:$0xff] }
 0x115   : > { %2447 = vmatpush1.bf16.msra.mxu1 %v5034_v1  ;;  %v5078_v1 = vld [vmem:[%s5730_s26 + $0x160] ss:$8 sps:$4 sm:$0xff]  }
 0x116   : > { %2993 = vmatpush1.bf16.msra.mxu0 %v5035_v2  ;;  %2448 = vmatprep.subr.bf16.mxu1 %v5036_v3  ;;  %v5081_v2 = vld [vmem:[%s5730_s26 + $0x360] ss:$8 sps:$4 sm:$0xff]   ;;  %v5086_v3 = vld [vmem:[%s5730_s26 + $0x174] ss:$8 sps:$4 sm:$0xff]  }
 0x117   : > { %2994 = vmatprep.subr.bf16.mxu0 %v5038_v4  ;;  %v5089_v4 = vld [vmem:[%s5730_s26 + $0x374] ss:$8 sps:$4 sm:$0xff]  }
 0x119   : > { %2449 = vmatpush1.bf16.msra.mxu1 %v5040_v5  ;;  %v538_v5 = vld [vmem:[%s5722_s9 + $0x140] sm:$0xff] }
 0x11a   : > { %2995 = vmatpush1.bf16.msra.mxu0 %v5041_v6  ;;  %2691 = vmatprep.subr.bf16.mxu1 %v5044_v7  ;;  %v542_v6 = vld [vmem:[%s5722_s9 + $0x160] sm:$0xff]  ;;  %v540_v7 = vld [vmem:[%s5722_s9 + $0x150] sm:$0xff] }
 0x11b   : > { %3237 = vmatprep.subr.bf16.mxu0 %v5047_v8  ;;  %v544_v8 = vld [vmem:[%s5722_s9 + $0x170] sm:$0xff] }
 0x11c   : > { %2451 = vmatmul.mubr.bf16.vlgmr.msra.gmra.mrb[0].mxu1 %v4180_v13  ;;  %v4212_v13 = vcombine.low %v530_v53, %v534_v54  ;;  %v562_v53 = vld [vmem:[%s5722_s9 + $0x200] sm:$0xff] }
 0x11d   : > { %2997 = vmatmul.mubr.bf16.vlgmr.msra.gmra.mrb[0].mxu0 %v4184_v14  ;;  %2692 = vmatpush1.bf16.msra.mxu1 %v5042_v15  ;;  %v4216_v14 = vcombine.low %v532_v55, %v536_v56  ;;  %v4221_v15 = vcombine.high %v538_v5, %v542_v6  ;;  %v566_v54 = vld [vmem:[%s5722_s9 + $0x220] sm:$0xff]  ;;  %v564_v55 = vld [vmem:[%s5722_s9 + $0x210] sm:$0xff] }
 0x11e   : > { %3238 = vmatpush1.bf16.msra.mxu0 %v5045_v16  ;;  %2460 = vmatprep.mubr.bf16.mxu1 %v4189_v17  ;;  %v4225_v16 = vcombine.high %v540_v7, %v544_v8  ;;  %v5090_v17 = vld [vmem:[%s5730_s26 + $0x180] ss:$8 sps:$4 sm:$0xff]   ;;  %v568_v56 = vld [vmem:[%s5722_s9 + $0x230] sm:$0xff] }
 0x11f   : > { %3006 = vmatprep.mubr.bf16.mxu0 %v4193_v18  ;;  %2693 = vmatprep.subr.bf16.mxu1 %v5050_v19  ;;  %v5093_v18 = vld [vmem:[%s5730_s26 + $0x380] ss:$8 sps:$4 sm:$0xff]   ;;  %v5098_v19 = vld [vmem:[%s5730_s26 + $0x194] ss:$8 sps:$4 sm:$0xff]  }
 0x120   : > { %3239 = vmatprep.subr.bf16.mxu0 %v5053_v22  ;;  %v550_v22 = vld [vmem:[%s5722_s9 + $0x1a0] sm:$0xff] }
 0x121   : > { %2694 = vmatpush1.bf16.msra.mxu1 %v5048_v20  ;;  %v5101_v20 = vld [vmem:[%s5730_s26 + $0x394] ss:$8 sps:$4 sm:$0xff]  }
 0x122   : > { %3240 = vmatpush1.bf16.msra.mxu0 %v5051_v21  ;;  %2695 = vmatprep.subr.bf16.mxu1 %v5056_v27  ;;  %v546_v21 = vld [vmem:[%s5722_s9 + $0x180] sm:$0xff] }
 0x123   : > { %3241 = vmatprep.subr.bf16.mxu0 %v5059_v28  ;;  %v5104_v27 = vld [vmem:[%s5730_s26 + $0x1a4] ss:$8 sps:$4 sm:$0xff]  }
 0x124   : > { %2461 = vmatmul.mubr.bf16.gmra.mrb[4].mxu1 %v4188_v29  ;;  %v5107_v28 = vld [vmem:[%s5730_s26 + $0x3a4] ss:$8 sps:$4 sm:$0xff]   ;;  %v4220_v29 = vcombine.low %v538_v5, %v542_v6 }
 0x125   : > { %3007 = vmatmul.mubr.bf16.gmra.mrb[4].mxu0 %v4192_v30  ;;  %2470 = vmatprep.mubr.bf16.mxu1 %v4197_v31  ;;  %v4224_v30 = vcombine.low %v540_v7, %v544_v8  ;;  %v4229_v31 = vcombine.high %v546_v21, %v550_v22  ;;  %v570_v5 = vld [vmem:[%s5722_s9 + $0x240] sm:$0xff]  ;;  %v572_v7 = vld [vmem:[%s5722_s9 + $0x250] sm:$0xff] }
 0x126   : > { %3016 = vmatprep.mubr.bf16.mxu0 %v4201_v32  ;;  %2696 = vmatpush1.bf16.msra.mxu1 %v5054_v33  ;;  %v4233_v32 = vcombine.high %v548_v23, %v552_v24  ;;  %v5102_v33 = vld [vmem:[%s5730_s26 + $0x1a0] ss:$8 sps:$4 sm:$0xff]   ;;  %v576_v8 = vld [vmem:[%s5722_s9 + $0x270] sm:$0xff] }
 0x127   : > { %3242 = vmatpush1.bf16.msra.mxu0 %v5057_v34  ;;  %2697 = vmatprep.subr.bf16.mxu1 %v5062_v35  ;;  %v5105_v34 = vld [vmem:[%s5730_s26 + $0x3a0] ss:$8 sps:$4 sm:$0xff]   ;;  %v5110_v35 = vld [vmem:[%s5730_s26 + $0x1b4] ss:$8 sps:$4 sm:$0xff]  }
 0x128   : > { %3243 = vmatprep.subr.bf16.mxu0 %v5065_v36  ;;  %v5113_v36 = vld [vmem:[%s5730_s26 + $0x3b4] ss:$8 sps:$4 sm:$0xff]   ;;  %v574_v6 = vld [vmem:[%s5722_s9 + $0x260] sm:$0xff] }
 0x12a   : > { %2698 = vmatpush1.bf16.msra.mxu1 %v5060_v41  ;;  %v5108_v41 = vld [vmem:[%s5730_s26 + $0x1b0] ss:$8 sps:$4 sm:$0xff]  }
 0x12b   : > { %3244 = vmatpush1.bf16.msra.mxu0 %v5063_v42  ;;  %2699 = vmatprep.subr.bf16.mxu1 %v5068_v43  ;;  %v5111_v42 = vld [vmem:[%s5730_s26 + $0x3b0] ss:$8 sps:$4 sm:$0xff]   ;;  %v5116_v43 = vld [vmem:[%s5730_s26 + $0x1c4] ss:$8 sps:$4 sm:$0xff]  }
 0x12c   : > { %3245 = vmatprep.subr.bf16.mxu0 %v5071_v44  ;;  %2471 = vmatmul.mubr.bf16.gmra.mrb[8].mxu1 %v4196_v45  ;;  %v5119_v44 = vld [vmem:[%s5730_s26 + $0x3c4] ss:$8 sps:$4 sm:$0xff]   ;;  %v4228_v45 = vcombine.low %v546_v21, %v550_v22 }
 0x12d   : > { %3017 = vmatmul.mubr.bf16.gmra.mrb[8].mxu0 %v4200_v46  ;;  %2480 = vmatprep.mubr.bf16.mxu1 %v4205_v47  ;;  %v4232_v46 = vcombine.low %v548_v23, %v552_v24  ;;  %v4237_v47 = vcombine.high %v554_v37, %v558_v38  ;;  %v586_v23 = vld [vmem:[%s5722_s9 + $0x2c0] sm:$0xff] }
 0x12e   : > { %3026 = vmatprep.mubr.bf16.mxu0 %v4209_v48  ;;  %2700 = vmatpush1.bf16.msra.mxu1 %v5066_v49  ;;  %v4241_v48 = vcombine.high %v556_v39, %v560_v40  ;;  %v5114_v49 = vld [vmem:[%s5730_s26 + $0x1c0] ss:$8 sps:$4 sm:$0xff]  }
 0x12f   : > { %3246 = vmatpush1.bf16.msra.mxu0 %v5069_v50  ;;  %2701 = vmatprep.subr.bf16.mxu1 %v5074_v51  ;;  %v5117_v50 = vld [vmem:[%s5730_s26 + $0x3c0] ss:$8 sps:$4 sm:$0xff]   ;;  %v5122_v51 = vld [vmem:[%s5730_s26 + $0x1d4] ss:$8 sps:$4 sm:$0xff]  }
 0x130   : > { %3247 = vmatprep.subr.bf16.mxu0 %v5077_v52  ;;  %v5125_v52 = vld [vmem:[%s5730_s26 + $0x3d4] ss:$8 sps:$4 sm:$0xff]   ;;  %v590_v24 = vld [vmem:[%s5722_s9 + $0x2e0] sm:$0xff] }
 0x132   : > { %2702 = vmatpush1.bf16.msra.mxu1 %v5072_v57  ;;  %v5120_v57 = vld [vmem:[%s5730_s26 + $0x1d0] ss:$8 sps:$4 sm:$0xff]  }
 0x133   : > { %3248 = vmatpush1.bf16.msra.mxu0 %v5075_v58  ;;  %2703 = vmatprep.subr.bf16.mxu1 %v5080_v59  ;;  %v5123_v58 = vld [vmem:[%s5730_s26 + $0x3d0] ss:$8 sps:$4 sm:$0xff]   ;;  %v5128_v59 = vld [vmem:[%s5730_s26 + $0x1e4] ss:$8 sps:$4 sm:$0xff]  }
 0x134   : > { %3249 = vmatprep.subr.bf16.mxu0 %v5083_v60  ;;  %2481 = vmatmul.mubr.bf16.gmra.mrb[12].mxu1 %v4204_v61  ;;  %v5131_v60 = vld [vmem:[%s5730_s26 + $0x3e4] ss:$8 sps:$4 sm:$0xff]   ;;  %v4236_v61 = vcombine.low %v554_v37, %v558_v38 }
 0x135   : > { %3027 = vmatmul.mubr.bf16.gmra.mrb[12].mxu0 %v4208_v62  ;;  %2490 = vmatprep.mubr.bf16.mxu1 %v4213_v63  ;;  %v4240_v62 = vcombine.low %v556_v39, %v560_v40  ;;  %v4245_v63 = vcombine.high %v562_v53, %v566_v54  ;;  %v602_v39 = vld [vmem:[%s5722_s9 + $0x340] sm:$0xff] }
 0x136   : > { %3036 = vmatprep.mubr.bf16.mxu0 %v4217_v0  ;;  %2704 = vmatpush1.bf16.msra.mxu1 %v5078_v1  ;;  %v4249_v0 = vcombine.high %v564_v55, %v568_v56  ;;  %v5126_v1 = vld [vmem:[%s5730_s26 + $0x1e0] ss:$8 sps:$4 sm:$0xff]  }
 0x137   : > { %3250 = vmatpush1.bf16.msra.mxu0 %v5081_v2  ;;  %2705 = vmatprep.subr.bf16.mxu1 %v5086_v3  ;;  %v5129_v2 = vld [vmem:[%s5730_s26 + $0x3e0] ss:$8 sps:$4 sm:$0xff]   ;;  %v5134_v3 = vld [vmem:[%s5730_s26 + $0x1f4] ss:$8 sps:$4 sm:$0xff]  }
 0x138   : > { %3251 = vmatprep.subr.bf16.mxu0 %v5089_v4  ;;  %v5137_v4 = vld [vmem:[%s5730_s26 + $0x3f4] ss:$8 sps:$4 sm:$0xff]   ;;  %v606_v40 = vld [vmem:[%s5722_s9 + $0x360] sm:$0xff] }
 0x13a   : > { %2706 = vmatpush1.bf16.msra.mxu1 %v5084_v9  ;;  %v5132_v9 = vld [vmem:[%s5730_s26 + $0x1f0] ss:$8 sps:$4 sm:$0xff]  }
 0x13b   : > { %3252 = vmatpush1.bf16.msra.mxu0 %v5087_v10  ;;  %2707 = vmatprep.subr.bf16.mxu1 %v5092_v11  ;;  %v5135_v10 = vld [vmem:[%s5730_s26 + $0x3f0] ss:$8 sps:$4 sm:$0xff]   ;;  %v4244_v11 = vcombine.low %v562_v53, %v566_v54 }
 0x13c   : > { %3253 = vmatprep.subr.bf16.mxu0 %v5095_v12  ;;  %2491 = vmatmul.mubr.bf16.gmra.mrb[16].mxu1 %v4212_v13  ;;  %v4248_v12 = vcombine.low %v564_v55, %v568_v56  ;;  %v4253_v13 = vcombine.high %v570_v5, %v574_v6  ;;  %v618_v55 = vld [vmem:[%s5722_s9 + $0x3c0] sm:$0xff] }
 0x13d   : > { %3037 = vmatmul.mubr.bf16.gmra.mrb[16].mxu0 %v4216_v14  ;;  %2500 = vmatprep.mubr.bf16.mxu1 %v4221_v15  ;;  %v4257_v14 = vcombine.high %v572_v7, %v576_v8  ;;  %v578_v15 = vld [vmem:[%s5722_s9 + $0x280] sm:$0xff] }
 0x13e   : > { %3046 = vmatprep.mubr.bf16.mxu0 %v4225_v16  ;;  %2708 = vmatpush1.bf16.msra.mxu1 %v5090_v17  ;;  %v582_v16 = vld [vmem:[%s5722_s9 + $0x2a0] sm:$0xff]  ;;  %v580_v17 = vld [vmem:[%s5722_s9 + $0x290] sm:$0xff] }
 0x13f   : > { %3254 = vmatpush1.bf16.msra.mxu0 %v5093_v18  ;;  %2709 = vmatprep.subr.bf16.mxu1 %v5098_v19  ;;  %v584_v18 = vld [vmem:[%s5722_s9 + $0x2b0] sm:$0xff]  ;;  %v4252_v19 = vcombine.low %v570_v5, %v574_v6  ;;  %v4261_v21 = vcombine.high %v578_v15, %v582_v16  ;;  %v622_v56 = vld [vmem:[%s5722_s9 + $0x3e0] sm:$0xff] }
 0x140   : > { %3255 = vmatprep.subr.bf16.mxu0 %v5101_v20  ;;  %v4256_v20 = vcombine.low %v572_v7, %v576_v8  ;;  %v4265_v22 = vcombine.high %v580_v17, %v584_v18  ;;  %v634_v7 = vld [vmem:[%s5722_s9 + $0x440] sm:$0xff] }
 0x141   : > { %v638_v8 = vld [vmem:[%s5722_s9 + $0x460] sm:$0xff] }
 0x142   : > { %2710 = vmatpush1.bf16.msra.mxu1 %v5096_v25  ;;  %v588_v25 = vld [vmem:[%s5722_s9 + $0x2d0] sm:$0xff] }
 0x143   : > { %3256 = vmatpush1.bf16.msra.mxu0 %v5099_v26  ;;  %2711 = vmatprep.subr.bf16.mxu1 %v5104_v27  ;;  %v592_v26 = vld [vmem:[%s5722_s9 + $0x2f0] sm:$0xff]  ;;  %v4260_v27 = vcombine.low %v578_v15, %v582_v16  ;;  %v642_v15 = vld [vmem:[%s5722_s9 + $0x480] sm:$0xff] }
 0x144   : > { %3257 = vmatprep.subr.bf16.mxu0 %v5107_v28  ;;  %2501 = vmatmul.mubr.bf16.gmra.mrb[20].mxu1 %v4220_v29  ;;  %v4264_v28 = vcombine.low %v580_v17, %v584_v18  ;;  %v4269_v29 = vcombine.high %v586_v23, %v590_v24  ;;  %v646_v16 = vld [vmem:[%s5722_s9 + $0x4a0] sm:$0xff]  ;;  %v644_v17 = vld [vmem:[%s5722_s9 + $0x490] sm:$0xff] }
 0x145   : > { %3047 = vmatmul.mubr.bf16.gmra.mrb[20].mxu0 %v4224_v30  ;;  %2510 = vmatprep.mubr.bf16.mxu1 %v4229_v31  ;;  %v4273_v30 = vcombine.high %v588_v25, %v592_v26  ;;  %v594_v31 = vld [vmem:[%s5722_s9 + $0x300] sm:$0xff]  ;;  %v648_v18 = vld [vmem:[%s5722_s9 + $0x4b0] sm:$0xff] }
 0x146   : > { %3056 = vmatprep.mubr.bf16.mxu0 %v4233_v32  ;;  %2712 = vmatpush1.bf16.msra.mxu1 %v5102_v33  ;;  %v598_v32 = vld [vmem:[%s5722_s9 + $0x320] sm:$0xff]  ;;  %v596_v33 = vld [vmem:[%s5722_s9 + $0x310] sm:$0xff] }
 0x147   : > { %3258 = vmatpush1.bf16.msra.mxu0 %v5105_v34  ;;  %2713 = vmatprep.subr.bf16.mxu1 %v5110_v35  ;;  %v600_v34 = vld [vmem:[%s5722_s9 + $0x330] sm:$0xff]  ;;  %v4268_v35 = vcombine.low %v586_v23, %v590_v24  ;;  %v4277_v37 = vcombine.high %v594_v31, %v598_v32  ;;  %v650_v23 = vld [vmem:[%s5722_s9 + $0x4c0] sm:$0xff] }
 0x148   : > { %3259 = vmatprep.subr.bf16.mxu0 %v5113_v36  ;;  %v4272_v36 = vcombine.low %v588_v25, %v592_v26  ;;  %v4281_v38 = vcombine.high %v596_v33, %v600_v34  ;;  %v654_v24 = vld [vmem:[%s5722_s9 + $0x4e0] sm:$0xff]  ;;  %v652_v25 = vld [vmem:[%s5722_s9 + $0x4d0] sm:$0xff] }
 0x149   : > { %v656_v26 = vld [vmem:[%s5722_s9 + $0x4f0] sm:$0xff] }
 0x14a   : > { %2714 = vmatpush1.bf16.msra.mxu1 %v5108_v41  ;;  %v604_v41 = vld [vmem:[%s5722_s9 + $0x350] sm:$0xff] }
 0x14b   : > { %3260 = vmatpush1.bf16.msra.mxu0 %v5111_v42  ;;  %2715 = vmatprep.subr.bf16.mxu1 %v5116_v43  ;;  %v608_v42 = vld [vmem:[%s5722_s9 + $0x370] sm:$0xff]  ;;  %v4276_v43 = vcombine.low %v594_v31, %v598_v32  ;;  %v658_v31 = vld [vmem:[%s5722_s9 + $0x500] sm:$0xff] }
 0x14c   : > { %3261 = vmatprep.subr.bf16.mxu0 %v5119_v44  ;;  %2511 = vmatmul.mubr.bf16.gmra.mrb[24].mxu1 %v4228_v45  ;;  %v4280_v44 = vcombine.low %v596_v33, %v600_v34  ;;  %v4285_v45 = vcombine.high %v602_v39, %v606_v40  ;;  %v662_v32 = vld [vmem:[%s5722_s9 + $0x520] sm:$0xff]  ;;  %v660_v33 = vld [vmem:[%s5722_s9 + $0x510] sm:$0xff] }
 0x14d   : > { %3057 = vmatmul.mubr.bf16.gmra.mrb[24].mxu0 %v4232_v46  ;;  %2520 = vmatprep.mubr.bf16.mxu1 %v4237_v47  ;;  %v4289_v46 = vcombine.high %v604_v41, %v608_v42  ;;  %v610_v47 = vld [vmem:[%s5722_s9 + $0x380] sm:$0xff]  ;;  %v664_v34 = vld [vmem:[%s5722_s9 + $0x530] sm:$0xff] }
 0x14e   : > { %3066 = vmatprep.mubr.bf16.mxu0 %v4241_v48  ;;  %2716 = vmatpush1.bf16.msra.mxu1 %v5114_v49  ;;  %v614_v48 = vld [vmem:[%s5722_s9 + $0x3a0] sm:$0xff]  ;;  %v612_v49 = vld [vmem:[%s5722_s9 + $0x390] sm:$0xff] }
 0x14f   : > { %3262 = vmatpush1.bf16.msra.mxu0 %v5117_v50  ;;  %2717 = vmatprep.subr.bf16.mxu1 %v5122_v51  ;;  %v616_v50 = vld [vmem:[%s5722_s9 + $0x3b0] sm:$0xff]  ;;  %v4284_v51 = vcombine.low %v602_v39, %v606_v40  ;;  %v4293_v53 = vcombine.high %v610_v47, %v614_v48  ;;  %v666_v39 = vld [vmem:[%s5722_s9 + $0x540] sm:$0xff] }
 0x150   : > { %3263 = vmatprep.subr.bf16.mxu0 %v5125_v52  ;;  %v4288_v52 = vcombine.low %v604_v41, %v608_v42  ;;  %v4297_v54 = vcombine.high %v612_v49, %v616_v50  ;;  %v670_v40 = vld [vmem:[%s5722_s9 + $0x560] sm:$0xff]  ;;  %v668_v41 = vld [vmem:[%s5722_s9 + $0x550] sm:$0xff] }
 0x151   : > { %v672_v42 = vld [vmem:[%s5722_s9 + $0x570] sm:$0xff] }
 0x152   : > { %2718 = vmatpush1.bf16.msra.mxu1 %v5120_v57  ;;  %v620_v57 = vld [vmem:[%s5722_s9 + $0x3d0] sm:$0xff] }
 0x153   : > { %3264 = vmatpush1.bf16.msra.mxu0 %v5123_v58  ;;  %2719 = vmatprep.subr.bf16.mxu1 %v5128_v59  ;;  %v624_v58 = vld [vmem:[%s5722_s9 + $0x3f0] sm:$0xff]  ;;  %v4292_v59 = vcombine.low %v610_v47, %v614_v48  ;;  %v674_v47 = vld [vmem:[%s5722_s9 + $0x580] sm:$0xff] }
 0x154   : > { %3265 = vmatprep.subr.bf16.mxu0 %v5131_v60  ;;  %2521 = vmatmul.mubr.bf16.gmra.mrb[28].mxu1 %v4236_v61  ;;  %v4296_v60 = vcombine.low %v612_v49, %v616_v50  ;;  %v4301_v61 = vcombine.high %v618_v55, %v622_v56  ;;  %v678_v48 = vld [vmem:[%s5722_s9 + $0x5a0] sm:$0xff]  ;;  %v676_v49 = vld [vmem:[%s5722_s9 + $0x590] sm:$0xff] }
 0x155   : > { %3067 = vmatmul.mubr.bf16.gmra.mrb[28].mxu0 %v4240_v62  ;;  %2530 = vmatprep.mubr.bf16.mxu1 %v4245_v63  ;;  %v4305_v62 = vcombine.high %v620_v57, %v624_v58  ;;  %v626_v63 = vld [vmem:[%s5722_s9 + $0x400] sm:$0xff]  ;;  %v680_v50 = vld [vmem:[%s5722_s9 + $0x5b0] sm:$0xff] }
 0x156   : > { %3076 = vmatprep.mubr.bf16.mxu0 %v4249_v0  ;;  %2720 = vmatpush1.bf16.msra.mxu1 %v5126_v1  ;;  %v630_v0 = vld [vmem:[%s5722_s9 + $0x420] sm:$0xff]  ;;  %v628_v1 = vld [vmem:[%s5722_s9 + $0x410] sm:$0xff] }
 0x157   : > { %3266 = vmatpush1.bf16.msra.mxu0 %v5129_v2  ;;  %2721 = vmatprep.subr.bf16.mxu1 %v5134_v3  ;;  %v632_v2 = vld [vmem:[%s5722_s9 + $0x430] sm:$0xff]  ;;  %v4300_v3 = vcombine.low %v618_v55, %v622_v56  ;;  %v4309_v5 = vcombine.high %v626_v63, %v630_v0  ;;  %v682_v55 = vld [vmem:[%s5722_s9 + $0x5c0] sm:$0xff] }
 0x158   : > { %3267 = vmatprep.subr.bf16.mxu0 %v5137_v4  ;;  %v4304_v4 = vcombine.low %v620_v57, %v624_v58  ;;  %v4313_v6 = vcombine.high %v628_v1, %v632_v2  ;;  %v686_v56 = vld [vmem:[%s5722_s9 + $0x5e0] sm:$0xff]  ;;  %v684_v57 = vld [vmem:[%s5722_s9 + $0x5d0] sm:$0xff] }
 0x159   : > { %v688_v58 = vld [vmem:[%s5722_s9 + $0x5f0] sm:$0xff] }
 0x15a   : > { %2722 = vmatpush1.bf16.msra.mxu1 %v5132_v9  ;;  %v636_v9 = vld [vmem:[%s5722_s9 + $0x450] sm:$0xff] }
 0x15b   : > { %3268 = vmatpush1.bf16.msra.mxu0 %v5135_v10  ;;  %v640_v10 = vld [vmem:[%s5722_s9 + $0x470] sm:$0xff] }
 0x15c   : > { %2531 = vmatmul.mubr.bf16.gmra.mrb[32].mxu1 %v4244_v11  ;;  %v4308_v11 = vcombine.low %v626_v63, %v630_v0  ;;  %v499_v63 = vld [vmem:[%s5722_s9 + $0x8] sm:$0xff] }
 0x15d   : > { %3077 = vmatmul.mubr.bf16.gmra.mrb[32].mxu0 %v4248_v12  ;;  %2540 = vmatprep.mubr.bf16.mxu1 %v4253_v13  ;;  %v4312_v12 = vcombine.low %v628_v1, %v632_v2  ;;  %v4317_v13 = vcombine.high %v634_v7, %v638_v8  ;;  %v503_v0 = vld [vmem:[%s5722_s9 + $0x28] sm:$0xff]  ;;  %v501_v1 = vld [vmem:[%s5722_s9 + $0x18] sm:$0xff] }
 0x15e   : > { %3086 = vmatprep.mubr.bf16.mxu0 %v4257_v14  ;;  %v4321_v14 = vcombine.high %v636_v9, %v640_v10  ;;  %v505_v2 = vld [vmem:[%s5722_s9 + $0x38] sm:$0xff] }
 0x164   : > { %2541 = vmatmul.mubr.bf16.gmra.mrb[36].mxu1 %v4252_v19  ;;  %v4316_v19 = vcombine.low %v634_v7, %v638_v8  ;;  %v507_v7 = vld [vmem:[%s5722_s9 + $0x48] sm:$0xff] }
 0x165   : > { %3087 = vmatmul.mubr.bf16.gmra.mrb[36].mxu0 %v4256_v20  ;;  %2550 = vmatprep.mubr.bf16.mxu1 %v4261_v21  ;;  %v4320_v20 = vcombine.low %v636_v9, %v640_v10  ;;  %v4325_v21 = vcombine.high %v642_v15, %v646_v16  ;;  %v511_v8 = vld [vmem:[%s5722_s9 + $0x68] sm:$0xff]  ;;  %v509_v9 = vld [vmem:[%s5722_s9 + $0x58] sm:$0xff] }
 0x166   : > { %3096 = vmatprep.mubr.bf16.mxu0 %v4265_v22  ;;  %v4329_v22 = vcombine.high %v644_v17, %v648_v18  ;;  %v513_v10 = vld [vmem:[%s5722_s9 + $0x78] sm:$0xff] }
 0x16c   : > { %2551 = vmatmul.mubr.bf16.gmra.mrb[40].mxu1 %v4260_v27  ;;  %v4324_v27 = vcombine.low %v642_v15, %v646_v16  ;;  %v515_v15 = vld [vmem:[%s5722_s9 + $0x88] sm:$0xff] }
 0x16d   : > { %3097 = vmatmul.mubr.bf16.gmra.mrb[40].mxu0 %v4264_v28  ;;  %2560 = vmatprep.mubr.bf16.mxu1 %v4269_v29  ;;  %v4328_v28 = vcombine.low %v644_v17, %v648_v18  ;;  %v4333_v29 = vcombine.high %v650_v23, %v654_v24  ;;  %v519_v16 = vld [vmem:[%s5722_s9 + $0xa8] sm:$0xff]  ;;  %v517_v17 = vld [vmem:[%s5722_s9 + $0x98] sm:$0xff] }
 0x16e   : > { %3106 = vmatprep.mubr.bf16.mxu0 %v4273_v30  ;;  %v4337_v30 = vcombine.high %v652_v25, %v656_v26  ;;  %v521_v18 = vld [vmem:[%s5722_s9 + $0xb8] sm:$0xff] }
 0x174   : > { %2561 = vmatmul.mubr.bf16.gmra.mrb[44].mxu1 %v4268_v35  ;;  %v4332_v35 = vcombine.low %v650_v23, %v654_v24  ;;  %v523_v23 = vld [vmem:[%s5722_s9 + $0xc8] sm:$0xff] }
 0x175   : > { %3107 = vmatmul.mubr.bf16.gmra.mrb[44].mxu0 %v4272_v36  ;;  %2570 = vmatprep.mubr.bf16.mxu1 %v4277_v37  ;;  %v4336_v36 = vcombine.low %v652_v25, %v656_v26  ;;  %v4341_v37 = vcombine.high %v658_v31, %v662_v32  ;;  %v527_v24 = vld [vmem:[%s5722_s9 + $0xe8] sm:$0xff]  ;;  %v525_v25 = vld [vmem:[%s5722_s9 + $0xd8] sm:$0xff] }
 0x176   : > { %3116 = vmatprep.mubr.bf16.mxu0 %v4281_v38  ;;  %v4345_v38 = vcombine.high %v660_v33, %v664_v34  ;;  %v529_v26 = vld [vmem:[%s5722_s9 + $0xf8] sm:$0xff] }
 0x17c   : > { %2571 = vmatmul.mubr.bf16.gmra.mrb[48].mxu1 %v4276_v43  ;;  %v4340_v43 = vcombine.low %v658_v31, %v662_v32  ;;  %v531_v31 = vld [vmem:[%s5722_s9 + $0x108] sm:$0xff] }
 0x17d   : > { %3117 = vmatmul.mubr.bf16.gmra.mrb[48].mxu0 %v4280_v44  ;;  %2580 = vmatprep.mubr.bf16.mxu1 %v4285_v45  ;;  %v4344_v44 = vcombine.low %v660_v33, %v664_v34  ;;  %v4349_v45 = vcombine.high %v666_v39, %v670_v40  ;;  %v535_v32 = vld [vmem:[%s5722_s9 + $0x128] sm:$0xff]  ;;  %v533_v33 = vld [vmem:[%s5722_s9 + $0x118] sm:$0xff] }
 0x17e   : > { %3126 = vmatprep.mubr.bf16.mxu0 %v4289_v46  ;;  %v4353_v46 = vcombine.high %v668_v41, %v672_v42  ;;  %v537_v34 = vld [vmem:[%s5722_s9 + $0x138] sm:$0xff] }
 0x184   : > { %2581 = vmatmul.mubr.bf16.gmra.mrb[52].mxu1 %v4284_v51  ;;  %v4348_v51 = vcombine.low %v666_v39, %v670_v40  ;;  %v539_v39 = vld [vmem:[%s5722_s9 + $0x148] sm:$0xff] }
 0x185   : > { %3127 = vmatmul.mubr.bf16.gmra.mrb[52].mxu0 %v4288_v52  ;;  %2590 = vmatprep.mubr.bf16.mxu1 %v4293_v53  ;;  %v4352_v52 = vcombine.low %v668_v41, %v672_v42  ;;  %v4357_v53 = vcombine.high %v674_v47, %v678_v48  ;;  %v543_v40 = vld [vmem:[%s5722_s9 + $0x168] sm:$0xff]  ;;  %v541_v41 = vld [vmem:[%s5722_s9 + $0x158] sm:$0xff] }
 0x186   : > { %3136 = vmatprep.mubr.bf16.mxu0 %v4297_v54  ;;  %v4361_v54 = vcombine.high %v676_v49, %v680_v50  ;;  %v545_v42 = vld [vmem:[%s5722_s9 + $0x178] sm:$0xff] }
 0x18c   : > { %2591 = vmatmul.mubr.bf16.gmra.mrb[56].mxu1 %v4292_v59  ;;  %v4356_v59 = vcombine.low %v674_v47, %v678_v48  ;;  %v547_v47 = vld [vmem:[%s5722_s9 + $0x188] sm:$0xff] }
 0x18d   : > { %3137 = vmatmul.mubr.bf16.gmra.mrb[56].mxu0 %v4296_v60  ;;  %2600 = vmatprep.mubr.bf16.mxu1 %v4301_v61  ;;  %v4360_v60 = vcombine.low %v676_v49, %v680_v50  ;;  %v4365_v61 = vcombine.high %v682_v55, %v686_v56  ;;  %v551_v48 = vld [vmem:[%s5722_s9 + $0x1a8] sm:$0xff]  ;;  %v549_v49 = vld [vmem:[%s5722_s9 + $0x198] sm:$0xff] }
 0x18e   : > { %3146 = vmatprep.mubr.bf16.mxu0 %v4305_v62  ;;  %v4369_v62 = vcombine.high %v684_v57, %v688_v58  ;;  %v553_v50 = vld [vmem:[%s5722_s9 + $0x1b8] sm:$0xff] }
 0x194   : > { %2601 = vmatmul.mubr.bf16.gmra.mrb[60].mxu1 %v4300_v3  ;;  %v4364_v3 = vcombine.low %v682_v55, %v686_v56  ;;  %v555_v55 = vld [vmem:[%s5722_s9 + $0x1c8] sm:$0xff] }
 0x195   : > { %3147 = vmatmul.mubr.bf16.gmra.mrb[60].mxu0 %v4304_v4  ;;  %2610 = vmatprep.mubr.bf16.mxu1 %v4309_v5  ;;  %v4368_v4 = vcombine.low %v684_v57, %v688_v58  ;;  %v4183_v5 = vcombine.high %v499_v63, %v503_v0  ;;  %v559_v56 = vld [vmem:[%s5722_s9 + $0x1e8] sm:$0xff]  ;;  %v557_v57 = vld [vmem:[%s5722_s9 + $0x1d8] sm:$0xff] }
 0x196   : > { %3156 = vmatprep.mubr.bf16.mxu0 %v4313_v6  ;;  %v4187_v6 = vcombine.high %v501_v1, %v505_v2  ;;  %v561_v58 = vld [vmem:[%s5722_s9 + $0x1f8] sm:$0xff] }
 0x19c   : > { %2611 = vmatmul.mubr.bf16.gmra.mrb[64].mxu1 %v4308_v11  ;;  %v4182_v11 = vcombine.low %v499_v63, %v503_v0  ;;  %v563_v63 = vld [vmem:[%s5722_s9 + $0x208] sm:$0xff] }
 0x19d   : > { %3157 = vmatmul.mubr.bf16.gmra.mrb[64].mxu0 %v4312_v12  ;;  %2620 = vmatprep.mubr.bf16.mxu1 %v4317_v13  ;;  %v4186_v12 = vcombine.low %v501_v1, %v505_v2  ;;  %v4191_v13 = vcombine.high %v507_v7, %v511_v8  ;;  %v567_v0 = vld [vmem:[%s5722_s9 + $0x228] sm:$0xff]  ;;  %v565_v1 = vld [vmem:[%s5722_s9 + $0x218] sm:$0xff] }
 0x19e   : > { %3166 = vmatprep.mubr.bf16.mxu0 %v4321_v14  ;;  %v4195_v14 = vcombine.high %v509_v9, %v513_v10  ;;  %v569_v2 = vld [vmem:[%s5722_s9 + $0x238] sm:$0xff] }
 0x1a4   : > { %2621 = vmatmul.mubr.bf16.gmra.mrb[68].mxu1 %v4316_v19  ;;  %v4190_v19 = vcombine.low %v507_v7, %v511_v8  ;;  %v571_v7 = vld [vmem:[%s5722_s9 + $0x248] sm:$0xff] }
 0x1a5   : > { %3167 = vmatmul.mubr.bf16.gmra.mrb[68].mxu0 %v4320_v20  ;;  %2630 = vmatprep.mubr.bf16.mxu1 %v4325_v21  ;;  %v4194_v20 = vcombine.low %v509_v9, %v513_v10  ;;  %v4199_v21 = vcombine.high %v515_v15, %v519_v16  ;;  %v575_v8 = vld [vmem:[%s5722_s9 + $0x268] sm:$0xff]  ;;  %v573_v9 = vld [vmem:[%s5722_s9 + $0x258] sm:$0xff] }
 0x1a6   : > { %3176 = vmatprep.mubr.bf16.mxu0 %v4329_v22  ;;  %v4203_v22 = vcombine.high %v517_v17, %v521_v18  ;;  %v577_v10 = vld [vmem:[%s5722_s9 + $0x278] sm:$0xff] }
 0x1ac   : > { %2631 = vmatmul.mubr.bf16.gmra.mrb[72].mxu1 %v4324_v27  ;;  %v4198_v27 = vcombine.low %v515_v15, %v519_v16  ;;  %v579_v15 = vld [vmem:[%s5722_s9 + $0x288] sm:$0xff] }
 0x1ad   : > { %3177 = vmatmul.mubr.bf16.gmra.mrb[72].mxu0 %v4328_v28  ;;  %2640 = vmatprep.mubr.bf16.mxu1 %v4333_v29  ;;  %v4202_v28 = vcombine.low %v517_v17, %v521_v18  ;;  %v4207_v29 = vcombine.high %v523_v23, %v527_v24  ;;  %v583_v16 = vld [vmem:[%s5722_s9 + $0x2a8] sm:$0xff]  ;;  %v581_v17 = vld [vmem:[%s5722_s9 + $0x298] sm:$0xff] }
 0x1ae   : > { %3186 = vmatprep.mubr.bf16.mxu0 %v4337_v30  ;;  %v4211_v30 = vcombine.high %v525_v25, %v529_v26  ;;  %v585_v18 = vld [vmem:[%s5722_s9 + $0x2b8] sm:$0xff] }
 0x1b4   : > { %2641 = vmatmul.mubr.bf16.gmra.mrb[76].mxu1 %v4332_v35  ;;  %v4206_v35 = vcombine.low %v523_v23, %v527_v24  ;;  %v587_v23 = vld [vmem:[%s5722_s9 + $0x2c8] sm:$0xff] }
 0x1b5   : > { %3187 = vmatmul.mubr.bf16.gmra.mrb[76].mxu0 %v4336_v36  ;;  %2650 = vmatprep.mubr.bf16.mxu1 %v4341_v37  ;;  %v4210_v36 = vcombine.low %v525_v25, %v529_v26  ;;  %v4215_v37 = vcombine.high %v531_v31, %v535_v32  ;;  %v591_v24 = vld [vmem:[%s5722_s9 + $0x2e8] sm:$0xff]  ;;  %v589_v25 = vld [vmem:[%s5722_s9 + $0x2d8] sm:$0xff] }
 0x1b6   : > { %3196 = vmatprep.mubr.bf16.mxu0 %v4345_v38  ;;  %v4219_v38 = vcombine.high %v533_v33, %v537_v34  ;;  %v593_v26 = vld [vmem:[%s5722_s9 + $0x2f8] sm:$0xff] }
 0x1bc   : > { %2651 = vmatmul.mubr.bf16.gmra.mrb[80].mxu1 %v4340_v43  ;;  %v4214_v43 = vcombine.low %v531_v31, %v535_v32  ;;  %v595_v31 = vld [vmem:[%s5722_s9 + $0x308] sm:$0xff] }
 0x1bd   : > { %3197 = vmatmul.mubr.bf16.gmra.mrb[80].mxu0 %v4344_v44  ;;  %2660 = vmatprep.mubr.bf16.mxu1 %v4349_v45  ;;  %v4218_v44 = vcombine.low %v533_v33, %v537_v34  ;;  %v4223_v45 = vcombine.high %v539_v39, %v543_v40  ;;  %v599_v32 = vld [vmem:[%s5722_s9 + $0x328] sm:$0xff]  ;;  %v597_v33 = vld [vmem:[%s5722_s9 + $0x318] sm:$0xff] }
 0x1be   : > { %3206 = vmatprep.mubr.bf16.mxu0 %v4353_v46  ;;  %v4227_v46 = vcombine.high %v541_v41, %v545_v42  ;;  %v601_v34 = vld [vmem:[%s5722_s9 + $0x338] sm:$0xff] }
 0x1c4   : > { %2661 = vmatmul.mubr.bf16.gmra.mrb[84].mxu1 %v4348_v51  ;;  %v4222_v51 = vcombine.low %v539_v39, %v543_v40  ;;  %v603_v39 = vld [vmem:[%s5722_s9 + $0x348] sm:$0xff] }
 0x1c5   : > { %3207 = vmatmul.mubr.bf16.gmra.mrb[84].mxu0 %v4352_v52  ;;  %2670 = vmatprep.mubr.bf16.mxu1 %v4357_v53  ;;  %v4226_v52 = vcombine.low %v541_v41, %v545_v42  ;;  %v4231_v53 = vcombine.high %v547_v47, %v551_v48  ;;  %v607_v40 = vld [vmem:[%s5722_s9 + $0x368] sm:$0xff]  ;;  %v605_v41 = vld [vmem:[%s5722_s9 + $0x358] sm:$0xff] }
 0x1c6   : > { %3216 = vmatprep.mubr.bf16.mxu0 %v4361_v54  ;;  %v4235_v54 = vcombine.high %v549_v49, %v553_v50  ;;  %v609_v42 = vld [vmem:[%s5722_s9 + $0x378] sm:$0xff] }
 0x1cc   : > { %2671 = vmatmul.mubr.bf16.gmra.mrb[88].mxu1 %v4356_v59  ;;  %v4230_v59 = vcombine.low %v547_v47, %v551_v48  ;;  %v611_v47 = vld [vmem:[%s5722_s9 + $0x388] sm:$0xff] }
 0x1cd   : > { %3217 = vmatmul.mubr.bf16.gmra.mrb[88].mxu0 %v4360_v60  ;;  %2680 = vmatprep.mubr.bf16.mxu1 %v4365_v61  ;;  %v4234_v60 = vcombine.low %v549_v49, %v553_v50  ;;  %v4239_v61 = vcombine.high %v555_v55, %v559_v56  ;;  %v615_v48 = vld [vmem:[%s5722_s9 + $0x3a8] sm:$0xff]  ;;  %v613_v49 = vld [vmem:[%s5722_s9 + $0x398] sm:$0xff] }
 0x1ce   : > { %3226 = vmatprep.mubr.bf16.mxu0 %v4369_v62  ;;  %v4243_v62 = vcombine.high %v557_v57, %v561_v58  ;;  %v617_v50 = vld [vmem:[%s5722_s9 + $0x3b8] sm:$0xff] }
 0x1d4   : > { %2681 = vmatmul.mubr.bf16.gmra.mrb[92].mxu1 %v4364_v3  ;;  %v4238_v3 = vcombine.low %v555_v55, %v559_v56  ;;  %v619_v55 = vld [vmem:[%s5722_s9 + $0x3c8] sm:$0xff] }
 0x1d5   : > { %3227 = vmatmul.mubr.bf16.gmra.mrb[92].mxu0 %v4368_v4  ;;  %2723 = vmatprep.mubr.bf16.mxu1 %v4183_v5  ;;  %v4242_v4 = vcombine.low %v557_v57, %v561_v58  ;;  %v4247_v5 = vcombine.high %v563_v63, %v567_v0  ;;  %v623_v56 = vld [vmem:[%s5722_s9 + $0x3e8] sm:$0xff]  ;;  %v621_v57 = vld [vmem:[%s5722_s9 + $0x3d8] sm:$0xff] }
 0x1d6   : > { %3269 = vmatprep.mubr.bf16.mxu0 %v4187_v6  ;;  %v4251_v6 = vcombine.high %v565_v1, %v569_v2  ;;  %v625_v58 = vld [vmem:[%s5722_s9 + $0x3f8] sm:$0xff] }
 0x1dc   : > { %2724 = vmatmul.mubr.bf16.vlgmr.msra.gmra.mrb[0].mxu1 %v4182_v11  ;;  %v4246_v11 = vcombine.low %v563_v63, %v567_v0  ;;  %v627_v63 = vld [vmem:[%s5722_s9 + $0x408] sm:$0xff] }
 0x1dd   : > { %3270 = vmatmul.mubr.bf16.vlgmr.msra.gmra.mrb[0].mxu0 %v4186_v12  ;;  %2733 = vmatprep.mubr.bf16.mxu1 %v4191_v13  ;;  %v4250_v12 = vcombine.low %v565_v1, %v569_v2  ;;  %v4255_v13 = vcombine.high %v571_v7, %v575_v8  ;;  %v631_v0 = vld [vmem:[%s5722_s9 + $0x428] sm:$0xff]  ;;  %v629_v1 = vld [vmem:[%s5722_s9 + $0x418] sm:$0xff] }
 0x1de   : > { %3279 = vmatprep.mubr.bf16.mxu0 %v4195_v14  ;;  %v4259_v14 = vcombine.high %v573_v9, %v577_v10  ;;  %v633_v2 = vld [vmem:[%s5722_s9 + $0x438] sm:$0xff] }
 0x1e4   : > { %2734 = vmatmul.mubr.bf16.gmra.mrb[4].mxu1 %v4190_v19  ;;  %v4254_v19 = vcombine.low %v571_v7, %v575_v8  ;;  %v635_v7 = vld [vmem:[%s5722_s9 + $0x448] sm:$0xff] }
 0x1e5   : > { %3280 = vmatmul.mubr.bf16.gmra.mrb[4].mxu0 %v4194_v20  ;;  %2743 = vmatprep.mubr.bf16.mxu1 %v4199_v21  ;;  %v4258_v20 = vcombine.low %v573_v9, %v577_v10  ;;  %v4263_v21 = vcombine.high %v579_v15, %v583_v16  ;;  %v639_v8 = vld [vmem:[%s5722_s9 + $0x468] sm:$0xff]  ;;  %v637_v9 = vld [vmem:[%s5722_s9 + $0x458] sm:$0xff] }
 0x1e6   : > { %3289 = vmatprep.mubr.bf16.mxu0 %v4203_v22  ;;  %v4267_v22 = vcombine.high %v581_v17, %v585_v18  ;;  %v641_v10 = vld [vmem:[%s5722_s9 + $0x478] sm:$0xff] }
 0x1ec   : > { %2744 = vmatmul.mubr.bf16.gmra.mrb[8].mxu1 %v4198_v27  ;;  %v4262_v27 = vcombine.low %v579_v15, %v583_v16  ;;  %v643_v15 = vld [vmem:[%s5722_s9 + $0x488] sm:$0xff] }
 0x1ed   : > { %3290 = vmatmul.mubr.bf16.gmra.mrb[8].mxu0 %v4202_v28  ;;  %2753 = vmatprep.mubr.bf16.mxu1 %v4207_v29  ;;  %v4266_v28 = vcombine.low %v581_v17, %v585_v18  ;;  %v4271_v29 = vcombine.high %v587_v23, %v591_v24  ;;  %v647_v16 = vld [vmem:[%s5722_s9 + $0x4a8] sm:$0xff]  ;;  %v645_v17 = vld [vmem:[%s5722_s9 + $0x498] sm:$0xff] }
 0x1ee   : > { %3299 = vmatprep.mubr.bf16.mxu0 %v4211_v30  ;;  %v4275_v30 = vcombine.high %v589_v25, %v593_v26  ;;  %v649_v18 = vld [vmem:[%s5722_s9 + $0x4b8] sm:$0xff] }
 0x1f4   : > { %2754 = vmatmul.mubr.bf16.gmra.mrb[12].mxu1 %v4206_v35  ;;  %v4270_v35 = vcombine.low %v587_v23, %v591_v24  ;;  %v651_v23 = vld [vmem:[%s5722_s9 + $0x4c8] sm:$0xff] }
 0x1f5   : > { %3300 = vmatmul.mubr.bf16.gmra.mrb[12].mxu0 %v4210_v36  ;;  %2763 = vmatprep.mubr.bf16.mxu1 %v4215_v37  ;;  %v4274_v36 = vcombine.low %v589_v25, %v593_v26  ;;  %v4279_v37 = vcombine.high %v595_v31, %v599_v32  ;;  %v655_v24 = vld [vmem:[%s5722_s9 + $0x4e8] sm:$0xff]  ;;  %v653_v25 = vld [vmem:[%s5722_s9 + $0x4d8] sm:$0xff] }
 0x1f6   : > { %3309 = vmatprep.mubr.bf16.mxu0 %v4219_v38  ;;  %v4283_v38 = vcombine.high %v597_v33, %v601_v34  ;;  %v657_v26 = vld [vmem:[%s5722_s9 + $0x4f8] sm:$0xff] }
 0x1fc   : > { %2764 = vmatmul.mubr.bf16.gmra.mrb[16].mxu1 %v4214_v43  ;;  %v4278_v43 = vcombine.low %v595_v31, %v599_v32  ;;  %v659_v31 = vld [vmem:[%s5722_s9 + $0x508] sm:$0xff] }
 0x1fd   : > { %3310 = vmatmul.mubr.bf16.gmra.mrb[16].mxu0 %v4218_v44  ;;  %2773 = vmatprep.mubr.bf16.mxu1 %v4223_v45  ;;  %v4282_v44 = vcombine.low %v597_v33, %v601_v34  ;;  %v4287_v45 = vcombine.high %v603_v39, %v607_v40  ;;  %v663_v32 = vld [vmem:[%s5722_s9 + $0x528] sm:$0xff]  ;;  %v661_v33 = vld [vmem:[%s5722_s9 + $0x518] sm:$0xff] }
 0x1fe   : > { %3319 = vmatprep.mubr.bf16.mxu0 %v4227_v46  ;;  %v4291_v46 = vcombine.high %v605_v41, %v609_v42  ;;  %v665_v34 = vld [vmem:[%s5722_s9 + $0x538] sm:$0xff] }
 0x204   : > { %2774 = vmatmul.mubr.bf16.gmra.mrb[20].mxu1 %v4222_v51  ;;  %v4286_v51 = vcombine.low %v603_v39, %v607_v40  ;;  %v667_v39 = vld [vmem:[%s5722_s9 + $0x548] sm:$0xff] }
 0x205   : > { %3320 = vmatmul.mubr.bf16.gmra.mrb[20].mxu0 %v4226_v52  ;;  %2783 = vmatprep.mubr.bf16.mxu1 %v4231_v53  ;;  %v4290_v52 = vcombine.low %v605_v41, %v609_v42  ;;  %v4295_v53 = vcombine.high %v611_v47, %v615_v48  ;;  %v671_v40 = vld [vmem:[%s5722_s9 + $0x568] sm:$0xff]  ;;  %v669_v41 = vld [vmem:[%s5722_s9 + $0x558] sm:$0xff] }
 0x206   : > { %3329 = vmatprep.mubr.bf16.mxu0 %v4235_v54  ;;  %v4299_v54 = vcombine.high %v613_v49, %v617_v50  ;;  %v673_v42 = vld [vmem:[%s5722_s9 + $0x578] sm:$0xff] }
 0x20c   : > { %2784 = vmatmul.mubr.bf16.gmra.mrb[24].mxu1 %v4230_v59  ;;  %v4294_v59 = vcombine.low %v611_v47, %v615_v48  ;;  %v675_v47 = vld [vmem:[%s5722_s9 + $0x588] sm:$0xff] }
 0x20d   : > { %3330 = vmatmul.mubr.bf16.gmra.mrb[24].mxu0 %v4234_v60  ;;  %2793 = vmatprep.mubr.bf16.mxu1 %v4239_v61  ;;  %v4298_v60 = vcombine.low %v613_v49, %v617_v50  ;;  %v4303_v61 = vcombine.high %v619_v55, %v623_v56  ;;  %v679_v48 = vld [vmem:[%s5722_s9 + $0x5a8] sm:$0xff]  ;;  %v677_v49 = vld [vmem:[%s5722_s9 + $0x598] sm:$0xff] }
 0x20e   : > { %3339 = vmatprep.mubr.bf16.mxu0 %v4243_v62  ;;  %v4307_v62 = vcombine.high %v621_v57, %v625_v58  ;;  %v681_v50 = vld [vmem:[%s5722_s9 + $0x5b8] sm:$0xff] }
 0x214   : > { %2794 = vmatmul.mubr.bf16.gmra.mrb[28].mxu1 %v4238_v3  ;;  %v4302_v3 = vcombine.low %v619_v55, %v623_v56  ;;  %v683_v55 = vld [vmem:[%s5722_s9 + $0x5c8] sm:$0xff] }
 0x215   : > { %3340 = vmatmul.mubr.bf16.gmra.mrb[28].mxu0 %v4242_v4  ;;  %2803 = vmatprep.mubr.bf16.mxu1 %v4247_v5  ;;  %v4306_v4 = vcombine.low %v621_v57, %v625_v58  ;;  %v4311_v5 = vcombine.high %v627_v63, %v631_v0  ;;  %v687_v56 = vld [vmem:[%s5722_s9 + $0x5e8] sm:$0xff]  ;;  %v685_v57 = vld [vmem:[%s5722_s9 + $0x5d8] sm:$0xff] }
 0x216   : > { %3349 = vmatprep.mubr.bf16.mxu0 %v4251_v6  ;;  %v4315_v6 = vcombine.high %v629_v1, %v633_v2  ;;  %v689_v58 = vld [vmem:[%s5722_s9 + $0x5f8] sm:$0xff] }
 0x21c   : > { %2804 = vmatmul.mubr.bf16.gmra.mrb[32].mxu1 %v4246_v11  ;;  %v4310_v11 = vcombine.low %v627_v63, %v631_v0  ;;  %v4366_v63 = vcombine.low %v683_v55, %v687_v56  ;;  %v4370_v0 = vcombine.low %v685_v57, %v689_v58 }
 0x21d   : > { %3350 = vmatmul.mubr.bf16.gmra.mrb[32].mxu0 %v4250_v12  ;;  %2813 = vmatprep.mubr.bf16.mxu1 %v4255_v13  ;;  %v4314_v12 = vcombine.low %v629_v1, %v633_v2  ;;  %v4319_v13 = vcombine.high %v635_v7, %v639_v8  ;;  %v402_v2 = vld [vmem:[#allocation2] sm:$0xff] }
 0x21e   : > { %3359 = vmatprep.mubr.bf16.mxu0 %v4259_v14  ;;  %v4323_v14 = vcombine.high %v637_v9, %v641_v10 }
 0x224   : > { %2814 = vmatmul.mubr.bf16.gmra.mrb[36].mxu1 %v4254_v19  ;;  %v4318_v19 = vcombine.low %v635_v7, %v639_v8 }
 0x225   : > { %3360 = vmatmul.mubr.bf16.gmra.mrb[36].mxu0 %v4258_v20  ;;  %2823 = vmatprep.mubr.bf16.mxu1 %v4263_v21  ;;  %v4322_v20 = vcombine.low %v637_v9, %v641_v10  ;;  %v4327_v21 = vcombine.high %v643_v15, %v647_v16  ;;  %v404_v10 = vld [vmem:[#allocation2 + $0x10] sm:$0xff] }
 0x226   : > { %3369 = vmatprep.mubr.bf16.mxu0 %v4267_v22  ;;  %v4331_v22 = vcombine.high %v645_v17, %v649_v18 }
 0x22c   : > { %2824 = vmatmul.mubr.bf16.gmra.mrb[40].mxu1 %v4262_v27  ;;  %v4326_v27 = vcombine.low %v643_v15, %v647_v16  ;;  %v405_v15 = vld [vmem:[#allocation2 + $0x18] sm:$0xff] }
 0x22d   : > { %3370 = vmatmul.mubr.bf16.gmra.mrb[40].mxu0 %v4266_v28  ;;  %2833 = vmatprep.mubr.bf16.mxu1 %v4271_v29  ;;  %v4330_v28 = vcombine.low %v645_v17, %v649_v18  ;;  %v4335_v29 = vcombine.high %v651_v23, %v655_v24 }
 0x22e   : > { %3379 = vmatprep.mubr.bf16.mxu0 %v4275_v30  ;;  %v4339_v30 = vcombine.high %v653_v25, %v657_v26 }
 0x234   : > { %2834 = vmatmul.mubr.bf16.gmra.mrb[44].mxu1 %v4270_v35  ;;  %v4334_v35 = vcombine.low %v651_v23, %v655_v24 }
 0x235   : > { %3380 = vmatmul.mubr.bf16.gmra.mrb[44].mxu0 %v4274_v36  ;;  %2843 = vmatprep.mubr.bf16.mxu1 %v4279_v37  ;;  %v4338_v36 = vcombine.low %v653_v25, %v657_v26  ;;  %v4343_v37 = vcombine.high %v659_v31, %v663_v32  ;;  %v407_v26 = vld [vmem:[#allocation2 + $0x28] sm:$0xff] }
 0x236   : > { %3389 = vmatprep.mubr.bf16.mxu0 %v4283_v38  ;;  %v4347_v38 = vcombine.high %v661_v33, %v665_v34 }
 0x23c   : > { %2844 = vmatmul.mubr.bf16.gmra.mrb[48].mxu1 %v4278_v43  ;;  %v4342_v43 = vcombine.low %v659_v31, %v663_v32 }
 0x23d   : > { %3390 = vmatmul.mubr.bf16.gmra.mrb[48].mxu0 %v4282_v44  ;;  %2853 = vmatprep.mubr.bf16.mxu1 %v4287_v45  ;;  %v4346_v44 = vcombine.low %v661_v33, %v665_v34  ;;  %v4351_v45 = vcombine.high %v667_v39, %v671_v40 }
 0x23e   : > { %3399 = vmatprep.mubr.bf16.mxu0 %v4291_v46  ;;  %v4355_v46 = vcombine.high %v669_v41, %v673_v42 }
 0x244   : > { %2854 = vmatmul.mubr.bf16.gmra.mrb[52].mxu1 %v4286_v51  ;;  %v4350_v51 = vcombine.low %v667_v39, %v671_v40 }
 0x245   : > { %3400 = vmatmul.mubr.bf16.gmra.mrb[52].mxu0 %v4290_v52  ;;  %2863 = vmatprep.mubr.bf16.mxu1 %v4295_v53  ;;  %v4354_v52 = vcombine.low %v669_v41, %v673_v42  ;;  %v4359_v53 = vcombine.high %v675_v47, %v679_v48  ;;  %v410_v42 = vld [vmem:[#allocation2 + $0x40] sm:$0xff] }
 0x246   : > { %3409 = vmatprep.mubr.bf16.mxu0 %v4299_v54  ;;  %v4363_v54 = vcombine.high %v677_v49, %v681_v50 }
 0x24c   : > { %2864 = vmatmul.mubr.bf16.gmra.mrb[56].mxu1 %v4294_v59  ;;  %v4358_v59 = vcombine.low %v675_v47, %v679_v48 }
 0x24d   : > { %3410 = vmatmul.mubr.bf16.gmra.mrb[56].mxu0 %v4298_v60  ;;  %2873 = vmatprep.mubr.bf16.mxu1 %v4303_v61  ;;  %v4362_v60 = vcombine.low %v677_v49, %v681_v50  ;;  %v4367_v61 = vcombine.high %v683_v55, %v687_v56  ;;  %v412_v50 = vld [vmem:[#allocation2 + $0x50] sm:$0xff]  ;;  %v413_v55 = vld [vmem:[#allocation2 + $0x58] sm:$0xff] }
 0x24e   : > { %3419 = vmatprep.mubr.bf16.mxu0 %v4307_v62  ;;  %v4371_v62 = vcombine.high %v685_v57, %v689_v58 }
 0x254   : > { %2874 = vmatmul.mubr.bf16.gmra.mrb[60].mxu1 %v4302_v3 }
 0x255   : > { %3420 = vmatmul.mubr.bf16.gmra.mrb[60].mxu0 %v4306_v4  ;;  %2883 = vmatprep.mubr.bf16.mxu1 %v4311_v5 }
 0x256   : > { %3429 = vmatprep.mubr.bf16.mxu0 %v4315_v6  ;;  %v403_v6 = vld [vmem:[#allocation2 + $0x8] sm:$0xff] }
 0x25c   : > { %2884 = vmatmul.mubr.bf16.gmra.mrb[64].mxu1 %v4310_v11 }
 0x25d   : > { %3430 = vmatmul.mubr.bf16.gmra.mrb[64].mxu0 %v4314_v12  ;;  %2893 = vmatprep.mubr.bf16.mxu1 %v4319_v13 }
 0x25e   : > { %3439 = vmatprep.mubr.bf16.mxu0 %v4323_v14 }
 0x264   : > { %2894 = vmatmul.mubr.bf16.gmra.mrb[68].mxu1 %v4318_v19 }
 0x265   : > { %3440 = vmatmul.mubr.bf16.gmra.mrb[68].mxu0 %v4322_v20  ;;  %2903 = vmatprep.mubr.bf16.mxu1 %v4327_v21 }
 0x266   : > { %3449 = vmatprep.mubr.bf16.mxu0 %v4331_v22  ;;  %v406_v22 = vld [vmem:[#allocation2 + $0x20] sm:$0xff] }
 0x26c   : > { %2904 = vmatmul.mubr.bf16.gmra.mrb[72].mxu1 %v4326_v27 }
 0x26d   : > { %3450 = vmatmul.mubr.bf16.gmra.mrb[72].mxu0 %v4330_v28  ;;  %2913 = vmatprep.mubr.bf16.mxu1 %v4335_v29 }
 0x26e   : > { %3459 = vmatprep.mubr.bf16.mxu0 %v4339_v30  ;;  %v408_v30 = vld [vmem:[#allocation2 + $0x30] sm:$0xff] }
 0x274   : > { %2914 = vmatmul.mubr.bf16.gmra.mrb[76].mxu1 %v4334_v35  ;;  %v409_v35 = vld [vmem:[#allocation2 + $0x38] sm:$0xff] }
 0x275   : > { %3460 = vmatmul.mubr.bf16.gmra.mrb[76].mxu0 %v4338_v36  ;;  %2923 = vmatprep.mubr.bf16.mxu1 %v4343_v37 }
 0x276   : > { %3469 = vmatprep.mubr.bf16.mxu0 %v4347_v38 }
 0x27c   : > { %2924 = vmatmul.mubr.bf16.gmra.mrb[80].mxu1 %v4342_v43 }
 0x27d   : > { %3470 = vmatmul.mubr.bf16.gmra.mrb[80].mxu0 %v4346_v44  ;;  %2933 = vmatprep.mubr.bf16.mxu1 %v4351_v45 }
 0x27e   : > { %3479 = vmatprep.mubr.bf16.mxu0 %v4355_v46  ;;  %v411_v46 = vld [vmem:[#allocation2 + $0x48] sm:$0xff] }
 0x284   : > { %2934 = vmatmul.mubr.bf16.gmra.mrb[84].mxu1 %v4350_v51 }
 0x285   : > { %3480 = vmatmul.mubr.bf16.gmra.mrb[84].mxu0 %v4354_v52  ;;  %2943 = vmatprep.mubr.bf16.mxu1 %v4359_v53 }
 0x286   : > { %3489 = vmatprep.mubr.bf16.mxu0 %v4363_v54 }
 0x28c   : > { %2944 = vmatmul.mubr.bf16.gmra.mrb[88].mxu1 %v4358_v59 }
 0x28d   : > { %3490 = vmatmul.mubr.bf16.gmra.mrb[88].mxu0 %v4362_v60  ;;  %2953 = vmatprep.mubr.bf16.mxu1 %v4367_v61 }
 0x28e   : > { %3499 = vmatprep.mubr.bf16.mxu0 %v4371_v62  ;;  %v414_v62 = vld [vmem:[#allocation2 + $0x60] sm:$0xff] }
 0x294   : > { %2954 = vmatmul.mubr.bf16.gmra.mrb[92].mxu1 %v4366_v63 }
 0x295   : > { %3500 = vmatmul.mubr.bf16.gmra.mrb[92].mxu0 %v4370_v0 }
 0x2af   : > { %v2725_v1 = vpop.f32.mrb[0].mxu1 }
 0x2b0   : > { %v3271_v3 = vpop.f32.mrb[0].mxu0  ;;  %v2727_v5 = vpop.f32.mrb[1].mxu1 }
 0x2b1   : > { %v4509_v4 = vadd.f32 %v3271_v3, %v2725_v1  ;;  %v3273_v7 = vpop.f32.mrb[1].mxu0  ;;  %v2729_v9 = vpop.f32.mrb[2].mxu1 }
 0x2b2   : > { %v4510_v8 = vadd.f32 %v3273_v7, %v2727_v5  ;;  %v3275_v11 = vpop.f32.mrb[2].mxu0  ;;  %v2731_v14 = vpop.f32.mrb[3].mxu1 }
 0x2b3   : > { %v3510_v12 = vadd.f32 %v4509_v4, %v402_v2  ;;  %v4511_v13 = vadd.f32 %v3275_v11, %v2729_v9  ;;  %v3277_v16 = vpop.f32.mrb[3].mxu0  ;;  %v415_v2 = vld [vmem:[#allocation2 + $0x68] sm:$0xff]  ;;  %v417_v11 = vld [vmem:[#allocation2 + $0x78] sm:$0xff] }
 0x2b4   : > { %v3511_v17 = vadd.f32 %v4510_v8, %v403_v6  ;;  %v4512_v18 = vadd.f32 %v3277_v16, %v2731_v14  ;;  %v416_v6 = vld [vmem:[#allocation2 + $0x70] sm:$0xff] }
 0x2b5   : > { %3606 = vst [vmem:[#allocation2] sm:$0xff] %v3510_v12  ;;  %v3512_v19 = vadd.f32 %v4511_v13, %v404_v10 }
 0x2b6   : > { %3607 = vst [vmem:[#allocation2 + $0x8] sm:$0xff] %v3511_v17  ;;  %v3513_v20 = vadd.f32 %v4512_v18, %v405_v15  ;;  %v418_v18 = vld [vmem:[#allocation2 + $0x80] sm:$0xff] }
 0x2b7   : > { %3608 = vst [vmem:[#allocation2 + $0x10] sm:$0xff] %v3512_v19  ;;  %v2735_v21 = vpop.f32.mrb[4].mxu1 }
 0x2b8   : > { %3609 = vst [vmem:[#allocation2 + $0x18] sm:$0xff] %v3513_v20  ;;  %v3281_v23 = vpop.f32.mrb[4].mxu0  ;;  %v2737_v25 = vpop.f32.mrb[5].mxu1 }
 0x2b9   : > { %v4513_v24 = vadd.f32 %v3281_v23, %v2735_v21  ;;  %v3283_v27 = vpop.f32.mrb[5].mxu0  ;;  %v2739_v29 = vpop.f32.mrb[6].mxu1 }
 0x2ba   : > { %v4514_v28 = vadd.f32 %v3283_v27, %v2737_v25  ;;  %v3285_v31 = vpop.f32.mrb[6].mxu0  ;;  %v2741_v34 = vpop.f32.mrb[7].mxu1 }
 0x2bb   : > { %v3514_v32 = vadd.f32 %v4513_v24, %v406_v22  ;;  %v4515_v33 = vadd.f32 %v3285_v31, %v2739_v29  ;;  %v3287_v36 = vpop.f32.mrb[7].mxu0  ;;  %v419_v22 = vld [vmem:[#allocation2 + $0x88] sm:$0xff]  ;;  %v421_v31 = vld [vmem:[#allocation2 + $0x98] sm:$0xff] }
 0x2bc   : > { %v3515_v37 = vadd.f32 %v4514_v28, %v407_v26  ;;  %v4516_v38 = vadd.f32 %v3287_v36, %v2741_v34  ;;  %v420_v26 = vld [vmem:[#allocation2 + $0x90] sm:$0xff] }
 0x2bd   : > { %3610 = vst [vmem:[#allocation2 + $0x20] sm:$0xff] %v3514_v32  ;;  %v3516_v39 = vadd.f32 %v4515_v33, %v408_v30 }
 0x2be   : > { %3611 = vst [vmem:[#allocation2 + $0x28] sm:$0xff] %v3515_v37  ;;  %v3517_v40 = vadd.f32 %v4516_v38, %v409_v35  ;;  %v422_v38 = vld [vmem:[#allocation2 + $0xa0] sm:$0xff] }
 0x2bf   : > { %3612 = vst [vmem:[#allocation2 + $0x30] sm:$0xff] %v3516_v39  ;;  %v2745_v41 = vpop.f32.mrb[8].mxu1 }
 0x2c0   : > { %3613 = vst [vmem:[#allocation2 + $0x38] sm:$0xff] %v3517_v40  ;;  %v3291_v43 = vpop.f32.mrb[8].mxu0  ;;  %v2747_v45 = vpop.f32.mrb[9].mxu1 }
 0x2c1   : > { %v4517_v44 = vadd.f32 %v3291_v43, %v2745_v41  ;;  %v3293_v47 = vpop.f32.mrb[9].mxu0  ;;  %v2749_v49 = vpop.f32.mrb[10].mxu1 }
 0x2c2   : > { %v4518_v48 = vadd.f32 %v3293_v47, %v2747_v45  ;;  %v3295_v51 = vpop.f32.mrb[10].mxu0  ;;  %v2751_v54 = vpop.f32.mrb[11].mxu1 }
 0x2c3   : > { %v3518_v52 = vadd.f32 %v4517_v44, %v410_v42  ;;  %v4519_v53 = vadd.f32 %v3295_v51, %v2749_v49  ;;  %v3297_v56 = vpop.f32.mrb[11].mxu0  ;;  %v423_v42 = vld [vmem:[#allocation2 + $0xa8] sm:$0xff]  ;;  %v425_v51 = vld [vmem:[#allocation2 + $0xb8] sm:$0xff] }
 0x2c4   : > { %v3519_v57 = vadd.f32 %v4518_v48, %v411_v46  ;;  %v4520_v58 = vadd.f32 %v3297_v56, %v2751_v54  ;;  %v424_v46 = vld [vmem:[#allocation2 + $0xb0] sm:$0xff] }
 0x2c5   : > { %3614 = vst [vmem:[#allocation2 + $0x40] sm:$0xff] %v3518_v52  ;;  %v3520_v59 = vadd.f32 %v4519_v53, %v412_v50 }
 0x2c6   : > { %3615 = vst [vmem:[#allocation2 + $0x48] sm:$0xff] %v3519_v57  ;;  %v3521_v60 = vadd.f32 %v4520_v58, %v413_v55  ;;  %v426_v58 = vld [vmem:[#allocation2 + $0xc0] sm:$0xff] }
 0x2c7   : > { %3616 = vst [vmem:[#allocation2 + $0x50] sm:$0xff] %v3520_v59  ;;  %v2755_v61 = vpop.f32.mrb[12].mxu1 }
 0x2c8   : > { %3617 = vst [vmem:[#allocation2 + $0x58] sm:$0xff] %v3521_v60  ;;  %v3301_v63 = vpop.f32.mrb[12].mxu0  ;;  %v2757_v1 = vpop.f32.mrb[13].mxu1 }
 0x2c9   : > { %v4521_v0 = vadd.f32 %v3301_v63, %v2755_v61  ;;  %v3303_v3 = vpop.f32.mrb[13].mxu0  ;;  %v2759_v5 = vpop.f32.mrb[14].mxu1 }
 0x2ca   : > { %v4522_v4 = vadd.f32 %v3303_v3, %v2757_v1  ;;  %v3305_v7 = vpop.f32.mrb[14].mxu0  ;;  %v2761_v10 = vpop.f32.mrb[15].mxu1 }
 0x2cb   : > { %v3522_v8 = vadd.f32 %v4521_v0, %v414_v62  ;;  %v4523_v9 = vadd.f32 %v3305_v7, %v2759_v5  ;;  %v3307_v12 = vpop.f32.mrb[15].mxu0  ;;  %v427_v62 = vld [vmem:[#allocation2 + $0xc8] sm:$0xff]  ;;  %v429_v7 = vld [vmem:[#allocation2 + $0xd8] sm:$0xff] }
 0x2cc   : > { %v3523_v13 = vadd.f32 %v4522_v4, %v415_v2  ;;  %v4524_v14 = vadd.f32 %v3307_v12, %v2761_v10  ;;  %v428_v2 = vld [vmem:[#allocation2 + $0xd0] sm:$0xff] }
 0x2cd   : > { %3618 = vst [vmem:[#allocation2 + $0x60] sm:$0xff] %v3522_v8  ;;  %v3524_v15 = vadd.f32 %v4523_v9, %v416_v6 }
 0x2ce   : > { %3619 = vst [vmem:[#allocation2 + $0x68] sm:$0xff] %v3523_v13  ;;  %v3525_v16 = vadd.f32 %v4524_v14, %v417_v11  ;;  %v430_v14 = vld [vmem:[#allocation2 + $0xe0] sm:$0xff] }
 0x2cf   : > { %3620 = vst [vmem:[#allocation2 + $0x70] sm:$0xff] %v3524_v15  ;;  %v2765_v17 = vpop.f32.mrb[16].mxu1 }
 0x2d0   : > { %3621 = vst [vmem:[#allocation2 + $0x78] sm:$0xff] %v3525_v16  ;;  %v3311_v19 = vpop.f32.mrb[16].mxu0  ;;  %v2767_v21 = vpop.f32.mrb[17].mxu1 }
 0x2d1   : > { %v4525_v20 = vadd.f32 %v3311_v19, %v2765_v17  ;;  %v3313_v23 = vpop.f32.mrb[17].mxu0  ;;  %v2769_v25 = vpop.f32.mrb[18].mxu1 }
 0x2d2   : > { %v4526_v24 = vadd.f32 %v3313_v23, %v2767_v21  ;;  %v3315_v27 = vpop.f32.mrb[18].mxu0  ;;  %v2771_v30 = vpop.f32.mrb[19].mxu1 }
 0x2d3   : > { %v3526_v28 = vadd.f32 %v4525_v20, %v418_v18  ;;  %v4527_v29 = vadd.f32 %v3315_v27, %v2769_v25  ;;  %v3317_v32 = vpop.f32.mrb[19].mxu0  ;;  %v431_v18 = vld [vmem:[#allocation2 + $0xe8] sm:$0xff]  ;;  %v433_v27 = vld [vmem:[#allocation2 + $0xf8] sm:$0xff] }
 0x2d4   : > { %v3527_v33 = vadd.f32 %v4526_v24, %v419_v22  ;;  %v4528_v34 = vadd.f32 %v3317_v32, %v2771_v30  ;;  %v432_v22 = vld [vmem:[#allocation2 + $0xf0] sm:$0xff] }
 0x2d5   : > { %3622 = vst [vmem:[#allocation2 + $0x80] sm:$0xff] %v3526_v28  ;;  %v3528_v35 = vadd.f32 %v4527_v29, %v420_v26 }
 0x2d6   : > { %3623 = vst [vmem:[#allocation2 + $0x88] sm:$0xff] %v3527_v33  ;;  %v3529_v36 = vadd.f32 %v4528_v34, %v421_v31  ;;  %v434_v34 = vld [vmem:[#allocation2 + $0x100] sm:$0xff] }
 0x2d7   : > { %3624 = vst [vmem:[#allocation2 + $0x90] sm:$0xff] %v3528_v35  ;;  %v2775_v37 = vpop.f32.mrb[20].mxu1 }
 0x2d8   : > { %3625 = vst [vmem:[#allocation2 + $0x98] sm:$0xff] %v3529_v36  ;;  %v3321_v39 = vpop.f32.mrb[20].mxu0  ;;  %v2777_v41 = vpop.f32.mrb[21].mxu1 }
 0x2d9   : > { %v4529_v40 = vadd.f32 %v3321_v39, %v2775_v37  ;;  %v3323_v43 = vpop.f32.mrb[21].mxu0  ;;  %v2779_v45 = vpop.f32.mrb[22].mxu1 }
 0x2da   : > { %v4530_v44 = vadd.f32 %v3323_v43, %v2777_v41  ;;  %v3325_v47 = vpop.f32.mrb[22].mxu0  ;;  %v2781_v50 = vpop.f32.mrb[23].mxu1 }
 0x2db   : > { %v3530_v48 = vadd.f32 %v4529_v40, %v422_v38  ;;  %v4531_v49 = vadd.f32 %v3325_v47, %v2779_v45  ;;  %v3327_v52 = vpop.f32.mrb[23].mxu0  ;;  %v435_v38 = vld [vmem:[#allocation2 + $0x108] sm:$0xff]  ;;  %v437_v47 = vld [vmem:[#allocation2 + $0x118] sm:$0xff] }
 0x2dc   : > { %v3531_v53 = vadd.f32 %v4530_v44, %v423_v42  ;;  %v4532_v54 = vadd.f32 %v3327_v52, %v2781_v50  ;;  %v436_v42 = vld [vmem:[#allocation2 + $0x110] sm:$0xff] }
 0x2dd   : > { %3626 = vst [vmem:[#allocation2 + $0xa0] sm:$0xff] %v3530_v48  ;;  %v3532_v55 = vadd.f32 %v4531_v49, %v424_v46 }
 0x2de   : > { %3627 = vst [vmem:[#allocation2 + $0xa8] sm:$0xff] %v3531_v53  ;;  %v3533_v56 = vadd.f32 %v4532_v54, %v425_v51  ;;  %v438_v54 = vld [vmem:[#allocation2 + $0x120] sm:$0xff] }
 0x2df   : > { %3628 = vst [vmem:[#allocation2 + $0xb0] sm:$0xff] %v3532_v55  ;;  %v2785_v57 = vpop.f32.mrb[24].mxu1 }
 0x2e0   : > { %3629 = vst [vmem:[#allocation2 + $0xb8] sm:$0xff] %v3533_v56  ;;  %v3331_v59 = vpop.f32.mrb[24].mxu0  ;;  %v2787_v61 = vpop.f32.mrb[25].mxu1 }
 0x2e1   : > { %v4533_v60 = vadd.f32 %v3331_v59, %v2785_v57  ;;  %v3333_v63 = vpop.f32.mrb[25].mxu0  ;;  %v2789_v1 = vpop.f32.mrb[26].mxu1 }
 0x2e2   : > { %v4534_v0 = vadd.f32 %v3333_v63, %v2787_v61  ;;  %v3335_v3 = vpop.f32.mrb[26].mxu0  ;;  %v2791_v6 = vpop.f32.mrb[27].mxu1 }
 0x2e3   : > { %v3534_v4 = vadd.f32 %v4533_v60, %v426_v58  ;;  %v4535_v5 = vadd.f32 %v3335_v3, %v2789_v1  ;;  %v3337_v8 = vpop.f32.mrb[27].mxu0  ;;  %v439_v58 = vld [vmem:[#allocation2 + $0x128] sm:$0xff]  ;;  %v441_v3 = vld [vmem:[#allocation2 + $0x138] sm:$0xff] }
 0x2e4   : > { %v3535_v9 = vadd.f32 %v4534_v0, %v427_v62  ;;  %v4536_v10 = vadd.f32 %v3337_v8, %v2791_v6  ;;  %v440_v62 = vld [vmem:[#allocation2 + $0x130] sm:$0xff] }
 0x2e5   : > { %3630 = vst [vmem:[#allocation2 + $0xc0] sm:$0xff] %v3534_v4  ;;  %v3536_v11 = vadd.f32 %v4535_v5, %v428_v2 }
 0x2e6   : > { %3631 = vst [vmem:[#allocation2 + $0xc8] sm:$0xff] %v3535_v9  ;;  %v3537_v12 = vadd.f32 %v4536_v10, %v429_v7  ;;  %v442_v10 = vld [vmem:[#allocation2 + $0x140] sm:$0xff] }
 0x2e7   : > { %3632 = vst [vmem:[#allocation2 + $0xd0] sm:$0xff] %v3536_v11  ;;  %v2795_v13 = vpop.f32.mrb[28].mxu1 }
 0x2e8   : > { %3633 = vst [vmem:[#allocation2 + $0xd8] sm:$0xff] %v3537_v12  ;;  %v3341_v15 = vpop.f32.mrb[28].mxu0  ;;  %v2797_v17 = vpop.f32.mrb[29].mxu1 }
 0x2e9   : > { %v4537_v16 = vadd.f32 %v3341_v15, %v2795_v13  ;;  %v3343_v19 = vpop.f32.mrb[29].mxu0  ;;  %v2799_v21 = vpop.f32.mrb[30].mxu1 }
 0x2ea   : > { %v4538_v20 = vadd.f32 %v3343_v19, %v2797_v17  ;;  %v3345_v23 = vpop.f32.mrb[30].mxu0  ;;  %v2801_v26 = vpop.f32.mrb[31].mxu1 }
 0x2eb   : > { %v3538_v24 = vadd.f32 %v4537_v16, %v430_v14  ;;  %v4539_v25 = vadd.f32 %v3345_v23, %v2799_v21  ;;  %v3347_v28 = vpop.f32.mrb[31].mxu0  ;;  %v443_v14 = vld [vmem:[#allocation2 + $0x148] sm:$0xff]  ;;  %v445_v23 = vld [vmem:[#allocation2 + $0x158] sm:$0xff] }
 0x2ec   : > { %v3539_v29 = vadd.f32 %v4538_v20, %v431_v18  ;;  %v4540_v30 = vadd.f32 %v3347_v28, %v2801_v26  ;;  %v444_v18 = vld [vmem:[#allocation2 + $0x150] sm:$0xff] }
 0x2ed   : > { %3634 = vst [vmem:[#allocation2 + $0xe0] sm:$0xff] %v3538_v24  ;;  %v3540_v31 = vadd.f32 %v4539_v25, %v432_v22 }
 0x2ee   : > { %3635 = vst [vmem:[#allocation2 + $0xe8] sm:$0xff] %v3539_v29  ;;  %v3541_v32 = vadd.f32 %v4540_v30, %v433_v27  ;;  %v446_v30 = vld [vmem:[#allocation2 + $0x160] sm:$0xff] }
 0x2ef   : > { %3636 = vst [vmem:[#allocation2 + $0xf0] sm:$0xff] %v3540_v31  ;;  %v2805_v33 = vpop.f32.mrb[32].mxu1 }
 0x2f0   : > { %3637 = vst [vmem:[#allocation2 + $0xf8] sm:$0xff] %v3541_v32  ;;  %v3351_v35 = vpop.f32.mrb[32].mxu0  ;;  %v2807_v37 = vpop.f32.mrb[33].mxu1 }
 0x2f1   : > { %v4541_v36 = vadd.f32 %v3351_v35, %v2805_v33  ;;  %v3353_v39 = vpop.f32.mrb[33].mxu0  ;;  %v2809_v41 = vpop.f32.mrb[34].mxu1 }
 0x2f2   : > { %v4542_v40 = vadd.f32 %v3353_v39, %v2807_v37  ;;  %v3355_v43 = vpop.f32.mrb[34].mxu0  ;;  %v2811_v46 = vpop.f32.mrb[35].mxu1 }
 0x2f3   : > { %v3542_v44 = vadd.f32 %v4541_v36, %v434_v34  ;;  %v4543_v45 = vadd.f32 %v3355_v43, %v2809_v41  ;;  %v3357_v48 = vpop.f32.mrb[35].mxu0  ;;  %v447_v34 = vld [vmem:[#allocation2 + $0x168] sm:$0xff]  ;;  %v449_v43 = vld [vmem:[#allocation2 + $0x178] sm:$0xff] }
 0x2f4   : > { %v3543_v49 = vadd.f32 %v4542_v40, %v435_v38  ;;  %v4544_v50 = vadd.f32 %v3357_v48, %v2811_v46  ;;  %v448_v38 = vld [vmem:[#allocation2 + $0x170] sm:$0xff] }
 0x2f5   : > { %3638 = vst [vmem:[#allocation2 + $0x100] sm:$0xff] %v3542_v44  ;;  %v3544_v51 = vadd.f32 %v4543_v45, %v436_v42 }
 0x2f6   : > { %3639 = vst [vmem:[#allocation2 + $0x108] sm:$0xff] %v3543_v49  ;;  %v3545_v52 = vadd.f32 %v4544_v50, %v437_v47  ;;  %v450_v50 = vld [vmem:[#allocation2 + $0x180] sm:$0xff] }
 0x2f7   : > { %3640 = vst [vmem:[#allocation2 + $0x110] sm:$0xff] %v3544_v51  ;;  %v2815_v53 = vpop.f32.mrb[36].mxu1 }
 0x2f8   : > { %3641 = vst [vmem:[#allocation2 + $0x118] sm:$0xff] %v3545_v52  ;;  %v3361_v55 = vpop.f32.mrb[36].mxu0  ;;  %v2817_v57 = vpop.f32.mrb[37].mxu1 }
 0x2f9   : > { %v4545_v56 = vadd.f32 %v3361_v55, %v2815_v53  ;;  %v3363_v59 = vpop.f32.mrb[37].mxu0  ;;  %v2819_v61 = vpop.f32.mrb[38].mxu1 }
 0x2fa   : > { %v4546_v60 = vadd.f32 %v3363_v59, %v2817_v57  ;;  %v3365_v63 = vpop.f32.mrb[38].mxu0  ;;  %v2821_v2 = vpop.f32.mrb[39].mxu1 }
 0x2fb   : > { %v3546_v0 = vadd.f32 %v4545_v56, %v438_v54  ;;  %v4547_v1 = vadd.f32 %v3365_v63, %v2819_v61  ;;  %v3367_v4 = vpop.f32.mrb[39].mxu0  ;;  %v451_v54 = vld [vmem:[#allocation2 + $0x188] sm:$0xff]  ;;  %v453_v63 = vld [vmem:[#allocation2 + $0x198] sm:$0xff] }
 0x2fc   : > { %v3547_v5 = vadd.f32 %v4546_v60, %v439_v58  ;;  %v4548_v6 = vadd.f32 %v3367_v4, %v2821_v2  ;;  %v452_v58 = vld [vmem:[#allocation2 + $0x190] sm:$0xff] }
 0x2fd   : > { %3642 = vst [vmem:[#allocation2 + $0x120] sm:$0xff] %v3546_v0  ;;  %v3548_v7 = vadd.f32 %v4547_v1, %v440_v62 }
 0x2fe   : > { %3643 = vst [vmem:[#allocation2 + $0x128] sm:$0xff] %v3547_v5  ;;  %v3549_v8 = vadd.f32 %v4548_v6, %v441_v3  ;;  %v454_v6 = vld [vmem:[#allocation2 + $0x1a0] sm:$0xff] }
 0x2ff   : > { %3644 = vst [vmem:[#allocation2 + $0x130] sm:$0xff] %v3548_v7  ;;  %v2825_v9 = vpop.f32.mrb[40].mxu1 }
 0x300   : > { %3645 = vst [vmem:[#allocation2 + $0x138] sm:$0xff] %v3549_v8  ;;  %v3371_v11 = vpop.f32.mrb[40].mxu0  ;;  %v2827_v13 = vpop.f32.mrb[41].mxu1 }
 0x301   : > { %v4549_v12 = vadd.f32 %v3371_v11, %v2825_v9  ;;  %v3373_v15 = vpop.f32.mrb[41].mxu0  ;;  %v2829_v17 = vpop.f32.mrb[42].mxu1 }
 0x302   : > { %v4550_v16 = vadd.f32 %v3373_v15, %v2827_v13  ;;  %v3375_v19 = vpop.f32.mrb[42].mxu0  ;;  %v2831_v22 = vpop.f32.mrb[43].mxu1 }
 0x303   : > { %v3550_v20 = vadd.f32 %v4549_v12, %v442_v10  ;;  %v4551_v21 = vadd.f32 %v3375_v19, %v2829_v17  ;;  %v3377_v24 = vpop.f32.mrb[43].mxu0  ;;  %v455_v10 = vld [vmem:[#allocation2 + $0x1a8] sm:$0xff]  ;;  %v457_v19 = vld [vmem:[#allocation2 + $0x1b8] sm:$0xff] }
 0x304   : > { %v3551_v25 = vadd.f32 %v4550_v16, %v443_v14  ;;  %v4552_v26 = vadd.f32 %v3377_v24, %v2831_v22  ;;  %v456_v14 = vld [vmem:[#allocation2 + $0x1b0] sm:$0xff] }
 0x305   : > { %3646 = vst [vmem:[#allocation2 + $0x140] sm:$0xff] %v3550_v20  ;;  %v3552_v27 = vadd.f32 %v4551_v21, %v444_v18 }
 0x306   : > { %3647 = vst [vmem:[#allocation2 + $0x148] sm:$0xff] %v3551_v25  ;;  %v3553_v28 = vadd.f32 %v4552_v26, %v445_v23  ;;  %v458_v26 = vld [vmem:[#allocation2 + $0x1c0] sm:$0xff] }
 0x307   : > { %3648 = vst [vmem:[#allocation2 + $0x150] sm:$0xff] %v3552_v27  ;;  %v2835_v29 = vpop.f32.mrb[44].mxu1 }
 0x308   : > { %3649 = vst [vmem:[#allocation2 + $0x158] sm:$0xff] %v3553_v28  ;;  %v3381_v31 = vpop.f32.mrb[44].mxu0  ;;  %v2837_v33 = vpop.f32.mrb[45].mxu1 }
 0x309   : > { %v4553_v32 = vadd.f32 %v3381_v31, %v2835_v29  ;;  %v3383_v35 = vpop.f32.mrb[45].mxu0  ;;  %v2839_v37 = vpop.f32.mrb[46].mxu1 }
 0x30a   : > { %v4554_v36 = vadd.f32 %v3383_v35, %v2837_v33  ;;  %v3385_v39 = vpop.f32.mrb[46].mxu0  ;;  %v2841_v42 = vpop.f32.mrb[47].mxu1 }
 0x30b   : > { %v3554_v40 = vadd.f32 %v4553_v32, %v446_v30  ;;  %v4555_v41 = vadd.f32 %v3385_v39, %v2839_v37  ;;  %v3387_v44 = vpop.f32.mrb[47].mxu0  ;;  %v459_v30 = vld [vmem:[#allocation2 + $0x1c8] sm:$0xff]  ;;  %v461_v39 = vld [vmem:[#allocation2 + $0x1d8] sm:$0xff] }
 0x30c   : > { %v3555_v45 = vadd.f32 %v4554_v36, %v447_v34  ;;  %v4556_v46 = vadd.f32 %v3387_v44, %v2841_v42  ;;  %v460_v34 = vld [vmem:[#allocation2 + $0x1d0] sm:$0xff] }
 0x30d   : > { %3650 = vst [vmem:[#allocation2 + $0x160] sm:$0xff] %v3554_v40  ;;  %v3556_v47 = vadd.f32 %v4555_v41, %v448_v38 }
 0x30e   : > { %3651 = vst [vmem:[#allocation2 + $0x168] sm:$0xff] %v3555_v45  ;;  %v3557_v48 = vadd.f32 %v4556_v46, %v449_v43  ;;  %v462_v46 = vld [vmem:[#allocation2 + $0x1e0] sm:$0xff] }
 0x30f   : > { %3652 = vst [vmem:[#allocation2 + $0x170] sm:$0xff] %v3556_v47  ;;  %v2845_v49 = vpop.f32.mrb[48].mxu1 }
 0x310   : > { %3653 = vst [vmem:[#allocation2 + $0x178] sm:$0xff] %v3557_v48  ;;  %v3391_v51 = vpop.f32.mrb[48].mxu0  ;;  %v2847_v53 = vpop.f32.mrb[49].mxu1 }
 0x311   : > { %v4557_v52 = vadd.f32 %v3391_v51, %v2845_v49  ;;  %v3393_v55 = vpop.f32.mrb[49].mxu0  ;;  %v2849_v57 = vpop.f32.mrb[50].mxu1 }
 0x312   : > { %v4558_v56 = vadd.f32 %v3393_v55, %v2847_v53  ;;  %v3395_v59 = vpop.f32.mrb[50].mxu0  ;;  %v2851_v62 = vpop.f32.mrb[51].mxu1 }
 0x313   : > { %v3558_v60 = vadd.f32 %v4557_v52, %v450_v50  ;;  %v4559_v61 = vadd.f32 %v3395_v59, %v2849_v57  ;;  %v3397_v0 = vpop.f32.mrb[51].mxu0  ;;  %v463_v50 = vld [vmem:[#allocation2 + $0x1e8] sm:$0xff]  ;;  %v465_v59 = vld [vmem:[#allocation2 + $0x1f8] sm:$0xff] }
 0x314   : > { %v3559_v1 = vadd.f32 %v4558_v56, %v451_v54  ;;  %v4560_v2 = vadd.f32 %v3397_v0, %v2851_v62  ;;  %v464_v54 = vld [vmem:[#allocation2 + $0x1f0] sm:$0xff] }
 0x315   : > { %3654 = vst [vmem:[#allocation2 + $0x180] sm:$0xff] %v3558_v60  ;;  %v3560_v3 = vadd.f32 %v4559_v61, %v452_v58 }
 0x316   : > { %3655 = vst [vmem:[#allocation2 + $0x188] sm:$0xff] %v3559_v1  ;;  %v3561_v4 = vadd.f32 %v4560_v2, %v453_v63  ;;  %v466_v2 = vld [vmem:[#allocation2 + $0x200] sm:$0xff] }
 0x317   : > { %3656 = vst [vmem:[#allocation2 + $0x190] sm:$0xff] %v3560_v3  ;;  %v2855_v5 = vpop.f32.mrb[52].mxu1 }
 0x318   : > { %3657 = vst [vmem:[#allocation2 + $0x198] sm:$0xff] %v3561_v4  ;;  %v3401_v7 = vpop.f32.mrb[52].mxu0  ;;  %v2857_v9 = vpop.f32.mrb[53].mxu1 }
 0x319   : > { %v4561_v8 = vadd.f32 %v3401_v7, %v2855_v5  ;;  %v3403_v11 = vpop.f32.mrb[53].mxu0  ;;  %v2859_v13 = vpop.f32.mrb[54].mxu1 }
 0x31a   : > { %v4562_v12 = vadd.f32 %v3403_v11, %v2857_v9  ;;  %v3405_v15 = vpop.f32.mrb[54].mxu0  ;;  %v2861_v18 = vpop.f32.mrb[55].mxu1 }
 0x31b   : > { %v3562_v16 = vadd.f32 %v4561_v8, %v454_v6  ;;  %v4563_v17 = vadd.f32 %v3405_v15, %v2859_v13  ;;  %v3407_v20 = vpop.f32.mrb[55].mxu0  ;;  %v467_v6 = vld [vmem:[#allocation2 + $0x208] sm:$0xff]  ;;  %v469_v15 = vld [vmem:[#allocation2 + $0x218] sm:$0xff] }
 0x31c   : > { %v3563_v21 = vadd.f32 %v4562_v12, %v455_v10  ;;  %v4564_v22 = vadd.f32 %v3407_v20, %v2861_v18  ;;  %v468_v10 = vld [vmem:[#allocation2 + $0x210] sm:$0xff] }
 0x31d   : > { %3658 = vst [vmem:[#allocation2 + $0x1a0] sm:$0xff] %v3562_v16  ;;  %v3564_v23 = vadd.f32 %v4563_v17, %v456_v14 }
 0x31e   : > { %3659 = vst [vmem:[#allocation2 + $0x1a8] sm:$0xff] %v3563_v21  ;;  %v3565_v24 = vadd.f32 %v4564_v22, %v457_v19  ;;  %v470_v22 = vld [vmem:[#allocation2 + $0x220] sm:$0xff] }
 0x31f   : > { %3660 = vst [vmem:[#allocation2 + $0x1b0] sm:$0xff] %v3564_v23  ;;  %v2865_v25 = vpop.f32.mrb[56].mxu1 }
 0x320   : > { %3661 = vst [vmem:[#allocation2 + $0x1b8] sm:$0xff] %v3565_v24  ;;  %v3411_v27 = vpop.f32.mrb[56].mxu0  ;;  %v2867_v29 = vpop.f32.mrb[57].mxu1 }
 0x321   : > { %v4565_v28 = vadd.f32 %v3411_v27, %v2865_v25  ;;  %v3413_v31 = vpop.f32.mrb[57].mxu0  ;;  %v2869_v33 = vpop.f32.mrb[58].mxu1 }
 0x322   : > { %v4566_v32 = vadd.f32 %v3413_v31, %v2867_v29  ;;  %v3415_v35 = vpop.f32.mrb[58].mxu0  ;;  %v2871_v38 = vpop.f32.mrb[59].mxu1 }
 0x323   : > { %v3566_v36 = vadd.f32 %v4565_v28, %v458_v26  ;;  %v4567_v37 = vadd.f32 %v3415_v35, %v2869_v33  ;;  %v3417_v40 = vpop.f32.mrb[59].mxu0  ;;  %v471_v26 = vld [vmem:[#allocation2 + $0x228] sm:$0xff]  ;;  %v473_v35 = vld [vmem:[#allocation2 + $0x238] sm:$0xff] }
 0x324   : > { %v3567_v41 = vadd.f32 %v4566_v32, %v459_v30  ;;  %v4568_v42 = vadd.f32 %v3417_v40, %v2871_v38  ;;  %v472_v30 = vld [vmem:[#allocation2 + $0x230] sm:$0xff] }
 0x325   : > { %3662 = vst [vmem:[#allocation2 + $0x1c0] sm:$0xff] %v3566_v36  ;;  %v3568_v43 = vadd.f32 %v4567_v37, %v460_v34 }
 0x326   : > { %3663 = vst [vmem:[#allocation2 + $0x1c8] sm:$0xff] %v3567_v41  ;;  %v3569_v44 = vadd.f32 %v4568_v42, %v461_v39  ;;  %v474_v42 = vld [vmem:[#allocation2 + $0x240] sm:$0xff] }
 0x327   : > { %3664 = vst [vmem:[#allocation2 + $0x1d0] sm:$0xff] %v3568_v43  ;;  %v2875_v45 = vpop.f32.mrb[60].mxu1 }
 0x328   : > { %3665 = vst [vmem:[#allocation2 + $0x1d8] sm:$0xff] %v3569_v44  ;;  %v3421_v47 = vpop.f32.mrb[60].mxu0  ;;  %v2877_v49 = vpop.f32.mrb[61].mxu1 }
 0x329   : > { %v4569_v48 = vadd.f32 %v3421_v47, %v2875_v45  ;;  %v3423_v51 = vpop.f32.mrb[61].mxu0  ;;  %v2879_v53 = vpop.f32.mrb[62].mxu1 }
 0x32a   : > { %v4570_v52 = vadd.f32 %v3423_v51, %v2877_v49  ;;  %v3425_v55 = vpop.f32.mrb[62].mxu0  ;;  %v2881_v58 = vpop.f32.mrb[63].mxu1 }
 0x32b   : > { %v3570_v56 = vadd.f32 %v4569_v48, %v462_v46  ;;  %v4571_v57 = vadd.f32 %v3425_v55, %v2879_v53  ;;  %v3427_v60 = vpop.f32.mrb[63].mxu0  ;;  %v475_v46 = vld [vmem:[#allocation2 + $0x248] sm:$0xff]  ;;  %v477_v55 = vld [vmem:[#allocation2 + $0x258] sm:$0xff] }
 0x32c   : > { %v3571_v61 = vadd.f32 %v4570_v52, %v463_v50  ;;  %v4572_v62 = vadd.f32 %v3427_v60, %v2881_v58  ;;  %v476_v50 = vld [vmem:[#allocation2 + $0x250] sm:$0xff] }
 0x32d   : > { %3666 = vst [vmem:[#allocation2 + $0x1e0] sm:$0xff] %v3570_v56  ;;  %v3572_v63 = vadd.f32 %v4571_v57, %v464_v54 }
 0x32e   : > { %3667 = vst [vmem:[#allocation2 + $0x1e8] sm:$0xff] %v3571_v61  ;;  %v3573_v0 = vadd.f32 %v4572_v62, %v465_v59  ;;  %v478_v62 = vld [vmem:[#allocation2 + $0x260] sm:$0xff] }
 0x32f   : > { %3668 = vst [vmem:[#allocation2 + $0x1f0] sm:$0xff] %v3572_v63  ;;  %v2885_v1 = vpop.f32.mrb[64].mxu1 }
 0x330   : > { %3669 = vst [vmem:[#allocation2 + $0x1f8] sm:$0xff] %v3573_v0  ;;  %v3431_v3 = vpop.f32.mrb[64].mxu0  ;;  %v2887_v5 = vpop.f32.mrb[65].mxu1 }
 0x331   : > { %v4573_v4 = vadd.f32 %v3431_v3, %v2885_v1  ;;  %v3433_v7 = vpop.f32.mrb[65].mxu0  ;;  %v2889_v9 = vpop.f32.mrb[66].mxu1 }
 0x332   : > { %v4574_v8 = vadd.f32 %v3433_v7, %v2887_v5  ;;  %v3435_v11 = vpop.f32.mrb[66].mxu0  ;;  %v2891_v14 = vpop.f32.mrb[67].mxu1 }
 0x333   : > { %v3574_v12 = vadd.f32 %v4573_v4, %v466_v2  ;;  %v4575_v13 = vadd.f32 %v3435_v11, %v2889_v9  ;;  %v3437_v16 = vpop.f32.mrb[67].mxu0  ;;  %v479_v2 = vld [vmem:[#allocation2 + $0x268] sm:$0xff]  ;;  %v481_v11 = vld [vmem:[#allocation2 + $0x278] sm:$0xff] }
 0x334   : > { %v3575_v17 = vadd.f32 %v4574_v8, %v467_v6  ;;  %v4576_v18 = vadd.f32 %v3437_v16, %v2891_v14  ;;  %v480_v6 = vld [vmem:[#allocation2 + $0x270] sm:$0xff] }
 0x335   : > { %3670 = vst [vmem:[#allocation2 + $0x200] sm:$0xff] %v3574_v12  ;;  %v3576_v19 = vadd.f32 %v4575_v13, %v468_v10 }
 0x336   : > { %3671 = vst [vmem:[#allocation2 + $0x208] sm:$0xff] %v3575_v17  ;;  %v3577_v20 = vadd.f32 %v4576_v18, %v469_v15  ;;  %v482_v18 = vld [vmem:[#allocation2 + $0x280] sm:$0xff] }
 0x337   : > { %3672 = vst [vmem:[#allocation2 + $0x210] sm:$0xff] %v3576_v19  ;;  %v2895_v21 = vpop.f32.mrb[68].mxu1 }
 0x338   : > { %3673 = vst [vmem:[#allocation2 + $0x218] sm:$0xff] %v3577_v20  ;;  %v3441_v23 = vpop.f32.mrb[68].mxu0  ;;  %v2897_v25 = vpop.f32.mrb[69].mxu1 }
 0x339   : > { %v4577_v24 = vadd.f32 %v3441_v23, %v2895_v21  ;;  %v3443_v27 = vpop.f32.mrb[69].mxu0  ;;  %v2899_v29 = vpop.f32.mrb[70].mxu1 }
 0x33a   : > { %v4578_v28 = vadd.f32 %v3443_v27, %v2897_v25  ;;  %v3445_v31 = vpop.f32.mrb[70].mxu0  ;;  %v2901_v34 = vpop.f32.mrb[71].mxu1 }
 0x33b   : > { %v3578_v32 = vadd.f32 %v4577_v24, %v470_v22  ;;  %v4579_v33 = vadd.f32 %v3445_v31, %v2899_v29  ;;  %v3447_v36 = vpop.f32.mrb[71].mxu0  ;;  %v483_v22 = vld [vmem:[#allocation2 + $0x288] sm:$0xff]  ;;  %v485_v31 = vld [vmem:[#allocation2 + $0x298] sm:$0xff] }
 0x33c   : > { %v3579_v37 = vadd.f32 %v4578_v28, %v471_v26  ;;  %v4580_v38 = vadd.f32 %v3447_v36, %v2901_v34  ;;  %v484_v26 = vld [vmem:[#allocation2 + $0x290] sm:$0xff] }
 0x33d   : > { %3674 = vst [vmem:[#allocation2 + $0x220] sm:$0xff] %v3578_v32  ;;  %v3580_v39 = vadd.f32 %v4579_v33, %v472_v30 }
 0x33e   : > { %3675 = vst [vmem:[#allocation2 + $0x228] sm:$0xff] %v3579_v37  ;;  %v3581_v40 = vadd.f32 %v4580_v38, %v473_v35  ;;  %v486_v38 = vld [vmem:[#allocation2 + $0x2a0] sm:$0xff] }
 0x33f   : > { %3676 = vst [vmem:[#allocation2 + $0x230] sm:$0xff] %v3580_v39  ;;  %v2905_v41 = vpop.f32.mrb[72].mxu1 }
 0x340   : > { %3677 = vst [vmem:[#allocation2 + $0x238] sm:$0xff] %v3581_v40  ;;  %v3451_v43 = vpop.f32.mrb[72].mxu0  ;;  %v2907_v45 = vpop.f32.mrb[73].mxu1 }
 0x341   : > { %v4581_v44 = vadd.f32 %v3451_v43, %v2905_v41  ;;  %v3453_v47 = vpop.f32.mrb[73].mxu0  ;;  %v2909_v49 = vpop.f32.mrb[74].mxu1 }
 0x342   : > { %v4582_v48 = vadd.f32 %v3453_v47, %v2907_v45  ;;  %v3455_v51 = vpop.f32.mrb[74].mxu0  ;;  %v2911_v54 = vpop.f32.mrb[75].mxu1 }
 0x343   : > { %v3582_v52 = vadd.f32 %v4581_v44, %v474_v42  ;;  %v4583_v53 = vadd.f32 %v3455_v51, %v2909_v49  ;;  %v3457_v56 = vpop.f32.mrb[75].mxu0  ;;  %v487_v42 = vld [vmem:[#allocation2 + $0x2a8] sm:$0xff]  ;;  %v489_v51 = vld [vmem:[#allocation2 + $0x2b8] sm:$0xff] }
 0x344   : > { %v3583_v57 = vadd.f32 %v4582_v48, %v475_v46  ;;  %v4584_v58 = vadd.f32 %v3457_v56, %v2911_v54  ;;  %v488_v46 = vld [vmem:[#allocation2 + $0x2b0] sm:$0xff] }
 0x345   : > { %3678 = vst [vmem:[#allocation2 + $0x240] sm:$0xff] %v3582_v52  ;;  %v3584_v59 = vadd.f32 %v4583_v53, %v476_v50 }
 0x346   : > { %3679 = vst [vmem:[#allocation2 + $0x248] sm:$0xff] %v3583_v57  ;;  %v3585_v60 = vadd.f32 %v4584_v58, %v477_v55  ;;  %v490_v58 = vld [vmem:[#allocation2 + $0x2c0] sm:$0xff] }
 0x347   : > { %3680 = vst [vmem:[#allocation2 + $0x250] sm:$0xff] %v3584_v59  ;;  %v2915_v61 = vpop.f32.mrb[76].mxu1 }
 0x348   : > { %3681 = vst [vmem:[#allocation2 + $0x258] sm:$0xff] %v3585_v60  ;;  %v3461_v63 = vpop.f32.mrb[76].mxu0  ;;  %v2917_v1 = vpop.f32.mrb[77].mxu1 }
 0x349   : > { %v4585_v0 = vadd.f32 %v3461_v63, %v2915_v61  ;;  %v3463_v3 = vpop.f32.mrb[77].mxu0  ;;  %v2919_v5 = vpop.f32.mrb[78].mxu1 }
 0x34a   : > { %v4586_v4 = vadd.f32 %v3463_v3, %v2917_v1  ;;  %v3465_v7 = vpop.f32.mrb[78].mxu0  ;;  %v2921_v10 = vpop.f32.mrb[79].mxu1 }
 0x34b   : > { %v3586_v8 = vadd.f32 %v4585_v0, %v478_v62  ;;  %v4587_v9 = vadd.f32 %v3465_v7, %v2919_v5  ;;  %v3467_v12 = vpop.f32.mrb[79].mxu0  ;;  %v491_v62 = vld [vmem:[#allocation2 + $0x2c8] sm:$0xff]  ;;  %v493_v7 = vld [vmem:[#allocation2 + $0x2d8] sm:$0xff] }
 0x34c   : > { %v3587_v13 = vadd.f32 %v4586_v4, %v479_v2  ;;  %v4588_v14 = vadd.f32 %v3467_v12, %v2921_v10  ;;  %v492_v2 = vld [vmem:[#allocation2 + $0x2d0] sm:$0xff] }
 0x34d   : > { %3682 = vst [vmem:[#allocation2 + $0x260] sm:$0xff] %v3586_v8  ;;  %v3588_v15 = vadd.f32 %v4587_v9, %v480_v6 }
 0x34e   : > { %3683 = vst [vmem:[#allocation2 + $0x268] sm:$0xff] %v3587_v13  ;;  %v3589_v16 = vadd.f32 %v4588_v14, %v481_v11  ;;  %v494_v14 = vld [vmem:[#allocation2 + $0x2e0] sm:$0xff] }
 0x34f   : > { %3684 = vst [vmem:[#allocation2 + $0x270] sm:$0xff] %v3588_v15  ;;  %v2925_v17 = vpop.f32.mrb[80].mxu1 }
 0x350   : > { %3685 = vst [vmem:[#allocation2 + $0x278] sm:$0xff] %v3589_v16  ;;  %v3471_v19 = vpop.f32.mrb[80].mxu0  ;;  %v2927_v21 = vpop.f32.mrb[81].mxu1 }
 0x351   : > { %v4589_v20 = vadd.f32 %v3471_v19, %v2925_v17  ;;  %v3473_v23 = vpop.f32.mrb[81].mxu0  ;;  %v2929_v25 = vpop.f32.mrb[82].mxu1 }
 0x352   : > { %v4590_v24 = vadd.f32 %v3473_v23, %v2927_v21  ;;  %v3475_v27 = vpop.f32.mrb[82].mxu0  ;;  %v2931_v30 = vpop.f32.mrb[83].mxu1 }
 0x353   : > { %v3590_v28 = vadd.f32 %v4589_v20, %v482_v18  ;;  %v4591_v29 = vadd.f32 %v3475_v27, %v2929_v25  ;;  %v3477_v32 = vpop.f32.mrb[83].mxu0  ;;  %v495_v18 = vld [vmem:[#allocation2 + $0x2e8] sm:$0xff]  ;;  %v497_v27 = vld [vmem:[#allocation2 + $0x2f8] sm:$0xff] }
 0x354   : > { %v3591_v33 = vadd.f32 %v4590_v24, %v483_v22  ;;  %v4592_v34 = vadd.f32 %v3477_v32, %v2931_v30  ;;  %v496_v22 = vld [vmem:[#allocation2 + $0x2f0] sm:$0xff] }
 0x355   : > { %3686 = vst [vmem:[#allocation2 + $0x280] sm:$0xff] %v3590_v28  ;;  %v3592_v35 = vadd.f32 %v4591_v29, %v484_v26 }
 0x356   : > { %3687 = vst [vmem:[#allocation2 + $0x288] sm:$0xff] %v3591_v33  ;;  %v3593_v36 = vadd.f32 %v4592_v34, %v485_v31  ;;  %v3804_v33 = vlaneseq (!%p4500_p13)  ;;  %v3802_v34 = vld [vmem:[%s5740_s21] sm:$0x3] (!%p4500_p13) }
 0x357   : > { %3688 = vst [vmem:[#allocation2 + $0x290] sm:$0xff] %v3592_v35  ;;  %v2935_v37 = vpop.f32.mrb[84].mxu1 }
 0x358   : > { %3689 = vst [vmem:[#allocation2 + $0x298] sm:$0xff] %v3593_v36  ;;  %v3481_v39 = vpop.f32.mrb[84].mxu0  ;;  %v2937_v41 = vpop.f32.mrb[85].mxu1  ;;  %v3805_v35 = vshrl.u32 (!%p4500_p13), %v3804_v33, 7  ;;  %v3706_v36 = vld [vmem:[#allocation2] sm:$0xff] (!%p4500_p13)  ;;  %v3743_v33 = vld [vmem:[#allocation2 + $0x128] sm:$0xff] (!%p4500_p13) }
 0x359   : > { %v4593_v40 = vadd.f32 %v3481_v39, %v2935_v37  ;;  %v3483_v43 = vpop.f32.mrb[85].mxu0  ;;  %v2939_v45 = vpop.f32.mrb[86].mxu1  ;;  %v3707_v37 = vld [vmem:[#allocation2 + $0x8] sm:$0xff] (!%p4500_p13)  ;;  %v3709_v39 = vld [vmem:[#allocation2 + $0x18] sm:$0xff] (!%p4500_p13) }
 0x35a   : > { %v4594_v44 = vadd.f32 %v3483_v43, %v2937_v41  ;;  %v3485_v47 = vpop.f32.mrb[86].mxu0  ;;  %v2941_v50 = vpop.f32.mrb[87].mxu1  ;;  %v3810_v41 = vsub.s32 (!%p4500_p13), 1, %v3805_v35  ;;  %v3711_v43 = vld [vmem:[#allocation2 + $0x28] sm:$0xff] (!%p4500_p13) }
 0x35b   : > { %v3594_v48 = vadd.f32 %v4593_v40, %v486_v38  ;;  %v4595_v49 = vadd.f32 %v3485_v47, %v2939_v45  ;;  %v3487_v52 = vpop.f32.mrb[87].mxu0  ;;  %v3708_v38 = vld [vmem:[#allocation2 + $0x10] sm:$0xff] (!%p4500_p13)  ;;  %v3806_v40 = vsub.s32 (!%p4500_p13), 0, %v3805_v35  ;;  %v3713_v45 = vld [vmem:[#allocation2 + $0x38] sm:$0xff] (!%p4500_p13)  ;;  %v3715_v47 = vld [vmem:[#allocation2 + $0x48] sm:$0xff] (!%p4500_p13) }
 0x35c   : > { %v3595_v53 = vadd.f32 %v4594_v44, %v487_v42  ;;  %v4596_v54 = vadd.f32 %v3487_v52, %v2941_v50  ;;  %v3710_v42 = vld [vmem:[#allocation2 + $0x20] sm:$0xff] (!%p4500_p13)  ;;  %v3712_v44 = vld [vmem:[#allocation2 + $0x30] sm:$0xff] (!%p4500_p13) }
 0x35d   : > { %3690 = vst [vmem:[#allocation2 + $0x2a0] sm:$0xff] %v3594_v48  ;;  %v3596_v55 = vadd.f32 %v4595_v49, %v488_v46  ;;  %v3714_v46 = vld [vmem:[#allocation2 + $0x40] sm:$0xff] (!%p4500_p13)  ;;  %v3716_v48 = vld [vmem:[#allocation2 + $0x50] sm:$0xff] (!%p4500_p13)  ;;  %v3717_v49 = vld [vmem:[#allocation2 + $0x58] sm:$0xff] (!%p4500_p13)  ;;  %v6180_v50 = vrot.slane (!%p4500_p13), %v3802_v34, %v3806_v40 }
 0x35e   : > { %3691 = vst [vmem:[#allocation2 + $0x2a8] sm:$0xff] %v3595_v53  ;;  %v3597_v56 = vadd.f32 %v4596_v54, %v489_v51  ;;  %v6182_v51 = vrot.slane (!%p4500_p13), %v3802_v34, %v3810_v41  ;;  %v3718_v52 = vld [vmem:[#allocation2 + $0x60] sm:$0xff] (!%p4500_p13)  ;;  %v3719_v53 = vld [vmem:[#allocation2 + $0x68] sm:$0xff] (!%p4500_p13)  ;;  %v3720_v54 = vld [vmem:[#allocation2 + $0x70] sm:$0xff] (!%p4500_p13) }
 0x35f   : > { %3692 = vst [vmem:[#allocation2 + $0x2b0] sm:$0xff] %v3596_v55  ;;  %v2945_v57 = vpop.f32.mrb[88].mxu1  ;;  %v3721_v55 = vld [vmem:[#allocation2 + $0x78] sm:$0xff] (!%p4500_p13)  ;;  %v3746_v40 = vld [vmem:[#allocation2 + $0x140] sm:$0xff] (!%p4500_p13) }
 0x360   : > { %3693 = vst [vmem:[#allocation2 + $0x2b8] sm:$0xff] %v3597_v56  ;;  %v3491_v59 = vpop.f32.mrb[88].mxu0  ;;  %v2947_v61 = vpop.f32.mrb[89].mxu1  ;;  %v3722_v56 = vld [vmem:[#allocation2 + $0x80] sm:$0xff] (!%p4500_p13) }
 0x361   : > { %v4597_v60 = vadd.f32 %v3491_v59, %v2945_v57  ;;  %v3493_v63 = vpop.f32.mrb[89].mxu0  ;;  %v2949_v1 = vpop.f32.mrb[90].mxu1  ;;  %v3723_v57 = vld [vmem:[#allocation2 + $0x88] sm:$0xff] (!%p4500_p13)  ;;  %v3725_v59 = vld [vmem:[#allocation2 + $0x98] sm:$0xff] (!%p4500_p13) }
 0x362   : > { %v4598_v0 = vadd.f32 %v3493_v63, %v2947_v61  ;;  %v3495_v3 = vpop.f32.mrb[90].mxu0  ;;  %v2951_v6 = vpop.f32.mrb[91].mxu1  ;;  %v3815_v61 = vadd.f32 (!%p4500_p13), %v6182_v51, %v3707_v37  ;;  %v3817_v63 = vadd.f32 (!%p4500_p13), %v6182_v51, %v3709_v39  ;;  %v3745_v39 = vld [vmem:[#allocation2 + $0x138] sm:$0xff] (!%p4500_p13) }
 0x363   : > { %v3598_v4 = vadd.f32 %v4597_v60, %v490_v58  ;;  %v4599_v5 = vadd.f32 %v3495_v3, %v2949_v1  ;;  %v3497_v8 = vpop.f32.mrb[91].mxu0  ;;  %v3724_v58 = vld [vmem:[#allocation2 + $0x90] sm:$0xff] (!%p4500_p13)  ;;  %v3814_v60 = vadd.f32 (!%p4500_p13), %v6180_v50, %v3706_v36  ;;  %v3727_v1 = vld [vmem:[#allocation2 + $0xa8] sm:$0xff] (!%p4500_p13)  ;;  %v3729_v3 = vld [vmem:[#allocation2 + $0xb8] sm:$0xff] (!%p4500_p13) }
 0x364   : > { %v3599_v9 = vadd.f32 %v4598_v0, %v491_v62  ;;  %v4600_v10 = vadd.f32 %v3497_v8, %v2951_v6  ;;  %v3816_v62 = vadd.f32 (!%p4500_p13), %v6180_v50, %v3708_v38  ;;  %v3726_v0 = vld [vmem:[#allocation2 + $0xa0] sm:$0xff] (!%p4500_p13)  ;;  %v3820_v6 = vadd.f32 (!%p4500_p13), %v6180_v50, %v3712_v44  ;;  %3911 = vst [vmem:[%s5747_s8 + $0x8] sm:$0xff] (!%p4500_p13), %v3815_v61  ;;  %v3744_v38 = vld [vmem:[#allocation2 + $0x130] sm:$0xff] (!%p4500_p13)  ;;  %v3753_v61 = vld [vmem:[#allocation2 + $0x178] sm:$0xff] (!%p4500_p13) }
 0x365   : > { %3694 = vst [vmem:[#allocation2 + $0x2c0] sm:$0xff] %v3598_v4  ;;  %v3600_v11 = vadd.f32 %v4599_v5, %v492_v2  ;;  %v3728_v2 = vld [vmem:[#allocation2 + $0xb0] sm:$0xff] (!%p4500_p13)  ;;  %v3818_v4 = vadd.f32 (!%p4500_p13), %v6180_v50, %v3710_v42  ;;  %v3819_v5 = vadd.f32 (!%p4500_p13), %v6182_v51, %v3711_v43  ;;  %v3730_v8 = vld [vmem:[#allocation2 + $0xc0] sm:$0xff] (!%p4500_p13)  ;;  %3910 = vst [vmem:[%s5747_s8] sm:$0xff] (!%p4500_p13), %v3814_v60 }
 0x366   : > { %3695 = vst [vmem:[#allocation2 + $0x2c8] sm:$0xff] %v3599_v9  ;;  %v3601_v12 = vadd.f32 %v4600_v10, %v493_v7  ;;  %v3821_v7 = vadd.f32 (!%p4500_p13), %v6182_v51, %v3713_v45  ;;  %v3731_v9 = vld [vmem:[#allocation2 + $0xc8] sm:$0xff] (!%p4500_p13)  ;;  %v3732_v10 = vld [vmem:[#allocation2 + $0xd0] sm:$0xff] (!%p4500_p13)  ;;  %3912 = vst [vmem:[%s5747_s8 + $0x10] sm:$0xff] (!%p4500_p13), %v3816_v62  ;;  %v3834_v34 = vadd.f32 (!%p4500_p13), %v6180_v50, %v3726_v0 }
 0x367   : > { %3696 = vst [vmem:[#allocation2 + $0x2d0] sm:$0xff] %v3600_v11  ;;  %v2955_v13 = vpop.f32.mrb[92].mxu1  ;;  %v3733_v11 = vld [vmem:[#allocation2 + $0xd8] sm:$0xff] (!%p4500_p13)  ;;  %3913 = vst [vmem:[%s5747_s8 + $0x18] sm:$0xff] (!%p4500_p13), %v3817_v63  ;;  %v3835_v35 = vadd.f32 (!%p4500_p13), %v6182_v51, %v3727_v1  ;;  %v3836_v36 = vadd.f32 (!%p4500_p13), %v6180_v50, %v3728_v2  ;;  %v3837_v37 = vadd.f32 (!%p4500_p13), %v6182_v51, %v3729_v3  ;;  %v3747_v45 = vld [vmem:[#allocation2 + $0x148] sm:$0xff] (!%p4500_p13) }
 0x368   : > { %3697 = vst [vmem:[#allocation2 + $0x2d8] sm:$0xff] %v3601_v12  ;;  %v3501_v15 = vpop.f32.mrb[92].mxu0  ;;  %v2957_v17 = vpop.f32.mrb[93].mxu1  ;;  %v3822_v12 = vadd.f32 (!%p4500_p13), %v6180_v50, %v3714_v46  ;;  %3914 = vst [vmem:[%s5747_s8 + $0x20] sm:$0xff] (!%p4500_p13), %v3818_v4  ;;  %v3838_v41 = vadd.f32 (!%p4500_p13), %v6180_v50, %v3730_v8  ;;  %v3839_v42 = vadd.f32 (!%p4500_p13), %v6182_v51, %v3731_v9  ;;  %v3748_v46 = vld [vmem:[#allocation2 + $0x150] sm:$0xff] (!%p4500_p13)  ;;  %v3754_v62 = vld [vmem:[#allocation2 + $0x180] sm:$0xff] (!%p4500_p13) }
 0x369   : > { %v4601_v16 = vadd.f32 %v3501_v15, %v2955_v13  ;;  %v3503_v19 = vpop.f32.mrb[93].mxu0  ;;  %v2959_v21 = vpop.f32.mrb[94].mxu1  ;;  %v3823_v13 = vadd.f32 (!%p4500_p13), %v6182_v51, %v3715_v47  ;;  %v3825_v15 = vadd.f32 (!%p4500_p13), %v6182_v51, %v3717_v49  ;;  %3915 = vst [vmem:[%s5747_s8 + $0x28] sm:$0xff] (!%p4500_p13), %v3819_v5  ;;  %3916 = vst [vmem:[%s5747_s8 + $0x30] sm:$0xff] (!%p4500_p13), %v3820_v6  ;;  %v3749_v47 = vld [vmem:[#allocation2 + $0x158] sm:$0xff] (!%p4500_p13)  ;;  %v3755_v63 = vld [vmem:[#allocation2 + $0x188] sm:$0xff] (!%p4500_p13) }
 0x36a   : > { %v4602_v20 = vadd.f32 %v3503_v19, %v2957_v17  ;;  %v3505_v23 = vpop.f32.mrb[94].mxu0  ;;  %v2961_v26 = vpop.f32.mrb[95].mxu1  ;;  %3705 = sbr.rel (%p4500_p13) target bundleno = 923 (0x39b), region = 52  ;;  %v3735_v17 = vld [vmem:[#allocation2 + $0xe8] sm:$0xff] (!%p4500_p13)  ;;  %v3737_v19 = vld [vmem:[#allocation2 + $0xf8] sm:$0xff] (!%p4500_p13)  ;;  %3917 = vst [vmem:[%s5747_s8 + $0x38] sm:$0xff] (!%p4500_p13), %v3821_v7  ;;  %v3840_v43 = vadd.f32 (!%p4500_p13), %v6180_v50, %v3732_v10  ;;  %v3841_v44 = vadd.f32 (!%p4500_p13), %v6182_v51, %v3733_v11  ;;  %v3851_v1 = vadd.f32 (!%p4500_p13), %v6182_v51, %v3743_v33 }
 0x36b   : > { %v3602_v24 = vadd.f32 %v4601_v16, %v494_v14  ;;  %v4603_v25 = vadd.f32 %v3505_v23, %v2959_v21  ;;  %v3507_v28 = vpop.f32.mrb[95].mxu0  ;;  %v3824_v14 = vadd.f32 (!%p4500_p13), %v6180_v50, %v3716_v48  ;;  %v3734_v16 = vld [vmem:[#allocation2 + $0xe0] sm:$0xff] (!%p4500_p13)  ;;  %v3827_v21 = vadd.f32 (!%p4500_p13), %v6182_v51, %v3719_v53  ;;  %3918 = vst [vmem:[%s5747_s8 + $0x40] sm:$0xff] (!%p4500_p13), %v3822_v12  ;;  %v3756_v4 = vld [vmem:[#allocation2 + $0x190] sm:$0xff] (!%p4500_p13)  ;;  %v3757_v5 = vld [vmem:[#allocation2 + $0x198] sm:$0xff] (!%p4500_p13) }
 0x36c   : > { %v3603_v29 = vadd.f32 %v4602_v20, %v495_v18  ;;  %v4604_v30 = vadd.f32 %v3507_v28, %v2961_v26  ;;  %v3736_v18 = vld [vmem:[#allocation2 + $0xf0] sm:$0xff] (!%p4500_p13)  ;;  %v3826_v20 = vadd.f32 (!%p4500_p13), %v6180_v50, %v3718_v52  ;;  %v3829_v23 = vadd.f32 (!%p4500_p13), %v6182_v51, %v3721_v55  ;;  %3919 = vst [vmem:[%s5747_s8 + $0x48] sm:$0xff] (!%p4500_p13), %v3823_v13  ;;  %v3751_v55 = vld [vmem:[#allocation2 + $0x168] sm:$0xff] (!%p4500_p13)  ;;  %v3758_v6 = vld [vmem:[#allocation2 + $0x1a0] sm:$0xff] (!%p4500_p13) }
 0x36d   : > { %3698 = vst [vmem:[#allocation2 + $0x2e0] sm:$0xff] %v3602_v24  ;;  %v3604_v31 = vadd.f32 %v4603_v25, %v496_v22  ;;  %v3828_v22 = vadd.f32 (!%p4500_p13), %v6180_v50, %v3720_v54  ;;  %v3738_v24 = vld [vmem:[#allocation2 + $0x100] sm:$0xff] (!%p4500_p13)  ;;  %v3739_v25 = vld [vmem:[#allocation2 + $0x108] sm:$0xff] (!%p4500_p13)  ;;  %v3740_v26 = vld [vmem:[#allocation2 + $0x110] sm:$0xff] (!%p4500_p13)  ;;  %v3831_v28 = vadd.f32 (!%p4500_p13), %v6182_v51, %v3723_v57  ;;  %v3842_v48 = vadd.f32 (!%p4500_p13), %v6180_v50, %v3734_v16 }
 0x36e   : > { %3699 = vst [vmem:[#allocation2 + $0x2e8] sm:$0xff] %v3603_v29  ;;  %v3605_v32 = vadd.f32 %v4604_v30, %v497_v27  ;;  %3920 = vst [vmem:[%s5747_s8 + $0x50] sm:$0xff] (!%p4500_p13), %v3824_v14  ;;  %v3830_v27 = vadd.f32 (!%p4500_p13), %v6180_v50, %v3722_v56  ;;  %v3832_v29 = vadd.f32 (!%p4500_p13), %v6180_v50, %v3724_v58  ;;  %v3750_v54 = vld [vmem:[#allocation2 + $0x160] sm:$0xff] (!%p4500_p13)  ;;  %v3752_v56 = vld [vmem:[#allocation2 + $0x170] sm:$0xff] (!%p4500_p13) }
 0x36f   : > { %3700 = vst [vmem:[#allocation2 + $0x2f0] sm:$0xff] %v3604_v31  ;;  %3921 = vst [vmem:[%s5747_s8 + $0x58] sm:$0xff] (!%p4500_p13), %v3825_v15  ;;  %v3833_v30 = vadd.f32 (!%p4500_p13), %v6182_v51, %v3725_v59  ;;  %v3741_v31 = vld [vmem:[#allocation2 + $0x118] sm:$0xff] (!%p4500_p13)  ;;  %v3843_v49 = vadd.f32 (!%p4500_p13), %v6182_v51, %v3735_v17  ;;  %v3844_v52 = vadd.f32 (!%p4500_p13), %v6180_v50, %v3736_v18  ;;  %v3759_v11 = vld [vmem:[#allocation2 + $0x1a8] sm:$0xff] (!%p4500_p13) }
 0x370   : > { %3701 = vst [vmem:[#allocation2 + $0x2f8] sm:$0xff] %v3605_v32  ;;  %v3742_v32 = vld [vmem:[#allocation2 + $0x120] sm:$0xff] (!%p4500_p13)  ;;  %3922 = vst [vmem:[%s5747_s8 + $0x60] sm:$0xff] (!%p4500_p13), %v3826_v20  ;;  %v3845_v53 = vadd.f32 (!%p4500_p13), %v6182_v51, %v3737_v19  ;;  %v3846_v57 = vadd.f32 (!%p4500_p13), %v6180_v50, %v3738_v24  ;;  %v3847_v58 = vadd.f32 (!%p4500_p13), %v6182_v51, %v3739_v25  ;;  %v3760_v12 = vld [vmem:[#allocation2 + $0x1b0] sm:$0xff] (!%p4500_p13) }
 0x371   : > { %3923 = vst [vmem:[%s5747_s8 + $0x68] sm:$0xff] %v3827_v21  ;;  %3924 = vst [vmem:[%s5747_s8 + $0x70] sm:$0xff] %v3828_v22  ;;  %v3848_v59 = vadd.f32 %v6180_v50, %v3740_v26  ;;  %v3849_v60 = vadd.f32 %v6182_v51, %v3741_v31  ;;  %v3850_v0 = vadd.f32 %v6180_v50, %v3742_v32  ;;  %v3761_v13 = vld [vmem:[#allocation2 + $0x1b8] sm:$0xff]  ;;  %v3762_v18 = vld [vmem:[#allocation2 + $0x1c0] sm:$0xff] }
 0x372   : > { %3925 = vst [vmem:[%s5747_s8 + $0x78] sm:$0xff] %v3829_v23  ;;  %3926 = vst [vmem:[%s5747_s8 + $0x80] sm:$0xff] %v3830_v27  ;;  %v3852_v2 = vadd.f32 %v6180_v50, %v3744_v38  ;;  %v3853_v3 = vadd.f32 %v6182_v51, %v3745_v39  ;;  %v3854_v7 = vadd.f32 %v6180_v50, %v3746_v40  ;;  %v3763_v19 = vld [vmem:[#allocation2 + $0x1c8] sm:$0xff]  ;;  %v3764_v20 = vld [vmem:[#allocation2 + $0x1d0] sm:$0xff] }
 0x373   : > { %3927 = vst [vmem:[%s5747_s8 + $0x88] sm:$0xff] %v3831_v28  ;;  %3928 = vst [vmem:[%s5747_s8 + $0x90] sm:$0xff] %v3832_v29  ;;  %v3855_v8 = vadd.f32 %v6182_v51, %v3747_v45  ;;  %v3856_v9 = vadd.f32 %v6180_v50, %v3748_v46  ;;  %v3857_v10 = vadd.f32 %v6182_v51, %v3749_v47  ;;  %v3765_v25 = vld [vmem:[#allocation2 + $0x1d8] sm:$0xff]  ;;  %v3766_v26 = vld [vmem:[#allocation2 + $0x1e0] sm:$0xff] }
 0x374   : > { %3929 = vst [vmem:[%s5747_s8 + $0x98] sm:$0xff] %v3833_v30  ;;  %3930 = vst [vmem:[%s5747_s8 + $0xa0] sm:$0xff] %v3834_v34  ;;  %v3858_v14 = vadd.f32 %v6180_v50, %v3750_v54  ;;  %v3859_v15 = vadd.f32 %v6182_v51, %v3751_v55  ;;  %v3860_v16 = vadd.f32 %v6180_v50, %v3752_v56  ;;  %v3767_v27 = vld [vmem:[#allocation2 + $0x1e8] sm:$0xff]  ;;  %v3768_v32 = vld [vmem:[#allocation2 + $0x1f0] sm:$0xff] }
 0x375   : > { %3931 = vst [vmem:[%s5747_s8 + $0xa8] sm:$0xff] %v3835_v35  ;;  %3932 = vst [vmem:[%s5747_s8 + $0xb0] sm:$0xff] %v3836_v36  ;;  %v3861_v17 = vadd.f32 %v6182_v51, %v3753_v61  ;;  %v3862_v21 = vadd.f32 %v6180_v50, %v3754_v62  ;;  %v3863_v22 = vadd.f32 %v6182_v51, %v3755_v63  ;;  %v3769_v33 = vld [vmem:[#allocation2 + $0x1f8] sm:$0xff]  ;;  %v3770_v34 = vld [vmem:[#allocation2 + $0x200] sm:$0xff] }
 0x376   : > { %3933 = vst [vmem:[%s5747_s8 + $0xb8] sm:$0xff] %v3837_v37  ;;  %3934 = vst [vmem:[%s5747_s8 + $0xc0] sm:$0xff] %v3838_v41  ;;  %v3864_v23 = vadd.f32 %v6180_v50, %v3756_v4  ;;  %v3865_v24 = vadd.f32 %v6182_v51, %v3757_v5  ;;  %v3866_v28 = vadd.f32 %v6180_v50, %v3758_v6  ;;  %v3771_v39 = vld [vmem:[#allocation2 + $0x208] sm:$0xff]  ;;  %v3772_v40 = vld [vmem:[#allocation2 + $0x210] sm:$0xff] }
 0x377   : > { %3935 = vst [vmem:[%s5747_s8 + $0xc8] sm:$0xff] %v3839_v42  ;;  %3936 = vst [vmem:[%s5747_s8 + $0xd0] sm:$0xff] %v3840_v43  ;;  %v3867_v29 = vadd.f32 %v6182_v51, %v3759_v11  ;;  %v3868_v30 = vadd.f32 %v6180_v50, %v3760_v12  ;;  %v3869_v31 = vadd.f32 %v6182_v51, %v3761_v13  ;;  %v3773_v41 = vld [vmem:[#allocation2 + $0x218] sm:$0xff]  ;;  %v3774_v46 = vld [vmem:[#allocation2 + $0x220] sm:$0xff] }
 0x378   : > { %3937 = vst [vmem:[%s5747_s8 + $0xd8] sm:$0xff] %v3841_v44  ;;  %3938 = vst [vmem:[%s5747_s8 + $0xe0] sm:$0xff] %v3842_v48  ;;  %v3870_v35 = vadd.f32 %v6180_v50, %v3762_v18  ;;  %v3871_v36 = vadd.f32 %v6182_v51, %v3763_v19  ;;  %v3872_v37 = vadd.f32 %v6180_v50, %v3764_v20  ;;  %v3775_v47 = vld [vmem:[#allocation2 + $0x228] sm:$0xff]  ;;  %v3776_v48 = vld [vmem:[#allocation2 + $0x230] sm:$0xff] }
 0x379   : > { %3939 = vst [vmem:[%s5747_s8 + $0xe8] sm:$0xff] %v3843_v49  ;;  %3940 = vst [vmem:[%s5747_s8 + $0xf0] sm:$0xff] %v3844_v52  ;;  %v3873_v38 = vadd.f32 %v6182_v51, %v3765_v25  ;;  %v3874_v42 = vadd.f32 %v6180_v50, %v3766_v26  ;;  %v3875_v43 = vadd.f32 %v6182_v51, %v3767_v27  ;;  %v3777_v55 = vld [vmem:[#allocation2 + $0x238] sm:$0xff]  ;;  %v3778_v56 = vld [vmem:[#allocation2 + $0x240] sm:$0xff] }
 0x37a   : > { %3941 = vst [vmem:[%s5747_s8 + $0xf8] sm:$0xff] %v3845_v53  ;;  %3942 = vst [vmem:[%s5747_s8 + $0x100] sm:$0xff] %v3846_v57  ;;  %v3876_v44 = vadd.f32 %v6180_v50, %v3768_v32  ;;  %v3877_v45 = vadd.f32 %v6182_v51, %v3769_v33  ;;  %v3878_v49 = vadd.f32 %v6180_v50, %v3770_v34  ;;  %v3779_v57 = vld [vmem:[#allocation2 + $0x248] sm:$0xff]  ;;  %v3780_v62 = vld [vmem:[#allocation2 + $0x250] sm:$0xff] }
 0x37b   : > { %3943 = vst [vmem:[%s5747_s8 + $0x108] sm:$0xff] %v3847_v58  ;;  %3944 = vst [vmem:[%s5747_s8 + $0x110] sm:$0xff] %v3848_v59  ;;  %v3879_v52 = vadd.f32 %v6182_v51, %v3771_v39  ;;  %v3880_v53 = vadd.f32 %v6180_v50, %v3772_v40  ;;  %v3881_v54 = vadd.f32 %v6182_v51, %v3773_v41  ;;  %v3781_v63 = vld [vmem:[#allocation2 + $0x258] sm:$0xff]  ;;  %v3783_v5 = vld [vmem:[#allocation2 + $0x268] sm:$0xff] }
 0x37c   : > { %3945 = vst [vmem:[%s5747_s8 + $0x118] sm:$0xff] %v3849_v60  ;;  %3946 = vst [vmem:[%s5747_s8 + $0x120] sm:$0xff] %v3850_v0  ;;  %v3882_v58 = vadd.f32 %v6180_v50, %v3774_v46  ;;  %v3883_v59 = vadd.f32 %v6182_v51, %v3775_v47  ;;  %v3884_v60 = vadd.f32 %v6180_v50, %v3776_v48  ;;  %v3782_v0 = vld [vmem:[#allocation2 + $0x260] sm:$0xff]  ;;  %v3784_v6 = vld [vmem:[#allocation2 + $0x270] sm:$0xff] }
 0x37d   : > { %3947 = vst [vmem:[%s5747_s8 + $0x128] sm:$0xff] %v3851_v1  ;;  %3948 = vst [vmem:[%s5747_s8 + $0x130] sm:$0xff] %v3852_v2  ;;  %v3885_v61 = vadd.f32 %v6182_v51, %v3777_v55  ;;  %v3886_v1 = vadd.f32 %v6180_v50, %v3778_v56  ;;  %v3887_v2 = vadd.f32 %v6182_v51, %v3779_v57  ;;  %v3786_v12 = vld [vmem:[#allocation2 + $0x280] sm:$0xff]  ;;  %v3787_v13 = vld [vmem:[#allocation2 + $0x288] sm:$0xff] }
 0x37e   : > { %3949 = vst [vmem:[%s5747_s8 + $0x138] sm:$0xff] %v3853_v3  ;;  %3950 = vst [vmem:[%s5747_s8 + $0x140] sm:$0xff] %v3854_v7  ;;  %v3888_v3 = vadd.f32 %v6180_v50, %v3780_v62  ;;  %v3889_v4 = vadd.f32 %v6182_v51, %v3781_v63  ;;  %v3785_v7 = vld [vmem:[#allocation2 + $0x278] sm:$0xff]  ;;  %v3790_v19 = vld [vmem:[#allocation2 + $0x2a0] sm:$0xff] }
 0x37f   : > { %3951 = vst [vmem:[%s5747_s8 + $0x148] sm:$0xff] %v3855_v8  ;;  %3952 = vst [vmem:[%s5747_s8 + $0x150] sm:$0xff] %v3856_v9  ;;  %v3890_v8 = vadd.f32 %v6180_v50, %v3782_v0  ;;  %v3891_v9 = vadd.f32 %v6182_v51, %v3783_v5  ;;  %v3893_v11 = vadd.f32 %v6182_v51, %v3785_v7  ;;  %v3789_v18 = vld [vmem:[#allocation2 + $0x298] sm:$0xff]  ;;  %v3791_v20 = vld [vmem:[#allocation2 + $0x2a8] sm:$0xff] }
 0x380   : > { %3953 = vst [vmem:[%s5747_s8 + $0x158] sm:$0xff] %v3857_v10  ;;  %3954 = vst [vmem:[%s5747_s8 + $0x160] sm:$0xff] %v3858_v14  ;;  %v3892_v10 = vadd.f32 %v6180_v50, %v3784_v6  ;;  %v3788_v14 = vld [vmem:[#allocation2 + $0x290] sm:$0xff]  ;;  %v3793_v25 = vld [vmem:[#allocation2 + $0x2b8] sm:$0xff] }
 0x381   : > { %3955 = vst [vmem:[%s5747_s8 + $0x168] sm:$0xff] %v3859_v15  ;;  %3956 = vst [vmem:[%s5747_s8 + $0x170] sm:$0xff] %v3860_v16  ;;  %v3894_v15 = vadd.f32 %v6180_v50, %v3786_v12  ;;  %v3895_v16 = vadd.f32 %v6182_v51, %v3787_v13  ;;  %v3794_v26 = vld [vmem:[#allocation2 + $0x2c0] sm:$0xff]  ;;  %v3797_v32 = vld [vmem:[#allocation2 + $0x2d8] sm:$0xff] }
 0x382   : > { %3957 = vst [vmem:[%s5747_s8 + $0x178] sm:$0xff] %v3861_v17  ;;  %3958 = vst [vmem:[%s5747_s8 + $0x180] sm:$0xff] %v3862_v21  ;;  %v3896_v17 = vadd.f32 %v6180_v50, %v3788_v14  ;;  %v3897_v21 = vadd.f32 %v6182_v51, %v3789_v18 }
 0x383   : > { %3959 = vst [vmem:[%s5747_s8 + $0x188] sm:$0xff] %v3863_v22  ;;  %3960 = vst [vmem:[%s5747_s8 + $0x190] sm:$0xff] %v3864_v23  ;;  %v3898_v22 = vadd.f32 %v6180_v50, %v3790_v19  ;;  %v3899_v23 = vadd.f32 %v6182_v51, %v3791_v20 }
 0x384   : > { %3961 = vst [vmem:[%s5747_s8 + $0x198] sm:$0xff] %v3865_v24  ;;  %3962 = vst [vmem:[%s5747_s8 + $0x1a0] sm:$0xff] %v3866_v28  ;;  %v3792_v24 = vld [vmem:[#allocation2 + $0x2b0] sm:$0xff]  ;;  %v3901_v28 = vadd.f32 %v6182_v51, %v3793_v25 }
 0x385   : > { %3963 = vst [vmem:[%s5747_s8 + $0x1a8] sm:$0xff] %v3867_v29  ;;  %3964 = vst [vmem:[%s5747_s8 + $0x1b0] sm:$0xff] %v3868_v30  ;;  %v3900_v27 = vadd.f32 %v6180_v50, %v3792_v24  ;;  %v3902_v29 = vadd.f32 %v6180_v50, %v3794_v26  ;;  %v3795_v30 = vld [vmem:[#allocation2 + $0x2c8] sm:$0xff] }
 0x386   : > { %3965 = vst [vmem:[%s5747_s8 + $0x1b8] sm:$0xff] %v3869_v31  ;;  %3966 = vst [vmem:[%s5747_s8 + $0x1c0] sm:$0xff] %v3870_v35  ;;  %v3796_v31 = vld [vmem:[#allocation2 + $0x2d0] sm:$0xff]  ;;  %v3903_v33 = vadd.f32 %v6182_v51, %v3795_v30  ;;  %v3905_v35 = vadd.f32 %v6182_v51, %v3797_v32 }
 0x387   : > { %3967 = vst [vmem:[%s5747_s8 + $0x1c8] sm:$0xff] %v3871_v36  ;;  %3968 = vst [vmem:[%s5747_s8 + $0x1d0] sm:$0xff] %v3872_v37  ;;  %v3904_v34 = vadd.f32 %v6180_v50, %v3796_v31  ;;  %v3798_v36 = vld [vmem:[#allocation2 + $0x2e0] sm:$0xff]  ;;  %v3799_v37 = vld [vmem:[#allocation2 + $0x2e8] sm:$0xff] }
 0x388   : > { %3969 = vst [vmem:[%s5747_s8 + $0x1d8] sm:$0xff] %v3873_v38  ;;  %3970 = vst [vmem:[%s5747_s8 + $0x1e0] sm:$0xff] %v3874_v42  ;;  %v3800_v38 = vld [vmem:[#allocation2 + $0x2f0] sm:$0xff]  ;;  %v3906_v39 = vadd.f32 %v6180_v50, %v3798_v36  ;;  %v3907_v40 = vadd.f32 %v6182_v51, %v3799_v37  ;;  %v3801_v42 = vld [vmem:[#allocation2 + $0x2f8] sm:$0xff] }
 0x389   : > { %3971 = vst [vmem:[%s5747_s8 + $0x1e8] sm:$0xff] %v3875_v43  ;;  %3972 = vst [vmem:[%s5747_s8 + $0x1f0] sm:$0xff] %v3876_v44  ;;  %v3908_v41 = vadd.f32 %v6180_v50, %v3800_v38  ;;  %v3909_v43 = vadd.f32 %v6182_v51, %v3801_v42 }
 0x38a   : > { %3973 = vst [vmem:[%s5747_s8 + $0x1f8] sm:$0xff] %v3877_v45  ;;  %3974 = vst [vmem:[%s5747_s8 + $0x200] sm:$0xff] %v3878_v49 }
 0x38b   : > { %3975 = vst [vmem:[%s5747_s8 + $0x208] sm:$0xff] %v3879_v52  ;;  %3976 = vst [vmem:[%s5747_s8 + $0x210] sm:$0xff] %v3880_v53 }
 0x38c   : > { %3977 = vst [vmem:[%s5747_s8 + $0x218] sm:$0xff] %v3881_v54  ;;  %3978 = vst [vmem:[%s5747_s8 + $0x220] sm:$0xff] %v3882_v58 }
 0x38d   : > { %3979 = vst [vmem:[%s5747_s8 + $0x228] sm:$0xff] %v3883_v59  ;;  %3980 = vst [vmem:[%s5747_s8 + $0x230] sm:$0xff] %v3884_v60 }
 0x38e   : > { %3981 = vst [vmem:[%s5747_s8 + $0x238] sm:$0xff] %v3885_v61  ;;  %3982 = vst [vmem:[%s5747_s8 + $0x240] sm:$0xff] %v3886_v1 }
 0x38f   : > { %3983 = vst [vmem:[%s5747_s8 + $0x248] sm:$0xff] %v3887_v2  ;;  %3984 = vst [vmem:[%s5747_s8 + $0x250] sm:$0xff] %v3888_v3 }
 0x390   : > { %3985 = vst [vmem:[%s5747_s8 + $0x258] sm:$0xff] %v3889_v4  ;;  %3986 = vst [vmem:[%s5747_s8 + $0x260] sm:$0xff] %v3890_v8 }
 0x391   : > { %3987 = vst [vmem:[%s5747_s8 + $0x268] sm:$0xff] %v3891_v9  ;;  %3988 = vst [vmem:[%s5747_s8 + $0x270] sm:$0xff] %v3892_v10 }
 0x392   : > { %3989 = vst [vmem:[%s5747_s8 + $0x278] sm:$0xff] %v3893_v11  ;;  %3990 = vst [vmem:[%s5747_s8 + $0x280] sm:$0xff] %v3894_v15 }
 0x393   : > { %3991 = vst [vmem:[%s5747_s8 + $0x288] sm:$0xff] %v3895_v16  ;;  %3992 = vst [vmem:[%s5747_s8 + $0x290] sm:$0xff] %v3896_v17 }
 0x394   : > { %3993 = vst [vmem:[%s5747_s8 + $0x298] sm:$0xff] %v3897_v21  ;;  %3994 = vst [vmem:[%s5747_s8 + $0x2a0] sm:$0xff] %v3898_v22 }
 0x395   : > { %3995 = vst [vmem:[%s5747_s8 + $0x2a8] sm:$0xff] %v3899_v23  ;;  %3996 = vst [vmem:[%s5747_s8 + $0x2b0] sm:$0xff] %v3900_v27 }
 0x396   : > { %3997 = vst [vmem:[%s5747_s8 + $0x2b8] sm:$0xff] %v3901_v28  ;;  %3998 = vst [vmem:[%s5747_s8 + $0x2c0] sm:$0xff] %v3902_v29 }
 0x397   : > { %3999 = vst [vmem:[%s5747_s8 + $0x2c8] sm:$0xff] %v3903_v33  ;;  %4000 = vst [vmem:[%s5747_s8 + $0x2d0] sm:$0xff] %v3904_v34 }
 0x398   : > { %4001 = vst [vmem:[%s5747_s8 + $0x2d8] sm:$0xff] %v3905_v35  ;;  %4002 = vst [vmem:[%s5747_s8 + $0x2e0] sm:$0xff] %v3906_v39 }
 0x399   : > { %4003 = vst [vmem:[%s5747_s8 + $0x2e8] sm:$0xff] %v3907_v40  ;;  %4004 = vst [vmem:[%s5747_s8 + $0x2f0] sm:$0xff] %v3908_v41 }
 0x39a   : > { %4005 = vst [vmem:[%s5747_s8 + $0x2f8] sm:$0xff] %v3909_v43 }
 0x39b PF: > { %s6517_s18 = sld [smem:[#allocation17_spill]]  ;;  %s6518_s9 = sld [smem:[#allocation24_spill]] }
 0x39c   : > { %s4023_s0 = sshll.u32 %s5747_s8, 4  ;;  %s4007_s1 = scalar_lea.sflag [#allocation5], %s5737_s28  ;;  %s6383_s0 = int_to_ptr.vmem [resolvable:$true] %s4023_s0 }
 0x39d   : > { %s5228_s22 = scalar_lea.vmem %s6383_s0, 12288  ;;  %p6519_p10 = scmp.ne.s32.totalorder %s6506_s2, 0 }
 0x39e   : > { %p5229_p3 = scmp.ne.s32.totalorder %s6383_s0, %s5228_s22  ;;  %s5394_s26 = smov [#allocation9]  }
 0x39f   : > { %s5232_s3 = sshll.u32 %s5394_s26, 4  ;;  %s5233_s3 = int_to_ptr.vmem [resolvable:$false] %s5232_s3 }
 0x3a0   : > { %p5230_p4 = pnand %p5229_p3, %p6519_p10  ;;  %s5234_s21 = scalar_lea.vmem %s5233_s3, 24576 }
 0x3a1   : > { %s4508_s5 = sshll.u32 %s6517_s18, 8  ;;  %p5235_p0 = scmp.lt.s32.totalorder %s6383_s0, %s5233_s3 }
 0x3a2   : > { %s6380_s27 = scalar_lea.hbm %s6518_s9, %s4508_s5  ;;  %p5231_p8 = pneg %p5230_p4 }
 0x3a3   : > { %p5236_p2 = scmp.lt.s32.totalorder %s5234_s21, %s5228_s22 }
 0x3a5   : > { %p5237_p1 = por %p5236_p2, %p5235_p0 }
 0x3a7   : > { %p5238_p11 = pnand %p5237_p1, %p5231_p8 }
 0x3a9   : > { %5241 = shalt.err (!%p5238_p11)
}
 0x3aa   : > { %s5242_s6 = scalar_lea.hbm %s6380_s27, 12288  ;;  %s5246_s29 = scalar_lea.hbm %s6518_s9, 24576 }
 0x3ab   : > { %p5243_p6 = scmp.ne.s32.totalorder %s6380_s27, %s5242_s6  ;;  %p5247_p12 = scmp.lt.u32.totalorder %s6380_s27, %s6518_s9 }
 0x3ac   : > { %p5248_p7 = scmp.lt.u32.totalorder %s5246_s29, %s5242_s6  ;;  %p5250_p3 = scmp.lt.u32.totalorder %s5242_s6, %s6380_s27 }
 0x3ad   : > { %p5244_p9 = pnand %p5243_p6, %p6519_p10 }
 0x3ae   : > { %p5249_p13 = por %p5248_p7, %p5247_p12 }
 0x3af   : > { %p5245_p5 = pneg %p5244_p9 }
 0x3b0   : > { %p5251_p4 = por %p5250_p3, %p5249_p13 }
 0x3b2   : > { %p5252_p8 = pnand %p5251_p4, %p5245_p5 }
 0x3b4   : > { %5255 = shalt.err (!%p5252_p8)
}
 0x3b5   : > { %s5395_s10 = smov 256   ;;  %s5396_s24 = smov 512  }
 0x3b6   : > { %s5397_s22 = smov 16  }
 0x3b7   : > { %4806 = dma.vmem_to_hbm [thread:$0]  (%p6519_p10), %s6383_s0, 12288, %s6380_s27, %s4007_s1, %s5395_s10, %s5396_s24, %s5397_s22  }
 0x3b8 PF: > { %s6520_s26 = sld [smem:[#allocation14_spill]]  ;;  %p4823_p0 = scmp.ge.s32.totalorder %s5382_s25, 2 }
 0x3b9   : > { %p6521_p2 = scmp.ne.s32.totalorder %s6507_s4, 0 }
 0x3bb   : > { %p4819_p1 = pnand %p4823_p0, %p6521_p2 }
 0x3be   : > { %s4038_s3 = sand.u32 1, %s6520_s26  }
 0x3bf   : > { %s4039_s21 = scalar_lea.sflag [#allocation5], %s4038_s3 }
 0x3c0   : > { %5325 = dma.done.wait (!%p4819_p1), %s4039_s21, 12288  }
 0x3c1   : > { %5327 = vsyncadd (!%p4819_p1), %s4039_s21, 4294955008  ;;  %s22_s25 = sadd.s32 1, %s5382_s25   ;;  %s6523_s22 = sld [smem:[#allocation18_spill]] }
 0x3c2   : > { %p6414_p11 = scmp.ge.s32.totalorder %s22_s25, 6   ;;  %s6524_s2 = sld [smem:[#allocation19_spill]] }
 0x3c3   : > { %s6525_s24 = sld [smem:[#allocation20_spill]]  ;;  %s6526_s12 = smov %s5334_s13 }
 0x3c4   : > { %s6527_s13 = smov %s5338_s14  ;;  %s6528_s14 = smov %s5659_s15 }
 0x3c5   : > { %s6529_s15 = smov %s5346_s16  ;;  %s6530_s16 = smov %s5350_s17 }
 0x3c6   : > { %s6531_s17 = smov %s5524_s11  ;;  %s6532_s18 = smov %s5358_s19 }
 0x3c7   : > { %s6533_s19 = smov %s5362_s20  ;;  %s6534_s20 = smov %s5585_s7 }
 0x3c8   : > { %s6535_s21 = smov %s5374_s23  ;;  %s6536_s23 = smov %s6524_s2 }
 0x3c9   :  { %21 = sbr.rel (!%p6414_p11) target bundleno = 17 (0x11), region = 109 }
 0x3d0   :  { %4044 = vsyncpa [#allocation4], 1 }
 0x3d1   :  { %4046 = vsyncpa [#allocation4 + $0x1], 1 }
 0x3d2   :  { %4047 = vsyncpa [#allocation7], 1 }
 0x3d3   :  { %4049 = vsyncpa [#allocation7 + $0x1], 1 }
 0x3d4   :  { %4050 = vsyncpa [#allocation5], 1 }
 0x3d5   :  { %4052 = vsyncpa [#allocation5 + $0x1], 1 }

</bundles_post_ra>
